<compile_context>
chip_gen: v7x
topology: tpu7x:2x2x1
jax: 0.10.0
libtpu: 0.0.40
codegen_flags: <defaults>
</compile_context>

<pallas_src>
from functools import partial

import jax
import jax.numpy as jnp
from jax.experimental import pallas as pl
from jax.experimental.pallas import tpu as pltpu

HIDDEN = 64  # hidden_dim (module default)


# ---------------------------------------------------------------------------
# Fused Pallas kernel: 2 HeteroConv layers + mean pooling (one grid step =
# `graphs_per_block` graphs).
# ---------------------------------------------------------------------------
def _fused_forward_kernel(x_s_ref, x_g_ref, a_ss_ref, a_gg_ref, a_sg_ref,
                          a_gs_ref, p_s_ref, p_g_ref, w_s_ref, w_g_ref,
                          b_s_ref, b_g_ref, z_ref):
  """Per grid step.

  x_s_ref : [BG, NS, H]  bf16 state features (layer-1 feats zero-padded to H)
  x_g_ref : [BG, NG, H]  bf16 goal features
  a_ss    : [BG, NS, NS] bf16 GCN-normalized state->state adjacency (per graph)
  a_gg    : [BG, NG, NG] bf16 GCN-normalized goal->goal adjacency
  a_sg    : [BG, NG, NS] bf16 mean-agg state->goal (rows = dst goal nodes)
  a_gs    : [BG, NS, NG] bf16 mean-agg goal->state (rows = dst state nodes)
  p_s/p_g : [BG, 1, N]   bf16 mean-pool row vectors
  w_s/w_g : [2, 3H, H]   bf16 packed [0.5*W_sage_self; 0.5*W_gcn; 0.5*W_sage_cross]
  b_s/b_g : [2, 1, H]    f32  packed 0.5*(b_gcn + b_sage)
  z_ref   : [BG, 1, 2H]  f32  pooled [state | goal] features (lane-dense output)
  """
  f32, bf16 = jnp.float32, jnp.bfloat16
  xs = x_s_ref[...]
  xg = x_g_ref[...]
  a_ss = a_ss_ref[...]
  a_gg = a_gg_ref[...]
  a_sg = a_sg_ref[...]
  a_gs = a_gs_ref[...]
  bg, nsp, h = xs.shape
  ngp = xg.shape[1]

  def hetero_layer(xs, xg, l):
    # Per-graph aggregations (batched MXU matmuls, adjacencies stay in VMEM).
    agg_ss = jnp.einsum('bij,bjh->bih', a_ss, xs, preferred_element_type=f32).astype(bf16)
    agg_gs = jnp.einsum('bij,bjh->bih', a_gs, xg, preferred_element_type=f32).astype(bf16)
    agg_gg = jnp.einsum('bij,bjh->bih', a_gg, xg, preferred_element_type=f32).astype(bf16)
    agg_sg = jnp.einsum('bij,bjh->bih', a_sg, xs, preferred_element_type=f32).astype(bf16)
    # One wide shared projection per node type: K = 3H, M = BG * n rows.
    cat_s = jnp.concatenate([xs, agg_ss, agg_gs], axis=-1).reshape(bg * nsp, 3 * h)
    cat_g = jnp.concatenate([xg, agg_gg, agg_sg], axis=-1).reshape(bg * ngp, 3 * h)
    new_s = jnp.dot(cat_s, w_s_ref[l], preferred_element_type=f32) + b_s_ref[l]
    new_g = jnp.dot(cat_g, w_g_ref[l], preferred_element_type=f32) + b_g_ref[l]
    return (new_s.astype(bf16).reshape(bg, nsp, h),
            new_g.astype(bf16).reshape(bg, ngp, h))

  # Two hetero layers, statically unrolled (weights statically indexed).
  xs, xg = hetero_layer(xs, xg, 0)
  xs, xg = hetero_layer(xs, xg, 1)

  # global_mean_pool per graph: [BG,1,n] @ [BG,n,H] -> [BG,1,H]; output is the
  # lane-dense [BG,1,2H] pooled tensor (final Linear(2H+1,1) done in wrapper).
  s = jnp.einsum('bij,bjh->bih', p_s_ref[...], xs, preferred_element_type=f32)
  g = jnp.einsum('bij,bjh->bih', p_g_ref[...], xg, preferred_element_type=f32)
  z_ref[...] = jnp.concatenate([s, g], axis=-1)


# ---------------------------------------------------------------------------
# Wrapper: single pallas_call over a parallel graph-block grid + tiny head.
# ---------------------------------------------------------------------------
@partial(jax.jit, static_argnames=("graphs_per_block",))
def hetero_gnn_forward(x_s, x_g, a_ss, a_gg, a_sg, a_gs, p_s, p_g, depth,
                       packed, *, graphs_per_block=16):
  h = packed["b_s"].shape[-1]
  b = x_s.shape[0]
  bg = graphs_per_block
  assert b % bg == 0, "batch (num graphs) must be divisible by graphs_per_block"

  bf16 = jnp.bfloat16

  def pad_feat(x):  # zero-pad layer-1 feature columns to H (exact, see packing)
    return jnp.pad(x, ((0, 0), (0, 0), (0, h - x.shape[-1]))).astype(bf16)

  args = (pad_feat(x_s), pad_feat(x_g),
          a_ss.astype(bf16), a_gg.astype(bf16), a_sg.astype(bf16), a_gs.astype(bf16),
          p_s.astype(bf16), p_g.astype(bf16),
          packed["w_s"], packed["w_g"], packed["b_s"], packed["b_g"])

  def graph_block(arr):   # blocked along the graph axis
    return pl.BlockSpec((bg,) + arr.shape[1:], lambda i: (0, 0, 0)[:arr.ndim - 1] and (i, 0, 0))

  # (explicit, readable versions of the index maps)
  def blk3(arr):
    return pl.BlockSpec((bg,) + arr.shape[1:], lambda i: (i, 0, 0))

  def full_resident(arr):  # constant index_map -> stays VMEM-resident across steps
    return pl.BlockSpec(arr.shape, lambda i: (0, 0, 0))

  in_specs = [blk3(a) for a in args[:8]] + [full_resident(a) for a in args[8:]]

  z3 = pl.pallas_call(
      _fused_forward_kernel,
      grid=(b // bg,),
      out_shape=jax.ShapeDtypeStruct((b, 1, 2 * h), jnp.float32),
      in_specs=in_specs,
      out_specs=pl.BlockSpec((bg, 1, 2 * h), lambda i: (i, 0, 0)),
      compiler_params=pltpu.CompilerParams(
          dimension_semantics=("parallel",),          # dual-TC on v7x
          vmem_limit_bytes=32 * 1024 * 1024,          # explicit (v5e default is 16 MiB)
      ),
  )(*args)

  # Tiny (2H+1)->1 head linear in the wrapper (keeps kernel output lane-dense).
  z = jnp.concatenate([z3[:, 0, :], depth[:, None]], axis=-1)   # [B, 2H+1]
  return (z @ packed["w_out"] + packed["b_out"])[:, 0]           # .squeeze(-1)


# ---------------------------------------------------------------------------
# Parameter packing (done ONCE at init, outside the jitted forward).
# ---------------------------------------------------------------------------
def _pad_rows(w, rows):
  return jnp.zeros((rows, w.shape[1]), jnp.float32).at[:w.shape[0], :].set(w)


def pack_params(params, h):
  """Pack per-(layer, target) weights into [2, 3H, H]; fold the HeteroConv 0.5.

  Row order matches the kernel concat order [x_dst, gcn_agg, sage_cross_agg]:
    target 'state': [W_r(gs)   ; W_gcn(ss) ; W_l(gs)]
    target 'goal' : [W_r(sg)   ; W_gcn(gg) ; W_l(sg)]
  """
  w_s, w_g, b_s, b_g = [], [], [], []
  for p in params["layers"]:
    w_s.append(0.5 * jnp.concatenate([_pad_rows(p["wr_gs"], h),
                                      _pad_rows(p["w_gcn_ss"], h),
                                      _pad_rows(p["wl_gs"], h)], axis=0))
    w_g.append(0.5 * jnp.concatenate([_pad_rows(p["wr_sg"], h),
                                      _pad_rows(p["w_gcn_gg"], h),
                                      _pad_rows(p["wl_sg"], h)], axis=0))
    b_s.append(0.5 * (p["b_gcn_ss"] + p["b_gs"]))
    b_g.append(0.5 * (p["b_gcn_gg"] + p["b_sg"]))
  return dict(
      w_s=jnp.stack(w_s).astype(jnp.bfloat16),   # [2, 3H, H]
      w_g=jnp.stack(w_g).astype(jnp.bfloat16),   # [2, 3H, H]
      b_s=jnp.stack(b_s),                        # [2, 1, H] f32
      b_g=jnp.stack(b_g),                        # [2, 1, H] f32
      w_out=params["w_out"],                     # [2H+1, 1] f32
      b_out=params["b_out"])                     # [1, 1]    f32


# ---------------------------------------------------------------------------
# Graph glue: dense per-graph operators (plain JAX, not the hot path)
# ---------------------------------------------------------------------------
def gcn_norm_batched(adj):                # adj [B, n, n] 0/1, zero diagonal
  a = adj + jnp.eye(adj.shape[-1], dtype=jnp.float32)[None]   # add_self_loops
  deg = jnp.sum(a, axis=-1)
  dinv = jax.lax.rsqrt(deg)
  return dinv[..., :, None] * a * dinv[..., None, :]          # D^-1/2 (A+I) D^-1/2


def mean_agg_batched(inc):                # inc [B, n_dst, n_src] 0/1
  deg = jnp.sum(inc, axis=-1, keepdims=True)
  return jnp.where(deg > 0, inc / jnp.maximum(deg, 1.0), 0.0)


# ---------------------------------------------------------------------------
# Deterministic parameter init (PyTorch-Linear-style uniform bounds)
# ---------------------------------------------------------------------------
def _linear(key, fan_in, fan_out, bias=True):
  kw, kb = jax.random.split(key)
  bound = 1.0 / float(fan_in) ** 0.5
  w = jax.random.uniform(kw, (fan_in, fan_out), jnp.float32, -bound, bound)
  if not bias:
    return w
  b = jax.random.uniform(kb, (1, fan_out), jnp.float32, -bound, bound)
  return w, b


def init_layer_params(key, f_s, f_g, h):
  ks = jax.random.split(key, 6)
  w_gcn_ss, b_gcn_ss = _linear(ks[0], f_s, h)
  w_gcn_gg, b_gcn_gg = _linear(ks[1], f_g, h)
  wl_sg, b_sg = _linear(ks[2], f_s, h)          # SAGE s->g: lin_l over src (state), bias
  wr_sg = _linear(ks[3], f_g, h, bias=False)    #            lin_r over dst (goal)
  wl_gs, b_gs = _linear(ks[4], f_g, h)          # SAGE g->s: lin_l over src (goal), bias
  wr_gs = _linear(ks[5], f_s, h, bias=False)    #            lin_r over dst (state)
  return dict(w_gcn_ss=w_gcn_ss, b_gcn_ss=b_gcn_ss,
              w_gcn_gg=w_gcn_gg, b_gcn_gg=b_gcn_gg,
              wl_sg=wl_sg, wr_sg=wr_sg, b_sg=b_sg,
              wl_gs=wl_gs, wr_gs=wr_gs, b_gs=b_gs)


def init_params(key, f_s, f_g, h):
  k1, k2, k3 = jax.random.split(key, 3)
  layers = [init_layer_params(k1, f_s, f_g, h),   # layer 1: lazy in-dims = (f_s, f_g)
            init_layer_params(k2, h, h, h)]        # layer 2: in-dims = hidden
  w_out, b_out = _linear(k3, 2 * h + 1, 1)         # self.out = Linear(2H+1, 1)
  return dict(layers=layers, w_out=w_out, b_out=b_out)


# ---------------------------------------------------------------------------
if __name__ == "__main__":
  key = jax.random.PRNGKey(0)
  k_xs, k_xg, k_ass, k_agg, k_inc, k_p = jax.random.split(key, 6)

  # B graphs, each with NSp state and NGp goal nodes (node counts kept sublane-
  # aligned; grid = B / GRAPHS_PER_BLOCK parallel steps).
  B, NSp, NGp, FS, FG = 32, 16, 16, 8, 12
  H = HIDDEN
  GRAPHS_PER_BLOCK = 16

  x_s = jax.random.normal(k_xs, (B, NSp, FS), jnp.float32)
  x_g = jax.random.normal(k_xg, (B, NGp, FG), jnp.float32)

  adj_ss = (jax.random.uniform(k_ass, (B, NSp, NSp)) < 0.25).astype(jnp.float32)
  adj_ss = adj_ss * (1.0 - jnp.eye(NSp, dtype=jnp.float32))
  adj_gg = (jax.random.uniform(k_agg, (B, NGp, NGp)) < 0.25).astype(jnp.float32)
  adj_gg = adj_gg * (1.0 - jnp.eye(NGp, dtype=jnp.float32))
  inc_sg = (jax.random.uniform(k_inc, (B, NGp, NSp)) < 0.3).astype(jnp.float32)  # dst=goal
  inc_gs = jnp.swapaxes(inc_sg, 1, 2)                                            # rev_matches

  a_ss = gcn_norm_batched(adj_ss)       # [B, NSp, NSp]
  a_gg = gcn_norm_batched(adj_gg)       # [B, NGp, NGp]
  a_sg = mean_agg_batched(inc_sg)       # [B, NGp, NSp]
  a_gs = mean_agg_batched(inc_gs)       # [B, NSp, NGp]
  p_s = jnp.full((B, 1, NSp), 1.0 / NSp, jnp.float32)   # global_mean_pool weights
  p_g = jnp.full((B, 1, NGp), 1.0 / NGp, jnp.float32)
  depth = (jnp.arange(B, dtype=jnp.float32) % 7.0) + 1.0  # data.depth, per graph

  params = init_params(k_p, FS, FG, H)
  packed = pack_params(params, H)       # packed ONCE, outside the jitted forward

  out = hetero_gnn_forward(x_s, x_g, a_ss, a_gg, a_sg, a_gs, p_s, p_g, depth,
                           packed, graphs_per_block=GRAPHS_PER_BLOCK)
  out = jax.block_until_ready(out)
  assert out.shape == (B,)

  # Pure-JAX f32 reference (unpacked params, original GCN/SAGE/HeteroConv math).
  def ref_forward():
    xs, xg = x_s, x_g
    for p in params["layers"]:
      gcn_s = jnp.einsum('bij,bjf->bif', a_ss, xs) @ p["w_gcn_ss"] + p["b_gcn_ss"]
      sage_s = (jnp.einsum('bij,bjf->bif', a_gs, xg) @ p["wl_gs"] + p["b_gs"]
                + xs @ p["wr_gs"])
      gcn_g = jnp.einsum('bij,bjf->bif', a_gg, xg) @ p["w_gcn_gg"] + p["b_gcn_gg"]
      sage_g = (jnp.einsum('bij,bjf->bif', a_sg, xs) @ p["wl_sg"] + p["b_sg"]
                + xg @ p["wr_sg"])
      xs, xg = 0.5 * (gcn_s + sage_s), 0.5 * (gcn_g + sage_g)
    s = xs.mean(axis=1)
    g = xg.mean(axis=1)
    z = jnp.concatenate([s, g, depth[:, None]], axis=-1)
    return (z @ params["w_out"] + params["b_out"])[:, 0]

  ref = jax.block_until_ready(ref_forward())
  # bf16 operands in the kernel (f32 accumulation) -> loosened tolerance.
  assert jnp.allclose(out, ref, rtol=5e-2, atol=5e-2), (
      f"max abs err = {float(jnp.max(jnp.abs(out - ref)))}")

  print("KERNEL_OK")
</pallas_src>

<mosaic_0001>
module attributes {stable_mosaic.version = 11 : i64} {
  func.func @_fused_forward_kernel(%arg0: i32, %arg1: memref<16x16x64xbf16, #tpu.memory_space<vmem>>, %arg2: memref<16x16x64xbf16, #tpu.memory_space<vmem>>, %arg3: memref<16x16x16xbf16, #tpu.memory_space<vmem>>, %arg4: memref<16x16x16xbf16, #tpu.memory_space<vmem>>, %arg5: memref<16x16x16xbf16, #tpu.memory_space<vmem>>, %arg6: memref<16x16x16xbf16, #tpu.memory_space<vmem>>, %arg7: memref<16x1x16xbf16, #tpu.memory_space<vmem>>, %arg8: memref<16x1x16xbf16, #tpu.memory_space<vmem>>, %arg9: memref<2x192x64xbf16, #tpu.memory_space<vmem>>, %arg10: memref<2x192x64xbf16, #tpu.memory_space<vmem>>, %arg11: memref<2x1x64xf32, #tpu.memory_space<vmem>>, %arg12: memref<2x1x64xf32, #tpu.memory_space<vmem>>, %arg13: memref<16x1x128xf32, #tpu.memory_space<vmem>>) attributes {dimension_semantics = [#tpu.dimension_semantics<parallel>], iteration_bounds = array<i64: 2>, scalar_prefetch = 0 : i64, scratch_operands = 0 : i64, tpu.core_type = #tpu.core_type<tc>, window_params = [{transform_indices = @transform_0, window_bounds = array<i64: 16, 16, 64>}, {transform_indices = @transform_1, window_bounds = array<i64: 16, 16, 64>}, {transform_indices = @transform_2, window_bounds = array<i64: 16, 16, 16>}, {transform_indices = @transform_3, window_bounds = array<i64: 16, 16, 16>}, {transform_indices = @transform_4, window_bounds = array<i64: 16, 16, 16>}, {transform_indices = @transform_5, window_bounds = array<i64: 16, 16, 16>}, {transform_indices = @transform_6, window_bounds = array<i64: 16, 1, 16>}, {transform_indices = @transform_7, window_bounds = array<i64: 16, 1, 16>}, {pipeline_mode = #tpu.pipeline_mode<synchronous>, transform_indices = @transform_8, window_bounds = array<i64: 2, 192, 64>}, {pipeline_mode = #tpu.pipeline_mode<synchronous>, transform_indices = @transform_9, window_bounds = array<i64: 2, 192, 64>}, {pipeline_mode = #tpu.pipeline_mode<synchronous>, transform_indices = @transform_10, window_bounds = array<i64: 2, 1, 64>}, {pipeline_mode = #tpu.pipeline_mode<synchronous>, transform_indices = @transform_11, window_bounds = array<i64: 2, 1, 64>}, {transform_indices = @transform_12, window_bounds = array<i64: 16, 1, 128>}]} {
    %c0 = arith.constant 0 : index
    %c0_0 = arith.constant 0 : index
    %c0_1 = arith.constant 0 : index
    %0 = vector.load %arg1[%c0, %c0_0, %c0_1] : memref<16x16x64xbf16, #tpu.memory_space<vmem>>, vector<16x16x64xbf16>
    %c0_2 = arith.constant 0 : index
    %c0_3 = arith.constant 0 : index
    %c0_4 = arith.constant 0 : index
    %1 = vector.load %arg2[%c0_2, %c0_3, %c0_4] : memref<16x16x64xbf16, #tpu.memory_space<vmem>>, vector<16x16x64xbf16>
    %c0_5 = arith.constant 0 : index
    %c0_6 = arith.constant 0 : index
    %c0_7 = arith.constant 0 : index
    %2 = vector.load %arg3[%c0_5, %c0_6, %c0_7] : memref<16x16x16xbf16, #tpu.memory_space<vmem>>, vector<16x16x16xbf16>
    %c0_8 = arith.constant 0 : index
    %c0_9 = arith.constant 0 : index
    %c0_10 = arith.constant 0 : index
    %3 = vector.load %arg4[%c0_8, %c0_9, %c0_10] : memref<16x16x16xbf16, #tpu.memory_space<vmem>>, vector<16x16x16xbf16>
    %c0_11 = arith.constant 0 : index
    %c0_12 = arith.constant 0 : index
    %c0_13 = arith.constant 0 : index
    %4 = vector.load %arg5[%c0_11, %c0_12, %c0_13] : memref<16x16x16xbf16, #tpu.memory_space<vmem>>, vector<16x16x16xbf16>
    %c0_14 = arith.constant 0 : index
    %c0_15 = arith.constant 0 : index
    %c0_16 = arith.constant 0 : index
    %5 = vector.load %arg6[%c0_14, %c0_15, %c0_16] : memref<16x16x16xbf16, #tpu.memory_space<vmem>>, vector<16x16x16xbf16>
    "tpu.trace_start"() <{level = 10 : i32, message = "bij,bjh->bih"}> : () -> ()
    %cst = arith.constant dense<0.000000e+00> : vector<16x16x64xf32>
    %6 = tpu.matmul %2, %0, %cst {dimension_numbers = #tpu.dot_dimension_numbers<[2], [1], [1], [2], [0, 0, 0, 1, 1, 2], [0], [0]>} : vector<16x16x16xbf16>, vector<16x16x64xbf16>, vector<16x16x64xf32> -> vector<16x16x64xf32>
    "tpu.trace_stop"() : () -> ()
    %7 = arith.truncf %6 : vector<16x16x64xf32> to vector<16x16x64xbf16>
    "tpu.trace_start"() <{level = 10 : i32, message = "bij,bjh->bih"}> : () -> ()
    %cst_17 = arith.constant dense<0.000000e+00> : vector<16x16x64xf32>
    %8 = tpu.matmul %5, %1, %cst_17 {dimension_numbers = #tpu.dot_dimension_numbers<[2], [1], [1], [2], [0, 0, 0, 1, 1, 2], [0], [0]>} : vector<16x16x16xbf16>, vector<16x16x64xbf16>, vector<16x16x64xf32> -> vector<16x16x64xf32>
    "tpu.trace_stop"() : () -> ()
    %9 = arith.truncf %8 : vector<16x16x64xf32> to vector<16x16x64xbf16>
    "tpu.trace_start"() <{level = 10 : i32, message = "bij,bjh->bih"}> : () -> ()
    %cst_18 = arith.constant dense<0.000000e+00> : vector<16x16x64xf32>
    %10 = tpu.matmul %3, %1, %cst_18 {dimension_numbers = #tpu.dot_dimension_numbers<[2], [1], [1], [2], [0, 0, 0, 1, 1, 2], [0], [0]>} : vector<16x16x16xbf16>, vector<16x16x64xbf16>, vector<16x16x64xf32> -> vector<16x16x64xf32>
    "tpu.trace_stop"() : () -> ()
    %11 = arith.truncf %10 : vector<16x16x64xf32> to vector<16x16x64xbf16>
    "tpu.trace_start"() <{level = 10 : i32, message = "bij,bjh->bih"}> : () -> ()
    %cst_19 = arith.constant dense<0.000000e+00> : vector<16x16x64xf32>
    %12 = tpu.matmul %4, %0, %cst_19 {dimension_numbers = #tpu.dot_dimension_numbers<[2], [1], [1], [2], [0, 0, 0, 1, 1, 2], [0], [0]>} : vector<16x16x16xbf16>, vector<16x16x64xbf16>, vector<16x16x64xf32> -> vector<16x16x64xf32>
    "tpu.trace_stop"() : () -> ()
    %13 = arith.truncf %12 : vector<16x16x64xf32> to vector<16x16x64xbf16>
    %14 = tpu.concatenate %0, %7, %9 in 2 : vector<16x16x64xbf16>, vector<16x16x64xbf16>, vector<16x16x64xbf16> -> vector<16x16x192xbf16>
    %15 = vector.shape_cast %14 : vector<16x16x192xbf16> to vector<256x192xbf16>
    %16 = tpu.concatenate %1, %11, %13 in 2 : vector<16x16x64xbf16>, vector<16x16x64xbf16>, vector<16x16x64xbf16> -> vector<16x16x192xbf16>
    %17 = vector.shape_cast %16 : vector<16x16x192xbf16> to vector<256x192xbf16>
    %c0_20 = arith.constant 0 : index
    %c0_21 = arith.constant 0 : index
    %c0_22 = arith.constant 0 : index
    %18 = vector.load %arg9[%c0_20, %c0_21, %c0_22] : memref<2x192x64xbf16, #tpu.memory_space<vmem>>, vector<1x192x64xbf16>
    %19 = vector.shape_cast %18 : vector<1x192x64xbf16> to vector<192x64xbf16>
    %cst_23 = arith.constant dense<0.000000e+00> : vector<256x64xf32>
    %20 = tpu.matmul %15, %19, %cst_23 {dimension_numbers = #tpu.dot_dimension_numbers<[1], [0], [0], [1], [0, 0, 1, 1], [], []>} : vector<256x192xbf16>, vector<192x64xbf16>, vector<256x64xf32> -> vector<256x64xf32>
    %c0_24 = arith.constant 0 : index
    %c0_25 = arith.constant 0 : index
    %c0_26 = arith.constant 0 : index
    %21 = vector.load %arg11[%c0_24, %c0_25, %c0_26] : memref<2x1x64xf32, #tpu.memory_space<vmem>>, vector<1x1x64xf32>
    %22 = vector.shape_cast %21 : vector<1x1x64xf32> to vector<1x64xf32>
    %23 = vector.broadcast %22 : vector<1x64xf32> to vector<256x64xf32>
    %24 = arith.addf %20, %23 : vector<256x64xf32>
    %c0_27 = arith.constant 0 : index
    %c0_28 = arith.constant 0 : index
    %c0_29 = arith.constant 0 : index
    %25 = vector.load %arg10[%c0_27, %c0_28, %c0_29] : memref<2x192x64xbf16, #tpu.memory_space<vmem>>, vector<1x192x64xbf16>
    %26 = vector.shape_cast %25 : vector<1x192x64xbf16> to vector<192x64xbf16>
    %cst_30 = arith.constant dense<0.000000e+00> : vector<256x64xf32>
    %27 = tpu.matmul %17, %26, %cst_30 {dimension_numbers = #tpu.dot_dimension_numbers<[1], [0], [0], [1], [0, 0, 1, 1], [], []>} : vector<256x192xbf16>, vector<192x64xbf16>, vector<256x64xf32> -> vector<256x64xf32>
    %c0_31 = arith.constant 0 : index
    %c0_32 = arith.constant 0 : index
    %c0_33 = arith.constant 0 : index
    %28 = vector.load %arg12[%c0_31, %c0_32, %c0_33] : memref<2x1x64xf32, #tpu.memory_space<vmem>>, vector<1x1x64xf32>
    %29 = vector.shape_cast %28 : vector<1x1x64xf32> to vector<1x64xf32>
    %30 = vector.broadcast %29 : vector<1x64xf32> to vector<256x64xf32>
    %31 = arith.addf %27, %30 : vector<256x64xf32>
    %32 = arith.truncf %24 : vector<256x64xf32> to vector<256x64xbf16>
    %33 = vector.shape_cast %32 : vector<256x64xbf16> to vector<16x16x64xbf16>
    %34 = arith.truncf %31 : vector<256x64xf32> to vector<256x64xbf16>
    %35 = vector.shape_cast %34 : vector<256x64xbf16> to vector<16x16x64xbf16>
    "tpu.trace_start"() <{level = 10 : i32, message = "bij,bjh->bih"}> : () -> ()
    %cst_34 = arith.constant dense<0.000000e+00> : vector<16x16x64xf32>
    %36 = tpu.matmul %2, %33, %cst_34 {dimension_numbers = #tpu.dot_dimension_numbers<[2], [1], [1], [2], [0, 0, 0, 1, 1, 2], [0], [0]>} : vector<16x16x16xbf16>, vector<16x16x64xbf16>, vector<16x16x64xf32> -> vector<16x16x64xf32>
    "tpu.trace_stop"() : () -> ()
    %37 = arith.truncf %36 : vector<16x16x64xf32> to vector<16x16x64xbf16>
    "tpu.trace_start"() <{level = 10 : i32, message = "bij,bjh->bih"}> : () -> ()
    %cst_35 = arith.constant dense<0.000000e+00> : vector<16x16x64xf32>
    %38 = tpu.matmul %5, %35, %cst_35 {dimension_numbers = #tpu.dot_dimension_numbers<[2], [1], [1], [2], [0, 0, 0, 1, 1, 2], [0], [0]>} : vector<16x16x16xbf16>, vector<16x16x64xbf16>, vector<16x16x64xf32> -> vector<16x16x64xf32>
    "tpu.trace_stop"() : () -> ()
    %39 = arith.truncf %38 : vector<16x16x64xf32> to vector<16x16x64xbf16>
    "tpu.trace_start"() <{level = 10 : i32, message = "bij,bjh->bih"}> : () -> ()
    %cst_36 = arith.constant dense<0.000000e+00> : vector<16x16x64xf32>
    %40 = tpu.matmul %3, %35, %cst_36 {dimension_numbers = #tpu.dot_dimension_numbers<[2], [1], [1], [2], [0, 0, 0, 1, 1, 2], [0], [0]>} : vector<16x16x16xbf16>, vector<16x16x64xbf16>, vector<16x16x64xf32> -> vector<16x16x64xf32>
    "tpu.trace_stop"() : () -> ()
    %41 = arith.truncf %40 : vector<16x16x64xf32> to vector<16x16x64xbf16>
    "tpu.trace_start"() <{level = 10 : i32, message = "bij,bjh->bih"}> : () -> ()
    %cst_37 = arith.constant dense<0.000000e+00> : vector<16x16x64xf32>
    %42 = tpu.matmul %4, %33, %cst_37 {dimension_numbers = #tpu.dot_dimension_numbers<[2], [1], [1], [2], [0, 0, 0, 1, 1, 2], [0], [0]>} : vector<16x16x16xbf16>, vector<16x16x64xbf16>, vector<16x16x64xf32> -> vector<16x16x64xf32>
    "tpu.trace_stop"() : () -> ()
    %43 = arith.truncf %42 : vector<16x16x64xf32> to vector<16x16x64xbf16>
    %44 = tpu.concatenate %33, %37, %39 in 2 : vector<16x16x64xbf16>, vector<16x16x64xbf16>, vector<16x16x64xbf16> -> vector<16x16x192xbf16>
    %45 = vector.shape_cast %44 : vector<16x16x192xbf16> to vector<256x192xbf16>
    %46 = tpu.concatenate %35, %41, %43 in 2 : vector<16x16x64xbf16>, vector<16x16x64xbf16>, vector<16x16x64xbf16> -> vector<16x16x192xbf16>
    %47 = vector.shape_cast %46 : vector<16x16x192xbf16> to vector<256x192xbf16>
    %c1 = arith.constant 1 : index
    %c0_38 = arith.constant 0 : index
    %c0_39 = arith.constant 0 : index
    %48 = vector.load %arg9[%c1, %c0_38, %c0_39] : memref<2x192x64xbf16, #tpu.memory_space<vmem>>, vector<1x192x64xbf16>
    %49 = vector.shape_cast %48 : vector<1x192x64xbf16> to vector<192x64xbf16>
    %cst_40 = arith.constant dense<0.000000e+00> : vector<256x64xf32>
    %50 = tpu.matmul %45, %49, %cst_40 {dimension_numbers = #tpu.dot_dimension_numbers<[1], [0], [0], [1], [0, 0, 1, 1], [], []>} : vector<256x192xbf16>, vector<192x64xbf16>, vector<256x64xf32> -> vector<256x64xf32>
    %c1_41 = arith.constant 1 : index
    %c0_42 = arith.constant 0 : index
    %c0_43 = arith.constant 0 : index
    %51 = vector.load %arg11[%c1_41, %c0_42, %c0_43] : memref<2x1x64xf32, #tpu.memory_space<vmem>>, vector<1x1x64xf32>
    %52 = vector.shape_cast %51 : vector<1x1x64xf32> to vector<1x64xf32>
    %53 = vector.broadcast %52 : vector<1x64xf32> to vector<256x64xf32>
    %54 = arith.addf %50, %53 : vector<256x64xf32>
    %c1_44 = arith.constant 1 : index
    %c0_45 = arith.constant 0 : index
    %c0_46 = arith.constant 0 : index
    %55 = vector.load %arg10[%c1_44, %c0_45, %c0_46] : memref<2x192x64xbf16, #tpu.memory_space<vmem>>, vector<1x192x64xbf16>
    %56 = vector.shape_cast %55 : vector<1x192x64xbf16> to vector<192x64xbf16>
    %cst_47 = arith.constant dense<0.000000e+00> : vector<256x64xf32>
    %57 = tpu.matmul %47, %56, %cst_47 {dimension_numbers = #tpu.dot_dimension_numbers<[1], [0], [0], [1], [0, 0, 1, 1], [], []>} : vector<256x192xbf16>, vector<192x64xbf16>, vector<256x64xf32> -> vector<256x64xf32>
    %c1_48 = arith.constant 1 : index
    %c0_49 = arith.constant 0 : index
    %c0_50 = arith.constant 0 : index
    %58 = vector.load %arg12[%c1_48, %c0_49, %c0_50] : memref<2x1x64xf32, #tpu.memory_space<vmem>>, vector<1x1x64xf32>
    %59 = vector.shape_cast %58 : vector<1x1x64xf32> to vector<1x64xf32>
    %60 = vector.broadcast %59 : vector<1x64xf32> to vector<256x64xf32>
    %61 = arith.addf %57, %60 : vector<256x64xf32>
    %62 = arith.truncf %54 : vector<256x64xf32> to vector<256x64xbf16>
    %63 = vector.shape_cast %62 : vector<256x64xbf16> to vector<16x16x64xbf16>
    %64 = arith.truncf %61 : vector<256x64xf32> to vector<256x64xbf16>
    %65 = vector.shape_cast %64 : vector<256x64xbf16> to vector<16x16x64xbf16>
    %c0_51 = arith.constant 0 : index
    %c0_52 = arith.constant 0 : index
    %c0_53 = arith.constant 0 : index
    %66 = vector.load %arg7[%c0_51, %c0_52, %c0_53] : memref<16x1x16xbf16, #tpu.memory_space<vmem>>, vector<16x1x16xbf16>
    "tpu.trace_start"() <{level = 10 : i32, message = "bij,bjh->bih"}> : () -> ()
    %cst_54 = arith.constant dense<0.000000e+00> : vector<16x1x64xf32>
    %67 = tpu.matmul %66, %63, %cst_54 {dimension_numbers = #tpu.dot_dimension_numbers<[2], [1], [1], [2], [0, 0, 0, 1, 1, 2], [0], [0]>} : vector<16x1x16xbf16>, vector<16x16x64xbf16>, vector<16x1x64xf32> -> vector<16x1x64xf32>
    "tpu.trace_stop"() : () -> ()
    %c0_55 = arith.constant 0 : index
    %c0_56 = arith.constant 0 : index
    %c0_57 = arith.constant 0 : index
    %68 = vector.load %arg8[%c0_55, %c0_56, %c0_57] : memref<16x1x16xbf16, #tpu.memory_space<vmem>>, vector<16x1x16xbf16>
    "tpu.trace_start"() <{level = 10 : i32, message = "bij,bjh->bih"}> : () -> ()
    %cst_58 = arith.constant dense<0.000000e+00> : vector<16x1x64xf32>
    %69 = tpu.matmul %68, %65, %cst_58 {dimension_numbers = #tpu.dot_dimension_numbers<[2], [1], [1], [2], [0, 0, 0, 1, 1, 2], [0], [0]>} : vector<16x1x16xbf16>, vector<16x16x64xbf16>, vector<16x1x64xf32> -> vector<16x1x64xf32>
    "tpu.trace_stop"() : () -> ()
    %70 = tpu.concatenate %67, %69 in 2 : vector<16x1x64xf32>, vector<16x1x64xf32> -> vector<16x1x128xf32>
    %c0_59 = arith.constant 0 : index
    %c0_60 = arith.constant 0 : index
    %c0_61 = arith.constant 0 : index
    %71 = vector.load %arg13[%c0_59, %c0_60, %c0_61] : memref<16x1x128xf32, #tpu.memory_space<vmem>>, vector<16x1x128xf32>
    tpu.vector_store %arg13[%c0_59, %c0_60, %c0_61], %70 {strides = array<i32>} : memref<16x1x128xf32, #tpu.memory_space<vmem>>, vector<16x1x128xf32>,
    return
  }
  func.func @transform_0(%arg0: i32) -> (i32, i32, i32) {
    %c0_i32 = arith.constant 0 : i32
    %c0_i32_0 = arith.constant 0 : i32
    %c0_i32_1 = arith.constant 0 : i32
    return %arg0, %c0_i32, %c0_i32_0 : i32, i32, i32
  }
  func.func @transform_1(%arg0: i32) -> (i32, i32, i32) {
    %c0_i32 = arith.constant 0 : i32
    %c0_i32_0 = arith.constant 0 : i32
    %c0_i32_1 = arith.constant 0 : i32
    return %arg0, %c0_i32, %c0_i32_0 : i32, i32, i32
  }
  func.func @transform_2(%arg0: i32) -> (i32, i32, i32) {
    %c0_i32 = arith.constant 0 : i32
    %c0_i32_0 = arith.constant 0 : i32
    %c0_i32_1 = arith.constant 0 : i32
    return %arg0, %c0_i32, %c0_i32_0 : i32, i32, i32
  }
  func.func @transform_3(%arg0: i32) -> (i32, i32, i32) {
    %c0_i32 = arith.constant 0 : i32
    %c0_i32_0 = arith.constant 0 : i32
    %c0_i32_1 = arith.constant 0 : i32
    return %arg0, %c0_i32, %c0_i32_0 : i32, i32, i32
  }
  func.func @transform_4(%arg0: i32) -> (i32, i32, i32) {
    %c0_i32 = arith.constant 0 : i32
    %c0_i32_0 = arith.constant 0 : i32
    %c0_i32_1 = arith.constant 0 : i32
    return %arg0, %c0_i32, %c0_i32_0 : i32, i32, i32
  }
  func.func @transform_5(%arg0: i32) -> (i32, i32, i32) {
    %c0_i32 = arith.constant 0 : i32
    %c0_i32_0 = arith.constant 0 : i32
    %c0_i32_1 = arith.constant 0 : i32
    return %arg0, %c0_i32, %c0_i32_0 : i32, i32, i32
  }
  func.func @transform_6(%arg0: i32) -> (i32, i32, i32) {
    %c0_i32 = arith.constant 0 : i32
    %c0_i32_0 = arith.constant 0 : i32
    %c0_i32_1 = arith.constant 0 : i32
    return %arg0, %c0_i32, %c0_i32_0 : i32, i32, i32
  }
  func.func @transform_7(%arg0: i32) -> (i32, i32, i32) {
    %c0_i32 = arith.constant 0 : i32
    %c0_i32_0 = arith.constant 0 : i32
    %c0_i32_1 = arith.constant 0 : i32
    return %arg0, %c0_i32, %c0_i32_0 : i32, i32, i32
  }
  func.func @transform_8(%arg0: i32) -> (i32, i32, i32) {
    %c0_i32 = arith.constant 0 : i32
    %c0_i32_0 = arith.constant 0 : i32
    %c0_i32_1 = arith.constant 0 : i32
    %c0_i32_2 = arith.constant 0 : i32
    return %c0_i32, %c0_i32_0, %c0_i32_1 : i32, i32, i32
  }
  func.func @transform_9(%arg0: i32) -> (i32, i32, i32) {
    %c0_i32 = arith.constant 0 : i32
    %c0_i32_0 = arith.constant 0 : i32
    %c0_i32_1 = arith.constant 0 : i32
    %c0_i32_2 = arith.constant 0 : i32
    return %c0_i32, %c0_i32_0, %c0_i32_1 : i32, i32, i32
  }
  func.func @transform_10(%arg0: i32) -> (i32, i32, i32) {
    %c0_i32 = arith.constant 0 : i32
    %c0_i32_0 = arith.constant 0 : i32
    %c0_i32_1 = arith.constant 0 : i32
    %c0_i32_2 = arith.constant 0 : i32
    return %c0_i32, %c0_i32_0, %c0_i32_1 : i32, i32, i32
  }
  func.func @transform_11(%arg0: i32) -> (i32, i32, i32) {
    %c0_i32 = arith.constant 0 : i32
    %c0_i32_0 = arith.constant 0 : i32
    %c0_i32_1 = arith.constant 0 : i32
    %c0_i32_2 = arith.constant 0 : i32
    return %c0_i32, %c0_i32_0, %c0_i32_1 : i32, i32, i32
  }
  func.func @transform_12(%arg0: i32) -> (i32, i32, i32) {
    %c0_i32 = arith.constant 0 : i32
    %c0_i32_0 = arith.constant 0 : i32
    %c0_i32_1 = arith.constant 0 : i32
    return %arg0, %c0_i32, %c0_i32_0 : i32, i32, i32
  }
}

</mosaic_0001>

<bundles_post_ra>
// kernel: hetero_gnn_forward.1
= control target key start
LH: loop header
LB: loop body
LE: loop exit
PB: predicated region body
PF: predicated region fallthrough
CT: control target
= control target key end

     0   :  { %s12317_s21 = smov 0   ;;  %s14728_s0 = inlined_call_operand.vmem [shape: bf16[32,16,64], index: 0, kind: input, shape index: {}]   ;;  %s14729_s1 = inlined_call_operand.vmem [shape: bf16[32,16,64], index: 1, kind: input, shape index: {}]   ;;  %s14730_s2 = inlined_call_operand.vmem [shape: bf16[32,16,16], index: 2, kind: input, shape index: {}]   ;;  %s14731_s3 = inlined_call_operand.vmem [shape: bf16[32,16,16], index: 3, kind: input, shape index: {}]   ;;  %s14732_s4 = inlined_call_operand.vmem [shape: bf16[32,16,16], index: 4, kind: input, shape index: {}]   ;;  %s14733_s5 = inlined_call_operand.vmem [shape: bf16[32,16,16], index: 5, kind: input, shape index: {}]   ;;  %s14734_s6 = inlined_call_operand.vmem [shape: bf16[32,1,16], index: 6, kind: input, shape index: {}]   ;;  %s14735_s7 = inlined_call_operand.vmem [shape: bf16[32,1,16], index: 7, kind: input, shape index: {}]   ;;  %s14736_s8 = inlined_call_operand.vmem [shape: bf16[2,192,64], index: 8, kind: input, shape index: {}]   ;;  %s14737_s9 = inlined_call_operand.vmem [shape: bf16[2,192,64], index: 9, kind: input, shape index: {}]   ;;  %s14738_s10 = inlined_call_operand.vmem [shape: f32[2,1,64], index: 10, kind: input, shape index: {}]   ;;  %s14739_s11 = inlined_call_operand.vmem [shape: f32[2,1,64], index: 11, kind: input, shape index: {}]   ;;  %s14740_s12 = inlined_call_operand.vmem [shape: f32[32,1,128], index: 12, kind: output, shape index: {}]  }
   0x1 LB: > { %s10252_s22 = sadd.s32 4294967295, %s12246_s21   ;;  %p10256_p0 = scmp.ge.s32.totalorder %s12246_s21, 1  ;;  %s12246_s21 = sphi %s12317_s21, %s22_s21  }
   0x2   : > { %p444_p1 = scmp.lt.s32.totalorder %s12246_s21, 3 }
   0x4   : > { %p445_p2 = pnand %p10256_p0, %p444_p1 }
   0x5   : > { %s10257_s23 = sshll.u32 (!%p445_p2), %s10252_s22, 4  ;;  %v14741_v0 = vmov (!%p445_p2), 0.0   ;;  %vm12249_vm0 = vmmov (!%p445_p2), 0   ;;  %vm785_vm1 = vcmask (!%p445_p2), 130048   ;;  %vm4215_vm2 = vcmask (!%p445_p2), 523264  }
   0x6   : > { %448 = sbr.rel (%p445_p2) target bundleno = 1823 (0x71f), region = 68  ;;  %11028 = vmatprep.subr.bf16.mxu0 (!%p445_p2), %v14741_v0  ;;  %p525_p3 = scmp.lt.s32.totalorder (!%p445_p2), %s10257_s23, 31  ;;  %11030 = vmatprep.mubr.msk.bf16.mxu0 (!%p445_p2), %vm12249_vm0, %v14741_v0 }
   0x7   : > { %11034 = vmatprep.subr.bf16.mxu1 (!%p445_p2), %v14741_v0  ;;  %11036 = vmatprep.mubr.msk.bf16.mxu1 (!%p445_p2), %vm12249_vm0, %v14741_v0 }
   0xd   : > { %s14751_s23 = smov (!%p525_p3, %s10257_s23), 31 }
   0xe   : > { %s12334_s24 = sshll.u32 %s14751_s23, 3  ;;  %s14318_s29 = scalar_lea.vmem %s14734_s6, %s14751_s23 }
   0xf   : > { %s12340_s27 = scalar_lea.vmem %s14728_s0, %s12334_s24  ;;  %s12346_s30 = scalar_lea.vmem %s14730_s2, %s12334_s24 }
  0x10   : > { %v12000_v1 = vld [vmem:[%s12340_s27] sm:$0xff]   ;;  %v12002_v3 = vld [vmem:[%s12340_s27 + $0x8] sm:$0xff]   ;;  %v12004_v5 = vld [vmem:[%s12340_s27 + $0x10] sm:$0xff]   ;;  %s12412_s15 = scalar_lea.vmem %s14729_s1, %s12334_s24  ;;  %s12421_s18 = scalar_lea.vmem %s14733_s5, %s12334_s24 }
  0x11   : > { %v12001_v2 = vld [vmem:[%s12346_s30] sm:$0xff]   ;;  %11029 = vmatpush3.bf16.msra.mxu0 %v12000_v1  ;;  %v12003_v4 = vld [vmem:[%s12346_s30 + $0x8] sm:$0xff]   ;;  %11035 = vmatpush3.bf16.msra.mxu1 %v12002_v3  ;;  %v12006_v6 = vld [vmem:[%s12340_s27 + $0x18] sm:$0xff]   ;;  %s12496_s22 = scalar_lea.vmem %s14731_s3, %s12334_s24  ;;  %s12583_s28 = scalar_lea.vmem %s14732_s4, %s12334_s24 }
  0x12   : > { %11040 = vmatprep.subr.bf16.mxu0 %v14741_v0  ;;  %11046 = vmatprep.subr.bf16.mxu1 %v14741_v0  ;;  %v12005_v7 = vld [vmem:[%s12346_s30 + $0x10] sm:$0xff]   ;;  %v12008_v8 = vld [vmem:[%s12340_s27 + $0x20] sm:$0xff]   ;;  %v12007_v9 = vld [vmem:[%s12346_s30 + $0x18] sm:$0xff]   ;;  %s12250_s24 = smov 64   ;;  %s14517_s16 = scalar_lea.vmem %s14735_s7, %s14751_s23 }
  0x13   : > { %v12010_v10 = vld [vmem:[%s12340_s27 + $0x28] sm:$0xff]   ;;  %v12009_v11 = vld [vmem:[%s12346_s30 + $0x20] sm:$0xff]   ;;  %v12378_v12 = vld [vmem:[%s12340_s27 + $0x30] sm:$0xff]  }
  0x14   : > { %11031 = vmatmul.mubr.msk.bf16.vlgmr.msra.gmra.mrb[0].mxu0 %vm785_vm1, %v12001_v2  ;;  %11037 = vmatmul.mubr.msk.bf16.vlgmr.msra.gmra.mrb[0].mxu1 %vm785_vm1, %v12003_v4  ;;  %v12011_v13 = vld [vmem:[%s12346_s30 + $0x28] sm:$0xff]   ;;  %v12382_v14 = vld [vmem:[%s12340_s27 + $0x38] sm:$0xff]   ;;  %v12013_v15 = vld [vmem:[%s12346_s30 + $0x30] sm:$0xff]  }
  0x15   : > { %11041 = vmatpush3.bf16.msra.mxu0 %v12004_v5  ;;  %11042 = vmatprep.mubr.msk.bf16.mxu0 %vm12249_vm0, %v14741_v0  ;;  %v12396_v16 = vld [vmem:[%s12340_s27 + $0x40] sm:$0xff]   ;;  %v12015_v17 = vld [vmem:[%s12346_s30 + $0x38] sm:$0xff]   ;;  %v12400_v18 = vld [vmem:[%s12340_s27 + $0x48] sm:$0xff]  }
  0x16   : > { %11052 = vmatprep.subr.bf16.mxu0 %v14741_v0  ;;  %11047 = vmatpush3.bf16.msra.mxu1 %v12006_v6  ;;  %v12017_v19 = vld [vmem:[%s12346_s30 + $0x40] sm:$0xff]   ;;  %v12426_v20 = vld [vmem:[%s12340_s27 + $0x50] sm:$0xff]   ;;  %v12019_v21 = vld [vmem:[%s12346_s30 + $0x48] sm:$0xff]  }
  0x17   : > { %11048 = vmatprep.mubr.msk.bf16.mxu1 %vm12249_vm0, %v14741_v0  ;;  %11058 = vmatprep.subr.bf16.mxu1 %v14741_v0  ;;  %v12430_v22 = vld [vmem:[%s12340_s27 + $0x58] sm:$0xff]   ;;  %v12021_v23 = vld [vmem:[%s12346_s30 + $0x50] sm:$0xff]   ;;  %v12444_v24 = vld [vmem:[%s12340_s27 + $0x60] sm:$0xff]  }
  0x18   : > { %v12023_v25 = vld [vmem:[%s12346_s30 + $0x58] sm:$0xff]   ;;  %v12448_v26 = vld [vmem:[%s12340_s27 + $0x68] sm:$0xff]   ;;  %v12025_v27 = vld [vmem:[%s12346_s30 + $0x60] sm:$0xff]  }
  0x19   : > { %v12462_v28 = vld [vmem:[%s12340_s27 + $0x70] sm:$0xff]   ;;  %v12027_v29 = vld [vmem:[%s12346_s30 + $0x68] sm:$0xff]   ;;  %v12466_v30 = vld [vmem:[%s12340_s27 + $0x78] sm:$0xff]  }
  0x1a   : > { %v12029_v31 = vld [vmem:[%s12346_s30 + $0x70] sm:$0xff]   ;;  %v12480_v32 = vld [vmem:[%s12412_s15] sm:$0xff]   ;;  %v12031_v33 = vld [vmem:[%s12346_s30 + $0x78] sm:$0xff]  }
  0x1b   : > { %v12484_v34 = vld [vmem:[%s12412_s15 + $0x8] sm:$0xff]   ;;  %v12033_v35 = vld [vmem:[%s12421_s18] sm:$0xff]   ;;  %v12504_v36 = vld [vmem:[%s12412_s15 + $0x10] sm:$0xff]  }
  0x1c   : > { %11043 = vmatmul.mubr.msk.bf16.vlgmr.msra.gmra.mrb[4].mxu0 %vm785_vm1, %v12005_v7  ;;  %11049 = vmatmul.mubr.msk.bf16.vlgmr.msra.gmra.mrb[4].mxu1 %vm785_vm1, %v12007_v9  ;;  %v12035_v37 = vld [vmem:[%s12421_s18 + $0x8] sm:$0xff]   ;;  %v12508_v38 = vld [vmem:[%s12412_s15 + $0x18] sm:$0xff]   ;;  %v12037_v39 = vld [vmem:[%s12421_s18 + $0x10] sm:$0xff]  }
  0x1d   : > { %11053 = vmatpush3.bf16.msra.mxu0 %v12008_v8  ;;  %11054 = vmatprep.mubr.msk.bf16.mxu0 %vm12249_vm0, %v14741_v0  ;;  %v12039_v40 = vld [vmem:[%s12421_s18 + $0x18] sm:$0xff]   ;;  %v12523_v41 = vld [vmem:[%s12412_s15 + $0x20] sm:$0xff]   ;;  %v12526_v42 = vld [vmem:[%s12412_s15 + $0x28] sm:$0xff]  }
  0x1e   : > { %11064 = vmatprep.subr.bf16.mxu0 %v14741_v0  ;;  %11059 = vmatpush3.bf16.msra.mxu1 %v12010_v10  ;;  %v12041_v43 = vld [vmem:[%s12421_s18 + $0x20] sm:$0xff]   ;;  %v12539_v44 = vld [vmem:[%s12412_s15 + $0x30] sm:$0xff]   ;;  %v12043_v45 = vld [vmem:[%s12421_s18 + $0x28] sm:$0xff]  }
  0x1f   : > { %11060 = vmatprep.mubr.msk.bf16.mxu1 %vm12249_vm0, %v14741_v0  ;;  %11070 = vmatprep.subr.bf16.mxu1 %v14741_v0  ;;  %v12544_v46 = vld [vmem:[%s12412_s15 + $0x38] sm:$0xff]   ;;  %v12045_v47 = vld [vmem:[%s12421_s18 + $0x30] sm:$0xff]   ;;  %v12559_v49 = vld [vmem:[%s12412_s15 + $0x40] sm:$0xff]  }
  0x20   : > { %v12047_v48 = vld [vmem:[%s12421_s18 + $0x38] sm:$0xff]   ;;  %v12562_v50 = vld [vmem:[%s12412_s15 + $0x48] sm:$0xff]   ;;  %v12049_v51 = vld [vmem:[%s12421_s18 + $0x40] sm:$0xff]  }
  0x21   : > { %v12575_v52 = vld [vmem:[%s12412_s15 + $0x50] sm:$0xff]   ;;  %v12051_v53 = vld [vmem:[%s12421_s18 + $0x48] sm:$0xff]   ;;  %v12586_v54 = vld [vmem:[%s12412_s15 + $0x58] sm:$0xff]  }
  0x22   : > { %v12053_v55 = vld [vmem:[%s12421_s18 + $0x50] sm:$0xff]   ;;  %v12599_v56 = vld [vmem:[%s12412_s15 + $0x60] sm:$0xff]   ;;  %v12055_v57 = vld [vmem:[%s12421_s18 + $0x58] sm:$0xff]  }
  0x23   : > { %v12604_v58 = vld [vmem:[%s12412_s15 + $0x68] sm:$0xff]   ;;  %v12057_v59 = vld [vmem:[%s12421_s18 + $0x60] sm:$0xff]   ;;  %v12619_v61 = vld [vmem:[%s12412_s15 + $0x70] sm:$0xff]  }
  0x24   : > { %11055 = vmatmul.mubr.msk.bf16.vlgmr.msra.gmra.mrb[8].mxu0 %vm785_vm1, %v12009_v11  ;;  %11061 = vmatmul.mubr.msk.bf16.vlgmr.msra.gmra.mrb[8].mxu1 %vm785_vm1, %v12011_v13  ;;  %v12059_v60 = vld [vmem:[%s12421_s18 + $0x68] sm:$0xff]   ;;  %v12622_v62 = vld [vmem:[%s12412_s15 + $0x78] sm:$0xff]   ;;  %v12061_v63 = vld [vmem:[%s12421_s18 + $0x70] sm:$0xff]  }
  0x25   : > { %11065 = vmatpush3.bf16.msra.mxu0 %v12378_v12  ;;  %11066 = vmatprep.mubr.msk.bf16.mxu0 %vm12249_vm0, %v14741_v0  ;;  %v12063_v1 = vld [vmem:[%s12421_s18 + $0x78] sm:$0xff]   ;;  %v12064_v2 = vld [vmem:[%s12496_s22] sm:$0xff]   ;;  %v12065_v3 = vld [vmem:[%s12496_s22 + $0x8] sm:$0xff]  }
  0x26   : > { %11076 = vmatprep.subr.bf16.mxu0 %v14741_v0  ;;  %11071 = vmatpush3.bf16.msra.mxu1 %v12382_v14  ;;  %v12066_v4 = vld [vmem:[%s12496_s22 + $0x10] sm:$0xff]   ;;  %v12067_v5 = vld [vmem:[%s12496_s22 + $0x18] sm:$0xff]   ;;  %v12068_v6 = vld [vmem:[%s12496_s22 + $0x20] sm:$0xff]  }
  0x27   : > { %11072 = vmatprep.mubr.msk.bf16.mxu1 %vm12249_vm0, %v14741_v0  ;;  %11082 = vmatprep.subr.bf16.mxu1 %v14741_v0  ;;  %v12069_v7 = vld [vmem:[%s12496_s22 + $0x28] sm:$0xff]   ;;  %v12070_v8 = vld [vmem:[%s12496_s22 + $0x30] sm:$0xff]   ;;  %v12071_v9 = vld [vmem:[%s12496_s22 + $0x38] sm:$0xff]  }
  0x28   : > { %v12072_v10 = vld [vmem:[%s12496_s22 + $0x40] sm:$0xff]   ;;  %v12073_v11 = vld [vmem:[%s12496_s22 + $0x48] sm:$0xff]   ;;  %v12074_v13 = vld [vmem:[%s12496_s22 + $0x50] sm:$0xff]  }
  0x2c   : > { %11067 = vmatmul.mubr.msk.bf16.vlgmr.msra.gmra.mrb[12].mxu0 %vm785_vm1, %v12013_v15  ;;  %11073 = vmatmul.mubr.msk.bf16.vlgmr.msra.gmra.mrb[12].mxu1 %vm785_vm1, %v12015_v17  ;;  %v12076_v15 = vld [vmem:[%s12496_s22 + $0x58] sm:$0xff]   ;;  %v12075_v17 = vld [vmem:[%s12496_s22 + $0x60] sm:$0xff]  }
  0x2d   : > { %11077 = vmatpush3.bf16.msra.mxu0 %v12396_v16  ;;  %11078 = vmatprep.mubr.msk.bf16.mxu0 %vm12249_vm0, %v14741_v0 }
  0x2e   : > { %11088 = vmatprep.subr.bf16.mxu0 %v14741_v0  ;;  %11083 = vmatpush3.bf16.msra.mxu1 %v12400_v18 }
  0x2f   : > { %11084 = vmatprep.mubr.msk.bf16.mxu1 %vm12249_vm0, %v14741_v0  ;;  %11094 = vmatprep.subr.bf16.mxu1 %v14741_v0 }
  0x34   : > { %11079 = vmatmul.mubr.msk.bf16.vlgmr.msra.gmra.mrb[16].mxu0 %vm785_vm1, %v12017_v19  ;;  %11085 = vmatmul.mubr.msk.bf16.vlgmr.msra.gmra.mrb[16].mxu1 %vm785_vm1, %v12019_v21  ;;  %v12079_v19 = vld [vmem:[%s12496_s22 + $0x68] sm:$0xff]   ;;  %v12077_v21 = vld [vmem:[%s12496_s22 + $0x70] sm:$0xff]  }
  0x35   : > { %11089 = vmatpush3.bf16.msra.mxu0 %v12426_v20  ;;  %11090 = vmatprep.mubr.msk.bf16.mxu0 %vm12249_vm0, %v14741_v0 }
  0x36   : > { %11100 = vmatprep.subr.bf16.mxu0 %v14741_v0  ;;  %11095 = vmatpush3.bf16.msra.mxu1 %v12430_v22 }
  0x37   : > { %11096 = vmatprep.mubr.msk.bf16.mxu1 %vm12249_vm0, %v14741_v0  ;;  %11106 = vmatprep.subr.bf16.mxu1 %v14741_v0 }
  0x3c   : > { %11091 = vmatmul.mubr.msk.bf16.vlgmr.msra.gmra.mrb[20].mxu0 %vm785_vm1, %v12021_v23  ;;  %11097 = vmatmul.mubr.msk.bf16.vlgmr.msra.gmra.mrb[20].mxu1 %vm785_vm1, %v12023_v25  ;;  %v12082_v23 = vld [vmem:[%s12496_s22 + $0x78] sm:$0xff]   ;;  %v12734_v25 = vld [vmem:[%s12340_s27] sm:$0xff]  }
  0x3d   : > { %11101 = vmatpush3.bf16.msra.mxu0 %v12444_v24  ;;  %11102 = vmatprep.mubr.msk.bf16.mxu0 %vm12249_vm0, %v14741_v0 }
  0x3e   : > { %11112 = vmatprep.subr.bf16.mxu0 %v14741_v0  ;;  %11107 = vmatpush3.bf16.msra.mxu1 %v12448_v26 }
  0x3f   : > { %11108 = vmatprep.mubr.msk.bf16.mxu1 %vm12249_vm0, %v14741_v0  ;;  %11118 = vmatprep.subr.bf16.mxu1 %v14741_v0 }
  0x44   : > { %11103 = vmatmul.mubr.msk.bf16.vlgmr.msra.gmra.mrb[24].mxu0 %vm785_vm1, %v12025_v27  ;;  %11109 = vmatmul.mubr.msk.bf16.vlgmr.msra.gmra.mrb[24].mxu1 %vm785_vm1, %v12027_v29  ;;  %v12742_v27 = vld [vmem:[%s12340_s27 + $0x8] sm:$0xff]   ;;  %v12078_v29 = vld [vmem:[%s12583_s28] sm:$0xff]  }
  0x45   : > { %11113 = vmatpush3.bf16.msra.mxu0 %v12462_v28  ;;  %11114 = vmatprep.mubr.msk.bf16.mxu0 %vm12249_vm0, %v14741_v0 }
  0x46   : > { %11124 = vmatprep.subr.bf16.mxu0 %v14741_v0  ;;  %11119 = vmatpush3.bf16.msra.mxu1 %v12466_v30 }
  0x47   : > { %11120 = vmatprep.mubr.msk.bf16.mxu1 %vm12249_vm0, %v14741_v0  ;;  %11130 = vmatprep.subr.bf16.mxu1 %v14741_v0 }
  0x4c   : > { %11115 = vmatmul.mubr.msk.bf16.vlgmr.msra.gmra.mrb[28].mxu0 %vm785_vm1, %v12029_v31  ;;  %11121 = vmatmul.mubr.msk.bf16.vlgmr.msra.gmra.mrb[28].mxu1 %vm785_vm1, %v12031_v33  ;;  %v12084_v31 = vld [vmem:[%s12583_s28 + $0x8] sm:$0xff]   ;;  %v12760_v33 = vld [vmem:[%s12340_s27 + $0x18] sm:$0xff]  }
  0x4d   : > { %11125 = vmatpush3.bf16.msra.mxu0 %v12480_v32  ;;  %11126 = vmatprep.mubr.msk.bf16.mxu0 %vm12249_vm0, %v14741_v0 }
  0x4e   : > { %11136 = vmatprep.subr.bf16.mxu0 %v14741_v0  ;;  %11131 = vmatpush3.bf16.msra.mxu1 %v12484_v34 }
  0x4f   : > { %11132 = vmatprep.mubr.msk.bf16.mxu1 %vm12249_vm0, %v14741_v0  ;;  %11142 = vmatprep.subr.bf16.mxu1 %v14741_v0 }
  0x54   : > { %11127 = vmatmul.mubr.msk.bf16.vlgmr.msra.gmra.mrb[32].mxu0 %vm785_vm1, %v12033_v35  ;;  %11133 = vmatmul.mubr.msk.bf16.vlgmr.msra.gmra.mrb[32].mxu1 %vm785_vm1, %v12035_v37  ;;  %v12087_v35 = vld [vmem:[%s12583_s28 + $0x18] sm:$0xff]   ;;  %v12778_v37 = vld [vmem:[%s12340_s27 + $0x28] sm:$0xff]  }
  0x55   : > { %11137 = vmatpush3.bf16.msra.mxu0 %v12504_v36  ;;  %11138 = vmatprep.mubr.msk.bf16.mxu0 %vm12249_vm0, %v14741_v0 }
  0x56   : > { %11148 = vmatprep.subr.bf16.mxu0 %v14741_v0  ;;  %11143 = vmatpush3.bf16.msra.mxu1 %v12508_v38 }
  0x57   : > { %11144 = vmatprep.mubr.msk.bf16.mxu1 %vm12249_vm0, %v14741_v0  ;;  %11154 = vmatprep.subr.bf16.mxu1 %v14741_v0 }
  0x5c   : > { %11139 = vmatmul.mubr.msk.bf16.vlgmr.msra.gmra.mrb[36].mxu0 %vm785_vm1, %v12037_v39  ;;  %11145 = vmatmul.mubr.msk.bf16.vlgmr.msra.gmra.mrb[36].mxu1 %vm785_vm1, %v12039_v40  ;;  %v12090_v39 = vld [vmem:[%s12583_s28 + $0x28] sm:$0xff]  }
  0x5d   : > { %11149 = vmatpush3.bf16.msra.mxu0 %v12523_v41  ;;  %11150 = vmatprep.mubr.msk.bf16.mxu0 %vm12249_vm0, %v14741_v0 }
  0x5e   : > { %11160 = vmatprep.subr.bf16.mxu0 %v14741_v0  ;;  %11155 = vmatpush3.bf16.msra.mxu1 %v12526_v42 }
  0x5f   : > { %11156 = vmatprep.mubr.msk.bf16.mxu1 %vm12249_vm0, %v14741_v0  ;;  %11166 = vmatprep.subr.bf16.mxu1 %v14741_v0 }
  0x64   : > { %11151 = vmatmul.mubr.msk.bf16.vlgmr.msra.gmra.mrb[40].mxu0 %vm785_vm1, %v12041_v43  ;;  %11157 = vmatmul.mubr.msk.bf16.vlgmr.msra.gmra.mrb[40].mxu1 %vm785_vm1, %v12043_v45 }
  0x65   : > { %11161 = vmatpush3.bf16.msra.mxu0 %v12539_v44  ;;  %11162 = vmatprep.mubr.msk.bf16.mxu0 %vm12249_vm0, %v14741_v0 }
  0x66   : > { %11172 = vmatprep.subr.bf16.mxu0 %v14741_v0  ;;  %11167 = vmatpush3.bf16.msra.mxu1 %v12544_v46 }
  0x67   : > { %11168 = vmatprep.mubr.msk.bf16.mxu1 %vm12249_vm0, %v14741_v0  ;;  %11178 = vmatprep.subr.bf16.mxu1 %v14741_v0 }
  0x6c   : > { %11163 = vmatmul.mubr.msk.bf16.vlgmr.msra.gmra.mrb[44].mxu0 %vm785_vm1, %v12045_v47  ;;  %11169 = vmatmul.mubr.msk.bf16.vlgmr.msra.gmra.mrb[44].mxu1 %vm785_vm1, %v12047_v48  ;;  %v12094_v47 = vld [vmem:[%s12583_s28 + $0x38] sm:$0xff]  }
  0x6d   : > { %11173 = vmatpush3.bf16.msra.mxu0 %v12559_v49  ;;  %11174 = vmatprep.mubr.msk.bf16.mxu0 %vm12249_vm0, %v14741_v0 }
  0x6e   : > { %11184 = vmatprep.subr.bf16.mxu0 %v14741_v0  ;;  %11179 = vmatpush3.bf16.msra.mxu1 %v12562_v50 }
  0x6f   : > { %11180 = vmatprep.mubr.msk.bf16.mxu1 %vm12249_vm0, %v14741_v0  ;;  %11190 = vmatprep.subr.bf16.mxu1 %v14741_v0 }
  0x74   : > { %11175 = vmatmul.mubr.msk.bf16.vlgmr.msra.gmra.mrb[48].mxu0 %vm785_vm1, %v12049_v51  ;;  %11181 = vmatmul.mubr.msk.bf16.vlgmr.msra.gmra.mrb[48].mxu1 %vm785_vm1, %v12051_v53 }
  0x75   : > { %11185 = vmatpush3.bf16.msra.mxu0 %v12575_v52  ;;  %11186 = vmatprep.mubr.msk.bf16.mxu0 %vm12249_vm0, %v14741_v0 }
  0x76   : > { %11196 = vmatprep.subr.bf16.mxu0 %v14741_v0  ;;  %11191 = vmatpush3.bf16.msra.mxu1 %v12586_v54 }
  0x77   : > { %11192 = vmatprep.mubr.msk.bf16.mxu1 %vm12249_vm0, %v14741_v0  ;;  %11202 = vmatprep.subr.bf16.mxu1 %v14741_v0 }
  0x7c   : > { %11187 = vmatmul.mubr.msk.bf16.vlgmr.msra.gmra.mrb[52].mxu0 %vm785_vm1, %v12053_v55  ;;  %11193 = vmatmul.mubr.msk.bf16.vlgmr.msra.gmra.mrb[52].mxu1 %vm785_vm1, %v12055_v57  ;;  %v12099_v57 = vld [vmem:[%s12583_s28 + $0x48] sm:$0xff]  }
  0x7d   : > { %11197 = vmatpush3.bf16.msra.mxu0 %v12599_v56  ;;  %11198 = vmatprep.mubr.msk.bf16.mxu0 %vm12249_vm0, %v14741_v0 }
  0x7e   : > { %11208 = vmatprep.subr.bf16.mxu0 %v14741_v0  ;;  %11203 = vmatpush3.bf16.msra.mxu1 %v12604_v58 }
  0x7f   : > { %11204 = vmatprep.mubr.msk.bf16.mxu1 %vm12249_vm0, %v14741_v0  ;;  %11214 = vmatprep.subr.bf16.mxu1 %v14741_v0 }
  0x84   : > { %11199 = vmatmul.mubr.msk.bf16.vlgmr.msra.gmra.mrb[56].mxu0 %vm785_vm1, %v12057_v59  ;;  %11205 = vmatmul.mubr.msk.bf16.vlgmr.msra.gmra.mrb[56].mxu1 %vm785_vm1, %v12059_v60 }
  0x85   : > { %11209 = vmatpush3.bf16.msra.mxu0 %v12619_v61  ;;  %11210 = vmatprep.mubr.msk.bf16.mxu0 %vm12249_vm0, %v14741_v0 }
  0x86   : > { %11220 = vmatprep.subr.bf16.mxu0 %v14741_v0  ;;  %11215 = vmatpush3.bf16.msra.mxu1 %v12622_v62 }
  0x87   : > { %11216 = vmatprep.mubr.msk.bf16.mxu1 %vm12249_vm0, %v14741_v0  ;;  %11226 = vmatprep.subr.bf16.mxu1 %v14741_v0 }
  0x8c   : > { %11211 = vmatmul.mubr.msk.bf16.vlgmr.msra.gmra.mrb[60].mxu0 %vm785_vm1, %v12061_v63  ;;  %11217 = vmatmul.mubr.msk.bf16.vlgmr.msra.gmra.mrb[60].mxu1 %vm785_vm1, %v12063_v1 }
  0x8d   : > { %11221 = vmatpush3.bf16.msra.mxu0 %v12480_v32  ;;  %11222 = vmatprep.mubr.msk.bf16.mxu0 %vm12249_vm0, %v14741_v0  ;;  %v12752_v32 = vld [vmem:[%s12340_s27 + $0x10] sm:$0xff]  }
  0x8e   : > { %11232 = vmatprep.subr.bf16.mxu0 %v14741_v0  ;;  %11227 = vmatpush3.bf16.msra.mxu1 %v12484_v34  ;;  %v12080_v34 = vld [vmem:[%s12583_s28 + $0x10] sm:$0xff]  }
  0x8f   : > { %11228 = vmatprep.mubr.msk.bf16.mxu1 %vm12249_vm0, %v14741_v0  ;;  %11238 = vmatprep.subr.bf16.mxu1 %v14741_v0 }
  0x94   : > { %11223 = vmatmul.mubr.msk.bf16.vlgmr.msra.gmra.mrb[64].mxu0 %vm785_vm1, %v12064_v2  ;;  %11229 = vmatmul.mubr.msk.bf16.vlgmr.msra.gmra.mrb[64].mxu1 %vm785_vm1, %v12065_v3 }
  0x95   : > { %11233 = vmatpush3.bf16.msra.mxu0 %v12504_v36  ;;  %11234 = vmatprep.mubr.msk.bf16.mxu0 %vm12249_vm0, %v14741_v0  ;;  %v12770_v36 = vld [vmem:[%s12340_s27 + $0x20] sm:$0xff]  }
  0x96   : > { %11244 = vmatprep.subr.bf16.mxu0 %v14741_v0  ;;  %11239 = vmatpush3.bf16.msra.mxu1 %v12508_v38  ;;  %v12081_v38 = vld [vmem:[%s12583_s28 + $0x20] sm:$0xff]  }
  0x97   : > { %11240 = vmatprep.mubr.msk.bf16.mxu1 %vm12249_vm0, %v14741_v0  ;;  %11250 = vmatprep.subr.bf16.mxu1 %v14741_v0 }
  0x9c   : > { %11235 = vmatmul.mubr.msk.bf16.vlgmr.msra.gmra.mrb[68].mxu0 %vm785_vm1, %v12066_v4  ;;  %11241 = vmatmul.mubr.msk.bf16.vlgmr.msra.gmra.mrb[68].mxu1 %vm785_vm1, %v12067_v5  ;;  %v12104_v5 = vld [vmem:[%s12583_s28 + $0x58] sm:$0xff]  }
  0x9d   : > { %11245 = vmatpush3.bf16.msra.mxu0 %v12523_v41  ;;  %11246 = vmatprep.mubr.msk.bf16.mxu0 %vm12249_vm0, %v14741_v0 }
  0x9e   : > { %11256 = vmatprep.subr.bf16.mxu0 %v14741_v0  ;;  %11251 = vmatpush3.bf16.msra.mxu1 %v12526_v42  ;;  %v12083_v42 = vld [vmem:[%s12583_s28 + $0x30] sm:$0xff]  }
  0x9f   : > { %11252 = vmatprep.mubr.msk.bf16.mxu1 %vm12249_vm0, %v14741_v0  ;;  %11262 = vmatprep.subr.bf16.mxu1 %v14741_v0 }
  0xa4   : > { %11247 = vmatmul.mubr.msk.bf16.vlgmr.msra.gmra.mrb[72].mxu0 %vm785_vm1, %v12068_v6  ;;  %11253 = vmatmul.mubr.msk.bf16.vlgmr.msra.gmra.mrb[72].mxu1 %vm785_vm1, %v12069_v7 }
  0xa5   : > { %11257 = vmatpush3.bf16.msra.mxu0 %v12539_v44  ;;  %11258 = vmatprep.mubr.msk.bf16.mxu0 %vm12249_vm0, %v14741_v0 }
  0xa6   : > { %11268 = vmatprep.subr.bf16.mxu0 %v14741_v0  ;;  %11263 = vmatpush3.bf16.msra.mxu1 %v12544_v46 }
  0xa7   : > { %11264 = vmatprep.mubr.msk.bf16.mxu1 %vm12249_vm0, %v14741_v0  ;;  %11274 = vmatprep.subr.bf16.mxu1 %v14741_v0 }
  0xac   : > { %11259 = vmatmul.mubr.msk.bf16.vlgmr.msra.gmra.mrb[76].mxu0 %vm785_vm1, %v12070_v8  ;;  %11265 = vmatmul.mubr.msk.bf16.vlgmr.msra.gmra.mrb[76].mxu1 %vm785_vm1, %v12071_v9  ;;  %v12088_v9 = vld [vmem:[%s12583_s28 + $0x60] sm:$0xff]  }
  0xad   : > { %11269 = vmatpush3.bf16.msra.mxu0 %v12559_v49  ;;  %11270 = vmatprep.mubr.msk.bf16.mxu0 %vm12249_vm0, %v14741_v0 }
  0xae   : > { %11280 = vmatprep.subr.bf16.mxu0 %v14741_v0  ;;  %11275 = vmatpush3.bf16.msra.mxu1 %v12562_v50 }
  0xaf   : > { %11276 = vmatprep.mubr.msk.bf16.mxu1 %vm12249_vm0, %v14741_v0  ;;  %11286 = vmatprep.subr.bf16.mxu1 %v14741_v0 }
  0xb4   : > { %11271 = vmatmul.mubr.msk.bf16.vlgmr.msra.gmra.mrb[80].mxu0 %vm785_vm1, %v12072_v10  ;;  %11277 = vmatmul.mubr.msk.bf16.vlgmr.msra.gmra.mrb[80].mxu1 %vm785_vm1, %v12073_v11 }
  0xb5   : > { %11281 = vmatpush3.bf16.msra.mxu0 %v12575_v52  ;;  %11282 = vmatprep.mubr.msk.bf16.mxu0 %vm12249_vm0, %v14741_v0  ;;  %v12085_v52 = vld [vmem:[%s12583_s28 + $0x40] sm:$0xff]  }
  0xb6   : > { %11292 = vmatprep.subr.bf16.mxu0 %v14741_v0  ;;  %11287 = vmatpush3.bf16.msra.mxu1 %v12586_v54 }
  0xb7   : > { %11288 = vmatprep.mubr.msk.bf16.mxu1 %vm12249_vm0, %v14741_v0  ;;  %11298 = vmatprep.subr.bf16.mxu1 %v14741_v0 }
  0xbc   : > { %11283 = vmatmul.mubr.msk.bf16.vlgmr.msra.gmra.mrb[84].mxu0 %vm785_vm1, %v12074_v13  ;;  %11289 = vmatmul.mubr.msk.bf16.vlgmr.msra.gmra.mrb[84].mxu1 %vm785_vm1, %v12076_v15 }
  0xbd   : > { %11293 = vmatpush3.bf16.msra.mxu0 %v12599_v56  ;;  %11294 = vmatprep.mubr.msk.bf16.mxu0 %vm12249_vm0, %v14741_v0 }
  0xbe   : > { %11304 = vmatprep.subr.bf16.mxu0 %v14741_v0  ;;  %11299 = vmatpush3.bf16.msra.mxu1 %v12604_v58 }
  0xbf   : > { %11300 = vmatprep.mubr.msk.bf16.mxu1 %vm12249_vm0, %v14741_v0  ;;  %11310 = vmatprep.subr.bf16.mxu1 %v14741_v0 }
  0xc4   : > { %11295 = vmatmul.mubr.msk.bf16.vlgmr.msra.gmra.mrb[88].mxu0 %vm785_vm1, %v12075_v17  ;;  %11301 = vmatmul.mubr.msk.bf16.vlgmr.msra.gmra.mrb[88].mxu1 %vm785_vm1, %v12079_v19  ;;  %v12106_v19 = vld [vmem:[%s12583_s28 + $0x68] sm:$0xff]  }
  0xc5   : > { %11305 = vmatpush3.bf16.msra.mxu0 %v12619_v61  ;;  %11306 = vmatprep.mubr.msk.bf16.mxu0 %vm12249_vm0, %v14741_v0 }
  0xc6   : > { %11316 = vmatprep.subr.bf16.mxu0 %v14741_v0  ;;  %11311 = vmatpush3.bf16.msra.mxu1 %v12622_v62  ;;  %v12086_v62 = vld [vmem:[%s12583_s28 + $0x50] sm:$0xff]  }
  0xc7   : > { %11312 = vmatprep.mubr.msk.bf16.mxu1 %vm12249_vm0, %v14741_v0  ;;  %11322 = vmatprep.subr.bf16.mxu1 %v14741_v0 }
  0xcc   : > { %11307 = vmatmul.mubr.msk.bf16.vlgmr.msra.gmra.mrb[92].mxu0 %vm785_vm1, %v12077_v21  ;;  %11313 = vmatmul.mubr.msk.bf16.vlgmr.msra.gmra.mrb[92].mxu1 %vm785_vm1, %v12082_v23 }
  0xcd   : > { %11317 = vmatpush3.bf16.msra.mxu0 %v12734_v25  ;;  %11318 = vmatprep.mubr.msk.bf16.mxu0 %vm12249_vm0, %v14741_v0 }
  0xce   : > { %11328 = vmatprep.subr.bf16.mxu0 %v14741_v0  ;;  %11323 = vmatpush3.bf16.msra.mxu1 %v12742_v27 }
  0xcf   : > { %11324 = vmatprep.mubr.msk.bf16.mxu1 %vm12249_vm0, %v14741_v0  ;;  %11334 = vmatprep.subr.bf16.mxu1 %v14741_v0 }
  0xd4   : > { %11319 = vmatmul.mubr.msk.bf16.vlgmr.msra.gmra.mrb[96].mxu0 %vm785_vm1, %v12078_v29  ;;  %11325 = vmatmul.mubr.msk.bf16.vlgmr.msra.gmra.mrb[96].mxu1 %vm785_vm1, %v12084_v31 }
  0xd5   : > { %11329 = vmatpush3.bf16.msra.mxu0 %v12752_v32  ;;  %11330 = vmatprep.mubr.msk.bf16.mxu0 %vm12249_vm0, %v14741_v0 }
  0xd6   : > { %11340 = vmatprep.subr.bf16.mxu0 %v14741_v0  ;;  %11335 = vmatpush3.bf16.msra.mxu1 %v12760_v33 }
  0xd7   : > { %11336 = vmatprep.mubr.msk.bf16.mxu1 %vm12249_vm0, %v14741_v0  ;;  %11346 = vmatprep.subr.bf16.mxu1 %v14741_v0 }
  0xdc   : > { %11331 = vmatmul.mubr.msk.bf16.vlgmr.msra.gmra.mrb[100].mxu0 %vm785_vm1, %v12080_v34  ;;  %11337 = vmatmul.mubr.msk.bf16.vlgmr.msra.gmra.mrb[100].mxu1 %vm785_vm1, %v12087_v35  ;;  %v12089_v34 = vld [vmem:[%s12583_s28 + $0x70] sm:$0xff]  }
  0xdd   : > { %11341 = vmatpush3.bf16.msra.mxu0 %v12770_v36  ;;  %11342 = vmatprep.mubr.msk.bf16.mxu0 %vm12249_vm0, %v14741_v0 }
  0xde   : > { %11352 = vmatprep.subr.bf16.mxu0 %v14741_v0  ;;  %11347 = vmatpush3.bf16.msra.mxu1 %v12778_v37 }
  0xdf   : > { %11348 = vmatprep.mubr.msk.bf16.mxu1 %vm12249_vm0, %v14741_v0  ;;  %11358 = vmatprep.subr.bf16.mxu1 %v14741_v0 }
  0xe4   : > { %11343 = vmatmul.mubr.msk.bf16.vlgmr.msra.gmra.mrb[104].mxu0 %vm785_vm1, %v12081_v38  ;;  %11349 = vmatmul.mubr.msk.bf16.vlgmr.msra.gmra.mrb[104].mxu1 %vm785_vm1, %v12090_v39  ;;  %v12091_v38 = vld [vmem:[%s14736_s8] sm:$0xff]  }
  0xe5   : > { %11353 = vmatpush3.bf16.msra.mxu0 %v12378_v12  ;;  %11354 = vmatprep.mubr.msk.bf16.mxu0 %vm12249_vm0, %v14741_v0 }
  0xe6   : > { %11364 = vmatprep.subr.bf16.mxu0 %v14741_v0  ;;  %11359 = vmatpush3.bf16.msra.mxu1 %v12382_v14 }
  0xe7   : > { %v823_v40 = vpop.f32.mrb[0].mxu0  ;;  %11360 = vmatprep.mubr.msk.bf16.mxu1 %vm12249_vm0, %v14741_v0  ;;  %11370 = vmatprep.subr.bf16.mxu1 %v14741_v0  ;;  %v878_v44 = vpop.f32.mrb[0].mxu1 }
  0xe8   : > { %v11032_v41 = vpop.f32.mrb[1].mxu0  ;;  %v11038_v46 = vpop.f32.mrb[1].mxu1 }
  0xe9   : > { %v826_v43 = vpop.f32.mrb[2].mxu0  ;;  %v881_v48 = vpop.f32.mrb[2].mxu1 }
  0xea   : > { %v11033_v12 = vpop.f32.mrb[3].mxu0  ;;  %v1655_v45 = vpack.c.bf16 %v826_v43, %v823_v40  ;;  %v1656_v49 = vpack.c.bf16 %v881_v48, %v878_v44  ;;  %v11039_v14 = vpop.f32.mrb[3].mxu1  ;;  %v12107_v43 = vld [vmem:[%s12583_s28 + $0x78] sm:$0xff]  }
  0xeb   : > { %v12092_v12 = vld [vmem:[%s14736_s8 + $0x8] sm:$0xff]  }
  0xec   : > { %4183 = vrot.lane.b32.xlu0 %v1655_v45, %s12250_s24  ;;  %11355 = vmatmul.mubr.msk.bf16.vlgmr.msra.gmra.mrb[108].mxu0 %vm785_vm1, %v12083_v42 }
  0xed   : > { %11365 = vmatpush3.bf16.msra.mxu0 %v12396_v16  ;;  %11366 = vmatprep.mubr.msk.bf16.mxu0 %vm12249_vm0, %v14741_v0 }
  0xee   : > { %11376 = vmatprep.subr.bf16.mxu0 %v14741_v0  ;;  %11361 = vmatmul.mubr.msk.bf16.vlgmr.msra.gmra.mrb[108].mxu1 %vm785_vm1, %v12094_v47 }
  0xef   : > { %v933_v50 = vpop.f32.mrb[4].mxu0  ;;  %11371 = vmatpush3.bf16.msra.mxu1 %v12400_v18  ;;  %11372 = vmatprep.mubr.msk.bf16.mxu1 %vm12249_vm0, %v14741_v0  ;;  %v988_v53 = vpop.f32.mrb[4].mxu1 }
  0xf0   : > { %v11044_v51 = vpop.f32.mrb[5].mxu0  ;;  %4185 = vrot.lane.b32.xlu0 %v1656_v49, %s12250_s24  ;;  %11382 = vmatprep.subr.bf16.mxu1 %v14741_v0  ;;  %v11050_v56 = vpop.f32.mrb[5].mxu1  ;;  %v12093_v49 = vld [vmem:[%s14736_s8 + $0x10] sm:$0xff]  }
  0xf1   : > { %v936_v16 = vpop.f32.mrb[6].mxu0  ;;  %v991_v58 = vpop.f32.mrb[6].mxu1 }
  0xf2   : > { %v11045_v54 = vpop.f32.mrb[7].mxu0  ;;  %v1657_v55 = vpack.c.bf16 %v936_v16, %v933_v50  ;;  %v1658_v18 = vpack.c.bf16 %v991_v58, %v988_v53  ;;  %v11051_v59 = vpop.f32.mrb[7].mxu1 }
  0xf3   : > { %v12095_v54 = vld [vmem:[%s14736_s8 + $0x18] sm:$0xff]  }
  0xf4   : > { %4187 = vrot.lane.b32.xlu1 %v1657_v55, %s12250_s24  ;;  %11367 = vmatmul.mubr.msk.bf16.vlgmr.msra.gmra.mrb[112].mxu0 %vm785_vm1, %v12085_v52 }
  0xf5   : > { %11377 = vmatpush3.bf16.msra.mxu0 %v12426_v20  ;;  %11378 = vmatprep.mubr.msk.bf16.mxu0 %vm12249_vm0, %v14741_v0 }
  0xf6   : > { %11388 = vmatprep.subr.bf16.mxu0 %v14741_v0  ;;  %11373 = vmatmul.mubr.msk.bf16.vlgmr.msra.gmra.mrb[112].mxu1 %vm785_vm1, %v12099_v57 }
  0xf7   : > { %v1043_v60 = vpop.f32.mrb[8].mxu0  ;;  %11383 = vmatpush3.bf16.msra.mxu1 %v12430_v22  ;;  %11384 = vmatprep.mubr.msk.bf16.mxu1 %vm12249_vm0, %v14741_v0  ;;  %v1098_v63 = vpop.f32.mrb[8].mxu1 }
  0xf8   : > { %v11056_v61 = vpop.f32.mrb[9].mxu0  ;;  %4189 = vrot.lane.b32.xlu1 %v1658_v18, %s12250_s24  ;;  %11394 = vmatprep.subr.bf16.mxu1 %v14741_v0  ;;  %v11062_v3 = vpop.f32.mrb[9].mxu1  ;;  %v12096_v18 = vld [vmem:[%s14736_s8 + $0x20] sm:$0xff]  }
  0xf9   : > { %v1046_v20 = vpop.f32.mrb[10].mxu0  ;;  %v1101_v4 = vpop.f32.mrb[10].mxu1 }
  0xfa   : > { %v1659_v1 = vpack.c.bf16 %v1046_v20, %v1043_v60  ;;  %v11057_v2 = vpop.f32.mrb[11].mxu0  ;;  %v1660_v22 = vpack.c.bf16 %v1101_v4, %v1098_v63  ;;  %v11063_v6 = vpop.f32.mrb[11].mxu1 }
  0xfc   : > { %4191 = vrot.lane.b32.xlu0 %v1659_v1, %s12250_s24  ;;  %11379 = vmatmul.mubr.msk.bf16.vlgmr.msra.gmra.mrb[116].mxu0 %vm785_vm1, %v12086_v62  ;;  %v12097_v1 = vld [vmem:[%s14736_s8 + $0x28] sm:$0xff]  }
  0xfd   : > { %11389 = vmatpush3.bf16.msra.mxu0 %v12444_v24  ;;  %11390 = vmatprep.mubr.msk.bf16.mxu0 %vm12249_vm0, %v14741_v0 }
  0xfe   : > { %4193 = vrot.lane.b32.xlu1 %v1660_v22, %s12250_s24  ;;  %11400 = vmatprep.subr.bf16.mxu0 %v14741_v0  ;;  %v12098_v22 = vld [vmem:[%s14736_s8 + $0x30] sm:$0xff]  }
  0xff   : > { %v1153_v7 = vpop.f32.mrb[12].mxu0  ;;  %11385 = vmatmul.mubr.msk.bf16.vlgmr.msra.gmra.mrb[116].mxu1 %vm785_vm1, %v12104_v5  ;;  %v1208_v24 = vpop.f32.mrb[12].mxu1 }
 0x100   : > { %v11068_v8 = vpop.f32.mrb[13].mxu0  ;;  %11395 = vmatpush3.bf16.msra.mxu1 %v12448_v26  ;;  %11396 = vmatprep.mubr.msk.bf16.mxu1 %vm12249_vm0, %v14741_v0  ;;  %v11074_v15 = vpop.f32.mrb[13].mxu1  ;;  %v12251_v26 = vmov 0  }
 0x101   : > { %v1156_v10 = vpop.f32.mrb[14].mxu0  ;;  %11406 = vmatprep.subr.bf16.mxu1 %v14741_v0  ;;  %v1211_v17 = vpop.f32.mrb[14].mxu1 }
 0x102   : > { %v1661_v11 = vpack.c.bf16 %v1156_v10, %v1153_v7  ;;  %v11069_v13 = vpop.f32.mrb[15].mxu0  ;;  %v1662_v21 = vpack.c.bf16 %v1211_v17, %v1208_v24  ;;  %v11075_v23 = vpop.f32.mrb[15].mxu1 }
 0x104   : > { %4195 = vrot.lane.b32.xlu0 %v1661_v11, %s12250_s24  ;;  %11391 = vmatmul.mubr.msk.bf16.vlgmr.msra.gmra.mrb[120].mxu0 %vm785_vm1, %v12088_v9  ;;  %v12100_v11 = vld [vmem:[%s14736_s8 + $0x38] sm:$0xff]  }
 0x105   : > { %11401 = vmatpush3.bf16.msra.mxu0 %v12462_v28  ;;  %11402 = vmatprep.mubr.msk.bf16.mxu0 %vm12249_vm0, %v14741_v0 }
 0x106   : > { %4197 = vrot.lane.b32.xlu1 %v1662_v21, %s12250_s24  ;;  %4543 = vmatprep.subr.bf16.mxu0 %v12251_v26  ;;  %v12101_v21 = vld [vmem:[%s14736_s8 + $0x40] sm:$0xff]  }
 0x107   : > { %v1263_v29 = vpop.f32.mrb[16].mxu0  ;;  %11397 = vmatmul.mubr.msk.bf16.vlgmr.msra.gmra.mrb[120].mxu1 %vm785_vm1, %v12106_v19  ;;  %v1318_v35 = vpop.f32.mrb[16].mxu1 }
 0x108   : > { %v11080_v31 = vpop.f32.mrb[17].mxu0  ;;  %11407 = vmatpush3.bf16.msra.mxu1 %v12466_v30  ;;  %11408 = vmatprep.mubr.msk.bf16.mxu1 %vm12249_vm0, %v14741_v0  ;;  %v11086_v41 = vpop.f32.mrb[17].mxu1 }
 0x109   : > { %v1266_v28 = vpop.f32.mrb[18].mxu0  ;;  %4855 = vmatprep.subr.bf16.mxu1 %v12251_v26  ;;  %v1321_v42 = vpop.f32.mrb[18].mxu1 }
 0x10a   : > { %v1663_v39 = vpack.c.bf16 %v1266_v28, %v1263_v29  ;;  %v11081_v40 = vpop.f32.mrb[19].mxu0  ;;  %v1664_v44 = vpack.c.bf16 %v1321_v42, %v1318_v35  ;;  %v11087_v30 = vpop.f32.mrb[19].mxu1 }
 0x10b   : > { %v12108_v40 = vld [vmem:[%s14737_s9] sm:$0xff]   ;;  %v12109_v30 = vld [vmem:[%s14737_s9 + $0x8] sm:$0xff]  }
 0x10c   : > { %4199 = vrot.lane.b32.xlu0 %v1663_v39, %s12250_s24  ;;  %11403 = vmatmul.mubr.msk.bf16.vlgmr.msra.gmra.mrb[124].mxu0 %vm785_vm1, %v12089_v34 }
 0x10d   : > { %4544 = vmatpush1.bf16.msra.mxu0 %v12091_v38  ;;  %v12102_v38 = vld [vmem:[%s14736_s8 + $0x48] sm:$0xff]  }
 0x10e   : > { %4545 = vmatprep.subr.bf16.mxu0 %v12251_v26 }
 0x10f   : > { %v1373_v45 = vpop.f32.mrb[20].mxu0  ;;  %11409 = vmatmul.mubr.msk.bf16.vlgmr.msra.gmra.mrb[124].mxu1 %vm785_vm1, %v12107_v43  ;;  %v1428_v48 = vpop.f32.mrb[20].mxu1 }
 0x110   : > { %4201 = vrot.lane.b32.xlu0 %v1664_v44, %s12250_s24  ;;  %v11092_v46 = vpop.f32.mrb[21].mxu0  ;;  %v11098_v51 = vpop.f32.mrb[21].mxu1  ;;  %v12103_v44 = vld [vmem:[%s14736_s8 + $0x50] sm:$0xff]   ;;  %4856 = vmatpush1.bf16.msra.mxu1 %v12108_v40 }
 0x111   : > { %v1376_v47 = vpop.f32.mrb[22].mxu0  ;;  %4546 = vmatpush1.bf16.msra.mxu0 %v12092_v12  ;;  %v1431_v52 = vpop.f32.mrb[22].mxu1  ;;  %4857 = vmatprep.subr.bf16.mxu1 %v12251_v26  ;;  %v12110_v51 = vld [vmem:[%s14737_s9 + $0x10] sm:$0xff]  }
 0x112   : > { %v1665_v14 = vpack.c.bf16 %v1376_v47, %v1373_v45  ;;  %v11093_v50 = vpop.f32.mrb[23].mxu0  ;;  %4547 = vmatprep.subr.bf16.mxu0 %v12251_v26  ;;  %v1666_v16 = vpack.c.bf16 %v1431_v52, %v1428_v48  ;;  %v11099_v53 = vpop.f32.mrb[23].mxu1 }
 0x114   : > { %4203 = vrot.lane.b32.xlu0 %v1665_v14, %s12250_s24  ;;  %v12105_v14 = vld [vmem:[%s14736_s8 + $0x58] sm:$0xff]   ;;  %4858 = vmatpush1.bf16.msra.mxu1 %v12109_v30 }
 0x115   : > { %4548 = vmatpush1.bf16.msra.mxu0 %v12093_v49  ;;  %4859 = vmatprep.subr.bf16.mxu1 %v12251_v26 }
 0x116   : > { %4549 = vmatprep.subr.bf16.mxu0 %v12251_v26 }
 0x117   : > { %v1483_v55 = vpop.f32.mrb[24].mxu0  ;;  %v1538_v58 = vpop.f32.mrb[24].mxu1 }
 0x118   : > { %4205 = vrot.lane.b32.xlu0 %v1666_v16, %s12250_s24  ;;  %v11104_v56 = vpop.f32.mrb[25].mxu0  ;;  %v11110_v61 = vpop.f32.mrb[25].mxu1  ;;  %4860 = vmatpush1.bf16.msra.mxu1 %v12110_v51 }
 0x119   : > { %v1486_v57 = vpop.f32.mrb[26].mxu0  ;;  %4550 = vmatpush1.bf16.msra.mxu0 %v12095_v54  ;;  %v1541_v62 = vpop.f32.mrb[26].mxu1  ;;  %v12111_v54 = vld [vmem:[%s14737_s9 + $0x18] sm:$0xff]   ;;  %4861 = vmatprep.subr.bf16.mxu1 %v12251_v26  ;;  %v12112_v61 = vld [vmem:[%s14737_s9 + $0x20] sm:$0xff]  }
 0x11a   : > { %v1667_v59 = vpack.c.bf16 %v1486_v57, %v1483_v55  ;;  %v11105_v60 = vpop.f32.mrb[27].mxu0  ;;  %4551 = vmatprep.subr.bf16.mxu0 %v12251_v26  ;;  %v1668_v20 = vpack.c.bf16 %v1541_v62, %v1538_v58  ;;  %v11111_v63 = vpop.f32.mrb[27].mxu1 }
 0x11c   : > { %4207 = vrot.lane.b32.xlu0 %v1667_v59, %s12250_s24  ;;  %4862 = vmatpush1.bf16.msra.mxu1 %v12111_v54  ;;  %v12118_v54 = vld [vmem:[%s14737_s9 + $0x50] sm:$0xff]  }
 0x11d   : > { %4552 = vmatpush1.bf16.msra.mxu0 %v12096_v18  ;;  %4863 = vmatprep.subr.bf16.mxu1 %v12251_v26 }
 0x11e   : > { %4553 = vmatprep.subr.bf16.mxu0 %v12251_v26 }
 0x11f   : > { %v1593_v2 = vpop.f32.mrb[28].mxu0  ;;  %v1648_v5 = vpop.f32.mrb[28].mxu1 }
 0x120   : > { %4209 = vrot.lane.b32.xlu0 %v1668_v20, %s12250_s24  ;;  %v11116_v3 = vpop.f32.mrb[29].mxu0  ;;  %v11122_v8 = vpop.f32.mrb[29].mxu1  ;;  %4864 = vmatpush1.bf16.msra.mxu1 %v12112_v61  ;;  %v12119_v61 = vld [vmem:[%s14737_s9 + $0x58] sm:$0xff]  }
 0x121   : > { %v1596_v4 = vpop.f32.mrb[30].mxu0  ;;  %4554 = vmatpush1.bf16.msra.mxu0 %v12097_v1  ;;  %v1651_v9 = vpop.f32.mrb[30].mxu1  ;;  %v12113_v1 = vld [vmem:[%s14737_s9 + $0x28] sm:$0xff]   ;;  %4865 = vmatprep.subr.bf16.mxu1 %v12251_v26  ;;  %v12114_v8 = vld [vmem:[%s14737_s9 + $0x30] sm:$0xff]  }
 0x122   : > { %v1669_v6 = vpack.c.bf16 %v1596_v4, %v1593_v2  ;;  %v11117_v7 = vpop.f32.mrb[31].mxu0  ;;  %4555 = vmatprep.subr.bf16.mxu0 %v12251_v26  ;;  %v1670_v10 = vpack.c.bf16 %v1651_v9, %v1648_v5  ;;  %v11123_v24 = vpop.f32.mrb[31].mxu1 }
 0x124   : > { %4211 = vrot.lane.b32.xlu0 %v1669_v6, %s12250_s24  ;;  %4866 = vmatpush1.bf16.msra.mxu1 %v12113_v1 }
 0x125   : > { %4556 = vmatpush1.bf16.msra.mxu0 %v12098_v22  ;;  %4867 = vmatprep.subr.bf16.mxu1 %v12251_v26 }
 0x126   : > { %4557 = vmatprep.subr.bf16.mxu0 %v12251_v26 }
 0x127   : > { %v1719_v13 = vpop.f32.mrb[32].mxu0  ;;  %v12895_v19 = vpop.f32.mrb[32].mxu1 }
 0x128   : > { %v11128_v15 = vpop.f32.mrb[33].mxu0  ;;  %4213 = vrot.lane.b32.xlu0 %v1670_v10, %s12250_s24  ;;  %v11134_v31 = vpop.f32.mrb[33].mxu1  ;;  %4868 = vmatpush1.bf16.msra.mxu1 %v12114_v8 }
 0x129   : > { %v1722_v17 = vpop.f32.mrb[34].mxu0  ;;  %4558 = vmatpush1.bf16.msra.mxu0 %v12100_v11  ;;  %v12901_v34 = vpop.f32.mrb[34].mxu1  ;;  %v12115_v11 = vld [vmem:[%s14737_s9 + $0x38] sm:$0xff]   ;;  %4869 = vmatprep.subr.bf16.mxu1 %v12251_v26 }
 0x12a   : > { %v2551_v23 = vpack.c.bf16 %v1722_v17, %v1719_v13  ;;  %v11129_v29 = vpop.f32.mrb[35].mxu0  ;;  %4559 = vmatprep.subr.bf16.mxu0 %v12251_v26  ;;  %v2552_v28 = vpack.c.bf16 %v12901_v34, %v12895_v19  ;;  %v11135_v35 = vpop.f32.mrb[35].mxu1 }
 0x12b   : > { %v12116_v35 = vld [vmem:[%s14737_s9 + $0x40] sm:$0xff]  }
 0x12c   : > { %10451 = vmatprep.mubr.msk.bf16.mxu0 %vm4215_vm2, %v2551_v23  ;;  %4870 = vmatpush1.bf16.msra.mxu1 %v12115_v11 }
 0x12d   : > { %4560 = vmatpush1.bf16.msra.mxu0 %v12101_v21  ;;  %4871 = vmatprep.subr.bf16.mxu1 %v12251_v26 }
 0x12e   : > { %4561 = vmatprep.subr.bf16.mxu0 %v12251_v26 }
 0x12f   : > { %v12910_v39 = vpop.f32.mrb[36].mxu0  ;;  %v12917_v43 = vpop.f32.mrb[36].mxu1 }
 0x130   : > { %v11140_v41 = vpop.f32.mrb[37].mxu0  ;;  %v11146_v46 = vpop.f32.mrb[37].mxu1  ;;  %4872 = vmatpush1.bf16.msra.mxu1 %v12116_v35 }
 0x131   : > { %v12915_v42 = vpop.f32.mrb[38].mxu0  ;;  %4562 = vmatpush1.bf16.msra.mxu0 %v12102_v38  ;;  %v12929_v47 = vpop.f32.mrb[38].mxu1  ;;  %4873 = vmatprep.subr.bf16.mxu1 %v12251_v26 }
 0x132   : > { %v2553_v12 = vpack.c.bf16 %v12915_v42, %v12910_v39  ;;  %v11141_v45 = vpop.f32.mrb[39].mxu0  ;;  %4563 = vmatprep.subr.bf16.mxu0 %v12251_v26  ;;  %v2554_v48 = vpack.c.bf16 %v12929_v47, %v12917_v43  ;;  %v11147_v49 = vpop.f32.mrb[39].mxu1 }
 0x135   : > { %4564 = vmatpush1.bf16.msra.mxu0 %v12103_v44  ;;  %v12117_v44 = vld [vmem:[%s14737_s9 + $0x48] sm:$0xff]  }
 0x136   : > { %4565 = vmatprep.subr.bf16.mxu0 %v12251_v26  ;;  %4874 = vmatpush1.bf16.msra.mxu1 %v12117_v44 }
 0x137   : > { %v12938_v50 = vpop.f32.mrb[40].mxu0  ;;  %v12945_v53 = vpop.f32.mrb[40].mxu1  ;;  %4875 = vmatprep.subr.bf16.mxu1 %v12251_v26 }
 0x138   : > { %v11152_v52 = vpop.f32.mrb[41].mxu0  ;;  %v11158_v57 = vpop.f32.mrb[41].mxu1 }
 0x139   : > { %v12943_v16 = vpop.f32.mrb[42].mxu0  ;;  %4566 = vmatpush1.bf16.msra.mxu0 %v12105_v14  ;;  %v12954_v58 = vpop.f32.mrb[42].mxu1 }
 0x13a   : > { %v2555_v55 = vpack.c.bf16 %v12943_v16, %v12938_v50  ;;  %v11153_v56 = vpop.f32.mrb[43].mxu0  ;;  %11412 = vmatprep.subr.bf16.mxu0 %v14741_v0  ;;  %v2556_v18 = vpack.c.bf16 %v12954_v58, %v12945_v53  ;;  %v11159_v59 = vpop.f32.mrb[43].mxu1  ;;  %4876 = vmatpush1.bf16.msra.mxu1 %v12118_v54 }
 0x13b   : > { %4877 = vmatprep.subr.bf16.mxu1 %v12251_v26 }
 0x13e   : > { %4878 = vmatpush1.bf16.msra.mxu1 %v12119_v61 }
 0x13f   : > { %v12959_v60 = vpop.f32.mrb[44].mxu0  ;;  %v12966_v63 = vpop.f32.mrb[44].mxu1  ;;  %11418 = vmatprep.subr.bf16.mxu1 %v14741_v0 }
 0x140   : > { %v11164_v62 = vpop.f32.mrb[45].mxu0  ;;  %v11170_v4 = vpop.f32.mrb[45].mxu1 }
 0x141   : > { %v12964_v20 = vpop.f32.mrb[46].mxu0  ;;  %v12974_v5 = vpop.f32.mrb[46].mxu1 }
 0x142   : > { %v2557_v2 = vpack.c.bf16 %v12964_v20, %v12959_v60  ;;  %v11165_v3 = vpop.f32.mrb[47].mxu0  ;;  %v2558_v22 = vpack.c.bf16 %v12974_v5, %v12966_v63  ;;  %v11171_v6 = vpop.f32.mrb[47].mxu1 }
 0x147   : > { %v12979_v7 = vpop.f32.mrb[48].mxu0  ;;  %v12986_v24 = vpop.f32.mrb[48].mxu1 }
 0x148   : > { %v11176_v9 = vpop.f32.mrb[49].mxu0  ;;  %v11182_v17 = vpop.f32.mrb[49].mxu1 }
 0x149   : > { %v12984_v10 = vpop.f32.mrb[50].mxu0  ;;  %v12994_v21 = vpop.f32.mrb[50].mxu1 }
 0x14a   : > { %v2559_v13 = vpack.c.bf16 %v12984_v10, %v12979_v7  ;;  %v11177_v15 = vpop.f32.mrb[51].mxu0  ;;  %v2560_v23 = vpack.c.bf16 %v12994_v21, %v12986_v24  ;;  %v11183_v29 = vpop.f32.mrb[51].mxu1 }
 0x14f   : > { %v12999_v31 = vpop.f32.mrb[52].mxu0  ;;  %v13006_v41 = vpop.f32.mrb[52].mxu1 }
 0x150   : > { %v11188_v38 = vpop.f32.mrb[53].mxu0  ;;  %v11194_v46 = vpop.f32.mrb[53].mxu1 }
 0x151   : > { %v13004_v40 = vpop.f32.mrb[54].mxu0  ;;  %v13014_v49 = vpop.f32.mrb[54].mxu1 }
 0x152   : > { %v2561_v30 = vpack.c.bf16 %v13004_v40, %v12999_v31  ;;  %v11189_v45 = vpop.f32.mrb[55].mxu0  ;;  %v2562_v14 = vpack.c.bf16 %v13014_v49, %v13006_v41  ;;  %v11195_v51 = vpop.f32.mrb[55].mxu1  ;;  %v12155_v41 = vld [vmem:[%s12340_s27 + $0x58] sm:$0xff]  }
 0x157   : > { %v13019_v52 = vpop.f32.mrb[56].mxu0  ;;  %v13026_v59 = vpop.f32.mrb[56].mxu1 }
 0x158   : > { %v11200_v56 = vpop.f32.mrb[57].mxu0  ;;  %v11206_v3 = vpop.f32.mrb[57].mxu1 }
 0x159   : > { %v13024_v57 = vpop.f32.mrb[58].mxu0  ;;  %v13034_v4 = vpop.f32.mrb[58].mxu1 }
 0x15a   : > { %v2563_v62 = vpack.c.bf16 %v13024_v57, %v13019_v52  ;;  %v11201_v1 = vpop.f32.mrb[59].mxu0  ;;  %v2564_v6 = vpack.c.bf16 %v13034_v4, %v13026_v59  ;;  %v11207_v8 = vpop.f32.mrb[59].mxu1  ;;  %v12156_v52 = vld [vmem:[%s12340_s27 + $0x60] sm:$0xff]   ;;  %v12157_v59 = vld [vmem:[%s12340_s27 + $0x68] sm:$0xff]  }
 0x15e   : > { %v4184_v9 = vpop.permute.xlu0 %4183 }
 0x15f   : > { %v4218_v11 = vsel %vm4215_vm2, %v12734_v25, %v4184_v9  ;;  %v13041_v15 = vpop.f32.mrb[60].mxu0  ;;  %v13049_v35 = vpop.f32.mrb[60].mxu1 }
 0x160   : > { %v11212_v17 = vpop.f32.mrb[61].mxu0  ;;  %4576 = vmatmul.mubr.bf16.vlgmr.msra.gmra.mrb[128].mxu0 %v4218_v11  ;;  %v11218_v45 = vpop.f32.mrb[61].mxu1 }
 0x161   : > { %v13043_v29 = vpop.f32.mrb[62].mxu0  ;;  %10452 = vmatprep.mubr.msk.bf16.mxu0 %vm4215_vm2, %v2552_v28  ;;  %v13053_v25 = vpop.f32.mrb[62].mxu1 }
 0x162   : > { %v2565_v38 = vpack.c.bf16 %v13043_v29, %v13041_v15  ;;  %v11213_v44 = vpop.f32.mrb[63].mxu0  ;;  %v4186_v46 = vpop.permute.xlu0 %4185  ;;  %v2566_v51 = vpack.c.bf16 %v13053_v25, %v13049_v35  ;;  %v12158_v15 = vld [vmem:[%s12340_s27 + $0x70] sm:$0xff]   ;;  %v12159_v35 = vld [vmem:[%s12340_s27 + $0x78] sm:$0xff]  }
 0x163   : > { %v11219_v54 = vpop.f32.mrb[63].mxu1  ;;  %v4222_v19 = vsel %vm4215_vm2, %v12742_v27, %v4186_v46 }
 0x166   : > { %v4188_v9 = vpop.permute.xlu1 %4187 }
 0x167   : > { %v2609_v56 = vpop.f32.mrb[64].mxu0  ;;  %v2658_v61 = vpop.f32.mrb[64].mxu1  ;;  %v4226_v27 = vsel %vm4215_vm2, %v12752_v32, %v4188_v9 }
 0x168   : > { %v11224_v34 = vpop.f32.mrb[65].mxu0  ;;  %4584 = vmatmul.mubr.bf16.gmra.mrb[132].mxu0 %v4222_v19  ;;  %v11230_v8 = vpop.f32.mrb[65].mxu1 }
 0x169   : > { %v2612_v28 = vpop.f32.mrb[66].mxu0  ;;  %10453 = vmatprep.mubr.msk.bf16.mxu0 %vm4215_vm2, %v2553_v12  ;;  %v2661_v11 = vpop.f32.mrb[66].mxu1 }
 0x16a   : > { %v3351_v1 = vpack.c.bf16 %v2612_v28, %v2609_v56  ;;  %v11225_v3 = vpop.f32.mrb[67].mxu0  ;;  %v3352_v17 = vpack.c.bf16 %v2661_v11, %v2658_v61  ;;  %v11231_v44 = vpop.f32.mrb[67].mxu1 }
 0x16b   : > { %v4190_v34 = vpop.permute.xlu1 %4189 }
 0x16c   : > { %4296 = vrot.lane.b32.xlu1 %v3351_v1, %s12250_s24  ;;  %v4230_v61 = vsel %vm4215_vm2, %v12760_v33, %v4190_v34 }
 0x16f   : > { %v2707_v45 = vpop.f32.mrb[68].mxu0  ;;  %v2756_v12 = vpop.f32.mrb[68].mxu1 }
 0x170   : > { %4592 = vmatmul.mubr.bf16.gmra.mrb[136].mxu0 %v4226_v27  ;;  %4298 = vrot.lane.b32.xlu1 %v3352_v17, %s12250_s24  ;;  %v11236_v39 = vpop.f32.mrb[69].mxu0  ;;  %v11242_v56 = vpop.f32.mrb[69].mxu1 }
 0x171   : > { %10454 = vmatprep.mubr.msk.bf16.mxu0 %vm4215_vm2, %v2554_v48  ;;  %v2710_v42 = vpop.f32.mrb[70].mxu0  ;;  %v2759_v19 = vpop.f32.mrb[70].mxu1 }
 0x172   : > { %v3353_v46 = vpack.c.bf16 %v2710_v42, %v2707_v45  ;;  %v11237_v54 = vpop.f32.mrb[71].mxu0  ;;  %v3354_v32 = vpack.c.bf16 %v2759_v19, %v2756_v12  ;;  %v11243_v28 = vpop.f32.mrb[71].mxu1 }
 0x173   : > { %v4192_v17 = vpop.permute.xlu0 %4191 }
 0x174   : > { %4300 = vrot.lane.b32.xlu1 %v3353_v46, %s12250_s24  ;;  %v4234_v27 = vsel %vm4215_vm2, %v12770_v36, %v4192_v17  ;;  %v4194_v46 = vpop.permute.xlu1 %4193 }
 0x175   : > { %v4238_v19 = vsel %vm4215_vm2, %v12778_v37, %v4194_v46 }
 0x177   : > { %v2805_v1 = vpop.f32.mrb[72].mxu0  ;;  %v2854_v48 = vpop.f32.mrb[72].mxu1 }
 0x178   : > { %4600 = vmatmul.mubr.bf16.gmra.mrb[140].mxu0 %v4230_v61  ;;  %4302 = vrot.lane.b32.xlu1 %v3354_v32, %s12250_s24  ;;  %v11248_v43 = vpop.f32.mrb[73].mxu0  ;;  %v11254_v9 = vpop.f32.mrb[73].mxu1 }
 0x179   : > { %10455 = vmatprep.mubr.msk.bf16.mxu0 %vm4215_vm2, %v2555_v55  ;;  %v2808_v47 = vpop.f32.mrb[74].mxu0  ;;  %v2857_v11 = vpop.f32.mrb[74].mxu1 }
 0x17a   : > { %v3355_v3 = vpack.c.bf16 %v2808_v47, %v2805_v1  ;;  %v11249_v8 = vpop.f32.mrb[75].mxu0  ;;  %v3356_v33 = vpack.c.bf16 %v2857_v11, %v2854_v48  ;;  %v11255_v44 = vpop.f32.mrb[75].mxu1  ;;  %v12150_v48 = vld [vmem:[%s12340_s27 + $0x30] sm:$0xff]  }
 0x17b   : > { %v4196_v1 = vpop.permute.xlu0 %4195 }
 0x17c   : > { %4304 = vrot.lane.b32.xlu1 %v3355_v3, %s12250_s24  ;;  %v4242_v3 = vsel %vm4215_vm2, %v12150_v48, %v4196_v1 }
 0x17f   : > { %v2903_v45 = vpop.f32.mrb[76].mxu0  ;;  %v2952_v55 = vpop.f32.mrb[76].mxu1 }
 0x180   : > { %4608 = vmatmul.mubr.bf16.gmra.mrb[144].mxu0 %v4234_v27  ;;  %4306 = vrot.lane.b32.xlu1 %v3356_v33, %s12250_s24  ;;  %v11260_v50 = vpop.f32.mrb[77].mxu0  ;;  %v11266_v12 = vpop.f32.mrb[77].mxu1 }
 0x181   : > { %10456 = vmatprep.mubr.msk.bf16.mxu0 %vm4215_vm2, %v2556_v18  ;;  %v2906_v16 = vpop.f32.mrb[78].mxu0  ;;  %v2955_v54 = vpop.f32.mrb[78].mxu1  ;;  %v12151_v50 = vld [vmem:[%s12340_s27 + $0x38] sm:$0xff]  }
 0x182   : > { %v3357_v39 = vpack.c.bf16 %v2906_v16, %v2903_v45  ;;  %v11261_v42 = vpop.f32.mrb[79].mxu0  ;;  %v3358_v36 = vpack.c.bf16 %v2955_v54, %v2952_v55  ;;  %v11267_v56 = vpop.f32.mrb[79].mxu1 }
 0x183   : > { %v4198_v33 = vpop.permute.xlu1 %4197  ;;  %v4200_v46 = vpop.permute.xlu0 %4199 }
 0x184   : > { %4308 = vrot.lane.b32.xlu1 %v3357_v39, %s12250_s24  ;;  %v4246_v16 = vsel %vm4215_vm2, %v12151_v50, %v4198_v33 }
 0x187   : > { %v3001_v34 = vpop.f32.mrb[80].mxu0  ;;  %v3050_v18 = vpop.f32.mrb[80].mxu1 }
 0x188   : > { %4616 = vmatmul.mubr.bf16.gmra.mrb[148].mxu0 %v4238_v19  ;;  %4310 = vrot.lane.b32.xlu1 %v3358_v36, %s12250_s24  ;;  %v11272_v53 = vpop.f32.mrb[81].mxu0  ;;  %v11278_v61 = vpop.f32.mrb[81].mxu1  ;;  %v12152_v19 = vld [vmem:[%s12340_s27 + $0x40] sm:$0xff]  }
 0x189   : > { %10457 = vmatprep.mubr.msk.bf16.mxu0 %vm4215_vm2, %v2557_v2  ;;  %v3004_v58 = vpop.f32.mrb[82].mxu0  ;;  %v3053_v37 = vpop.f32.mrb[82].mxu1 }
 0x18a   : > { %v3359_v32 = vpack.c.bf16 %v3004_v58, %v3001_v34  ;;  %v11273_v28 = vpop.f32.mrb[83].mxu0  ;;  %v3360_v43 = vpack.c.bf16 %v3053_v37, %v3050_v18  ;;  %v11279_v47 = vpop.f32.mrb[83].mxu1  ;;  %v4250_v34 = vsel %vm4215_vm2, %v12152_v19, %v4200_v46 }
 0x18b   : > { %v4202_v37 = vpop.permute.xlu0 %4201 }
 0x18c   : > { %4312 = vrot.lane.b32.xlu0 %v3359_v32, %s12250_s24  ;;  %4314 = vrot.lane.b32.xlu1 %v3360_v43, %s12250_s24  ;;  %v12153_v43 = vld [vmem:[%s12340_s27 + $0x48] sm:$0xff]  }
 0x18d   : > { %v4254_v47 = vsel %vm4215_vm2, %v12153_v43, %v4202_v37 }
 0x18f   : > { %v3099_v8 = vpop.f32.mrb[84].mxu0  ;;  %v3148_v2 = vpop.f32.mrb[84].mxu1 }
 0x190   : > { %4624 = vmatmul.mubr.bf16.gmra.mrb[152].mxu0 %v4242_v3  ;;  %v11284_v60 = vpop.f32.mrb[85].mxu0  ;;  %v11290_v17 = vpop.f32.mrb[85].mxu1 }
 0x191   : > { %10458 = vmatprep.mubr.msk.bf16.mxu0 %vm4215_vm2, %v2558_v22  ;;  %v3102_v20 = vpop.f32.mrb[86].mxu0  ;;  %v3151_v44 = vpop.f32.mrb[86].mxu1  ;;  %v12154_v17 = vld [vmem:[%s12340_s27 + $0x50] sm:$0xff]  }
 0x192   : > { %v3361_v9 = vpack.c.bf16 %v3102_v20, %v3099_v8  ;;  %v11285_v11 = vpop.f32.mrb[87].mxu0  ;;  %v3362_v27 = vpack.c.bf16 %v3151_v44, %v3148_v2  ;;  %v11291_v45 = vpop.f32.mrb[87].mxu1 }
 0x193   : > { %v4204_v2 = vpop.permute.xlu0 %4203 }
 0x194   : > { %4316 = vrot.lane.b32.xlu0 %v3361_v9, %s12250_s24  ;;  %4318 = vrot.lane.b32.xlu1 %v3362_v27, %s12250_s24  ;;  %v4258_v31 = vsel %vm4215_vm2, %v12154_v17, %v4204_v2 }
 0x197   : > { %v3197_v55 = vpop.f32.mrb[88].mxu0  ;;  %v3246_v22 = vpop.f32.mrb[88].mxu1 }
 0x198   : > { %4632 = vmatmul.mubr.bf16.gmra.mrb[156].mxu0 %v4246_v16  ;;  %v11296_v63 = vpop.f32.mrb[89].mxu0  ;;  %v11302_v12 = vpop.f32.mrb[89].mxu1 }
 0x199   : > { %10459 = vmatprep.mubr.msk.bf16.mxu0 %vm4215_vm2, %v2559_v13  ;;  %v3200_v5 = vpop.f32.mrb[90].mxu0  ;;  %v3249_v54 = vpop.f32.mrb[90].mxu1 }
 0x19a   : > { %v3363_v39 = vpack.c.bf16 %v3200_v5, %v3197_v55  ;;  %v11297_v42 = vpop.f32.mrb[91].mxu0  ;;  %v3364_v36 = vpack.c.bf16 %v3249_v54, %v3246_v22  ;;  %v11303_v56 = vpop.f32.mrb[91].mxu1 }
 0x19b   : > { %v4206_v5 = vpop.permute.xlu0 %4205 }
 0x19c   : > { %4320 = vrot.lane.b32.xlu0 %v3363_v39, %s12250_s24  ;;  %4322 = vrot.lane.b32.xlu1 %v3364_v36, %s12250_s24  ;;  %v4262_v49 = vsel %vm4215_vm2, %v12155_v41, %v4206_v5 }
 0x19f   : > { %v3295_v53 = vpop.f32.mrb[92].mxu0  ;;  %v3344_v13 = vpop.f32.mrb[92].mxu1 }
 0x1a0   : > { %4640 = vmatmul.mubr.bf16.gmra.mrb[160].mxu0 %v4250_v34  ;;  %v11308_v7 = vpop.f32.mrb[93].mxu0  ;;  %v11314_v32 = vpop.f32.mrb[93].mxu1 }
 0x1a1   : > { %10460 = vmatprep.mubr.msk.bf16.mxu0 %vm4215_vm2, %v2560_v23  ;;  %v3298_v10 = vpop.f32.mrb[94].mxu0  ;;  %v3347_v28 = vpop.f32.mrb[94].mxu1 }
 0x1a2   : > { %v3365_v58 = vpack.c.bf16 %v3298_v10, %v3295_v53  ;;  %v11309_v18 = vpop.f32.mrb[95].mxu0  ;;  %v3366_v61 = vpack.c.bf16 %v3347_v28, %v3344_v13  ;;  %v11315_v1 = vpop.f32.mrb[95].mxu1 }
 0x1a3   : > { %v4208_v56 = vpop.permute.xlu0 %4207 }
 0x1a4   : > { %4324 = vrot.lane.b32.xlu0 %v3365_v58, %s12250_s24  ;;  %4326 = vrot.lane.b32.xlu1 %v3366_v61, %s12250_s24  ;;  %v4266_v57 = vsel %vm4215_vm2, %v12156_v52, %v4208_v56 }
 0x1a7   : > { %v3409_v24 = vpop.f32.mrb[96].mxu0  ;;  %v13127_v48 = vpop.f32.mrb[96].mxu1 }
 0x1a8   : > { %4648 = vmatmul.mubr.bf16.gmra.mrb[164].mxu0 %v4254_v47  ;;  %v11320_v21 = vpop.f32.mrb[97].mxu0  ;;  %v11326_v60 = vpop.f32.mrb[97].mxu1 }
 0x1a9   : > { %10461 = vmatprep.mubr.msk.bf16.mxu0 %vm4215_vm2, %v2561_v30  ;;  %v3412_v23 = vpop.f32.mrb[98].mxu0  ;;  %v13129_v20 = vpop.f32.mrb[98].mxu1 }
 0x1aa   : > { %v4151_v3 = vpack.c.bf16 %v3412_v23, %v3409_v24  ;;  %v11321_v8 = vpop.f32.mrb[99].mxu0  ;;  %v4152_v9 = vpack.c.bf16 %v13129_v20, %v13127_v48  ;;  %v11327_v11 = vpop.f32.mrb[99].mxu1  ;;  %v12161_v20 = vld [vmem:[%s12412_s15 + $0x8] sm:$0xff]  }
 0x1ab   : > { %v4210_v1 = vpop.permute.xlu0 %4209 }
 0x1ac   : > { %10480 = vmatprep.mubr.msk.bf16.mxu1 %vm4215_vm2, %v4151_v3  ;;  %v4270_v4 = vsel %vm4215_vm2, %v12157_v59, %v4210_v1 }
 0x1af   : > { %v13136_v40 = vpop.f32.mrb[100].mxu0  ;;  %v13144_v44 = vpop.f32.mrb[100].mxu1 }
 0x1b0   : > { %4656 = vmatmul.mubr.bf16.gmra.mrb[168].mxu0 %v4258_v31  ;;  %v11332_v30 = vpop.f32.mrb[101].mxu0  ;;  %v11338_v50 = vpop.f32.mrb[101].mxu1 }
 0x1b1   : > { %10462 = vmatprep.mubr.msk.bf16.mxu0 %vm4215_vm2, %v2562_v14  ;;  %v13142_v33 = vpop.f32.mrb[102].mxu0  ;;  %v13148_v16 = vpop.f32.mrb[102].mxu1 }
 0x1b2   : > { %v4153_v27 = vpack.c.bf16 %v13142_v33, %v13136_v40  ;;  %v11333_v45 = vpop.f32.mrb[103].mxu0  ;;  %v4154_v55 = vpack.c.bf16 %v13148_v16, %v13144_v44  ;;  %v11339_v63 = vpop.f32.mrb[103].mxu1  ;;  %v12164_v33 = vld [vmem:[%s12412_s15 + $0x20] sm:$0xff]   ;;  %v12165_v16 = vld [vmem:[%s12412_s15 + $0x28] sm:$0xff]  }
 0x1b3   : > { %v4212_v8 = vpop.permute.xlu0 %4211 }
 0x1b4   : > { %v4274_v29 = vsel %vm4215_vm2, %v12158_v15, %v4212_v8 }
 0x1b7   : > { %v13154_v14 = vpop.f32.mrb[104].mxu0  ;;  %v13162_v42 = vpop.f32.mrb[104].mxu1 }
 0x1b8   : > { %4664 = vmatmul.mubr.bf16.gmra.mrb[172].mxu0 %v4262_v49  ;;  %v11344_v22 = vpop.f32.mrb[105].mxu0  ;;  %v11350_v54 = vpop.f32.mrb[105].mxu1 }
 0x1b9   : > { %10463 = vmatprep.mubr.msk.bf16.mxu0 %vm4215_vm2, %v2563_v62  ;;  %v13160_v39 = vpop.f32.mrb[106].mxu0  ;;  %v13166_v36 = vpop.f32.mrb[106].mxu1 }
 0x1ba   : > { %v4155_v12 = vpack.c.bf16 %v13160_v39, %v13154_v14  ;;  %v11345_v46 = vpop.f32.mrb[107].mxu0  ;;  %v4156_v19 = vpack.c.bf16 %v13166_v36, %v13162_v42  ;;  %v11351_v34 = vpop.f32.mrb[107].mxu1  ;;  %v12166_v39 = vld [vmem:[%s12412_s15 + $0x30] sm:$0xff]   ;;  %v12167_v36 = vld [vmem:[%s12412_s15 + $0x38] sm:$0xff]  }
 0x1bb   : > { %v4214_v63 = vpop.permute.xlu0 %4213 }
 0x1bc   : > { %v4278_v25 = vsel %vm4215_vm2, %v12159_v35, %v4214_v63  ;;  %v12163_v35 = vld [vmem:[%s12412_s15 + $0x18] sm:$0xff]  }
 0x1bf   : > { %v13172_v62 = vpop.f32.mrb[108].mxu0 }
 0x1c0   : > { %4672 = vmatmul.mubr.bf16.gmra.mrb[176].mxu0 %v4266_v57  ;;  %v11356_v53 = vpop.f32.mrb[109].mxu0 }
 0x1c1   : > { %10464 = vmatprep.mubr.msk.bf16.mxu0 %vm4215_vm2, %v2564_v6  ;;  %v13178_v7 = vpop.f32.mrb[110].mxu0  ;;  %v13180_v10 = vpop.f32.mrb[108].mxu1 }
 0x1c2   : > { %v4157_v13 = vpack.c.bf16 %v13178_v7, %v13172_v62  ;;  %v11357_v58 = vpop.f32.mrb[111].mxu0  ;;  %v11362_v18 = vpop.f32.mrb[109].mxu1  ;;  %v12168_v7 = vld [vmem:[%s12412_s15 + $0x40] sm:$0xff]  }
 0x1c3   : > { %v13184_v32 = vpop.f32.mrb[110].mxu1 }
 0x1c4   : > { %v4158_v28 = vpack.c.bf16 %v13184_v32, %v13180_v10  ;;  %v11363_v61 = vpop.f32.mrb[111].mxu1  ;;  %v12169_v32 = vld [vmem:[%s12412_s15 + $0x48] sm:$0xff]  }
 0x1c5   : > { %v12160_v61 = vld [vmem:[%s12412_s15] sm:$0xff]  }
 0x1c7   : > { %v13190_v6 = vpop.f32.mrb[112].mxu0 }
 0x1c8   : > { %4680 = vmatmul.mubr.bf16.gmra.mrb[180].mxu0 %v4270_v4  ;;  %v11368_v37 = vpop.f32.mrb[113].mxu0 }
 0x1c9   : > { %10465 = vmatprep.mubr.msk.bf16.mxu0 %vm4215_vm2, %v2565_v38  ;;  %v13196_v43 = vpop.f32.mrb[114].mxu0  ;;  %v13198_v47 = vpop.f32.mrb[112].mxu1 }
 0x1ca   : > { %v4159_v24 = vpack.c.bf16 %v13196_v43, %v13190_v6  ;;  %v11369_v21 = vpop.f32.mrb[115].mxu0  ;;  %v11374_v23 = vpop.f32.mrb[113].mxu1  ;;  %v12170_v43 = vld [vmem:[%s12412_s15 + $0x50] sm:$0xff]  }
 0x1cb   : > { %v13202_v3 = vpop.f32.mrb[114].mxu1 }
 0x1cc   : > { %v4160_v60 = vpack.c.bf16 %v13202_v3, %v13198_v47  ;;  %v11375_v2 = vpop.f32.mrb[115].mxu1  ;;  %v13321_v47 = vld [vmem:[%s14738_s10] ss:$0 sm:$0xff] }
 0x1cf   : > { %v13208_v38 = vpop.f32.mrb[116].mxu0 }
 0x1d0   : > { %4688 = vmatmul.mubr.bf16.gmra.mrb[184].mxu0 %v4274_v29  ;;  %v11380_v11 = vpop.f32.mrb[117].mxu0 }
 0x1d1   : > { %10466 = vmatprep.mubr.msk.bf16.mxu0 %vm4215_vm2, %v2566_v51  ;;  %v13214_v17 = vpop.f32.mrb[118].mxu0 }
 0x1d2   : > { %v4161_v31 = vpack.c.bf16 %v13214_v17, %v13208_v38  ;;  %v11381_v30 = vpop.f32.mrb[119].mxu0  ;;  %v13218_v45 = vpop.f32.mrb[116].mxu1 }
 0x1d3   : > { %v11386_v50 = vpop.f32.mrb[117].mxu1 }
 0x1d4   : > { %v13220_v5 = vpop.f32.mrb[118].mxu1  ;;  %v12162_v50 = vld [vmem:[%s12412_s15 + $0x10] sm:$0xff]  }
 0x1d5   : > { %v4162_v41 = vpack.c.bf16 %v13220_v5, %v13218_v45  ;;  %v11387_v49 = vpop.f32.mrb[119].mxu1 }
 0x1d7   : > { %v13226_v51 = vpop.f32.mrb[120].mxu0 }
 0x1d8   : > { %4696 = vmatmul.mubr.bf16.gmra.mrb[188].mxu0 %v4278_v25  ;;  %v11392_v22 = vpop.f32.mrb[121].mxu0 }
 0x1d9   : > { %v13228_v46 = vpop.f32.mrb[122].mxu0  ;;  %11414 = vmatprep.mubr.msk.bf16.mxu0 %vm12249_vm0, %v14741_v0 }
 0x1da   : > { %v4163_v54 = vpack.c.bf16 %v13228_v46, %v13226_v51  ;;  %v11393_v56 = vpop.f32.mrb[123].mxu0  ;;  %v13234_v34 = vpop.f32.mrb[120].mxu1  ;;  %v12173_v51 = vld [vmem:[%s12412_s15 + $0x60] sm:$0xff]  }
 0x1db   : > { %v11398_v52 = vpop.f32.mrb[121].mxu1 }
 0x1dc   : > { %v13236_v57 = vpop.f32.mrb[122].mxu1  ;;  %v12171_v52 = vld [vmem:[%s12412_s15 + $0x58] sm:$0xff]  }
 0x1dd   : > { %v4164_v53 = vpack.c.bf16 %v13236_v57, %v13234_v34  ;;  %v11399_v58 = vpop.f32.mrb[123].mxu1 }
 0x1de   : > { %v4297_v18 = vpop.permute.xlu1 %4296 }
 0x1df   : > { %v4330_v1 = vsel %vm4215_vm2, %v12160_v61, %v4297_v18  ;;  %v13242_v59 = vpop.f32.mrb[124].mxu0 }
 0x1e0   : > { %4888 = vmatmul.mubr.bf16.vlgmr.msra.gmra.mrb[128].mxu1 %v4330_v1  ;;  %v11404_v4 = vpop.f32.mrb[125].mxu0  ;;  %v12172_v1 = vld [vmem:[%s12346_s30] sm:$0xff]  }
 0x1e1   : > { %10481 = vmatprep.mubr.msk.bf16.mxu1 %vm4215_vm2, %v4152_v9  ;;  %v13248_v37 = vpop.f32.mrb[126].mxu0 }
 0x1e2   : > { %v4165_v21 = vpack.c.bf16 %v13248_v37, %v13242_v59  ;;  %v11405_v23 = vpop.f32.mrb[127].mxu0  ;;  %v13252_v8 = vpop.f32.mrb[124].mxu1  ;;  %v12176_v59 = vld [vmem:[%s12412_s15 + $0x70] sm:$0xff]  }
 0x1e3   : > { %v4299_v2 = vpop.permute.xlu1 %4298  ;;  %v11410_v15 = vpop.f32.mrb[125].mxu1 }
 0x1e4   : > { %v13254_v29 = vpop.f32.mrb[126].mxu1  ;;  %v4334_v9 = vsel %vm4215_vm2, %v12161_v20, %v4299_v2 }
 0x1e5   : > { %v4166_v11 = vpack.c.bf16 %v13254_v29, %v13252_v8  ;;  %v11411_v48 = vpop.f32.mrb[127].mxu1 }
 0x1e7   : > { %v4301_v30 = vpop.permute.xlu1 %4300 }
 0x1e8   : > { %4896 = vmatmul.mubr.bf16.gmra.mrb[132].mxu1 %v4334_v9  ;;  %v4338_v63 = vsel %vm4215_vm2, %v12162_v50, %v4301_v30 }
 0x1e9   : > { %10482 = vmatprep.mubr.msk.bf16.mxu1 %vm4215_vm2, %v4153_v27 }
 0x1eb   : > { %v4303_v49 = vpop.permute.xlu1 %4302 }
 0x1ec   : > { %v4342_v25 = vsel %vm4215_vm2, %v12163_v35, %v4303_v49  ;;  %v12174_v49 = vld [vmem:[%s12412_s15 + $0x68] sm:$0xff]  }
 0x1ef   : > { %v4305_v40 = vpop.permute.xlu1 %4304 }
 0x1f0   : > { %4904 = vmatmul.mubr.bf16.gmra.mrb[136].mxu1 %v4338_v63  ;;  %v4346_v27 = vsel %vm4215_vm2, %v12164_v33, %v4305_v40  ;;  %v12175_v33 = vld [vmem:[%s12346_s30 + $0x10] sm:$0xff]  }
 0x1f1   : > { %10483 = vmatprep.mubr.msk.bf16.mxu1 %vm4215_vm2, %v4154_v55 }
 0x1f3   : > { %v4307_v44 = vpop.permute.xlu1 %4306 }
 0x1f4   : > { %v4350_v55 = vsel %vm4215_vm2, %v12165_v16, %v4307_v44 }
 0x1f7   : > { %v4309_v14 = vpop.permute.xlu1 %4308 }
 0x1f8   : > { %4912 = vmatmul.mubr.bf16.gmra.mrb[140].mxu1 %v4342_v25 }
 0x1f9   : > { %10484 = vmatprep.mubr.msk.bf16.mxu1 %vm4215_vm2, %v4155_v12  ;;  %v4354_v12 = vsel %vm4215_vm2, %v12166_v39, %v4309_v14 }
 0x1fb   : > { %v4311_v42 = vpop.permute.xlu1 %4310 }
 0x1fe   : > { %v4313_v62 = vpop.permute.xlu0 %4312 }
 0x1ff   : > { %v4315_v10 = vpop.permute.xlu1 %4314 }
 0x200   : > { %4920 = vmatmul.mubr.bf16.gmra.mrb[144].mxu1 %v4346_v27 }
 0x201   : > { %10485 = vmatprep.mubr.msk.bf16.mxu1 %vm4215_vm2, %v4156_v19  ;;  %v4358_v19 = vsel %vm4215_vm2, %v12167_v36, %v4311_v42 }
 0x206   : > { %v4317_v6 = vpop.permute.xlu0 %4316 }
 0x208   : > { %4928 = vmatmul.mubr.bf16.gmra.mrb[148].mxu1 %v4350_v55 }
 0x209   : > { %10486 = vmatprep.mubr.msk.bf16.mxu1 %vm4215_vm2, %v4157_v13  ;;  %v4362_v13 = vsel %vm4215_vm2, %v12168_v7, %v4313_v62  ;;  %v12177_v62 = vld [vmem:[%s12412_s15 + $0x78] sm:$0xff]  }
 0x20e   : > { %v4321_v58 = vpop.permute.xlu0 %4320 }
 0x20f   : > { %v4378_v46 = vsel %vm4215_vm2, %v12173_v51, %v4321_v58 }
 0x210   : > { %4936 = vmatmul.mubr.bf16.gmra.mrb[152].mxu1 %v4354_v12 }
 0x211   : > { %10487 = vmatprep.mubr.msk.bf16.mxu1 %vm4215_vm2, %v4158_v28  ;;  %v4366_v28 = vsel %vm4215_vm2, %v12169_v32, %v4315_v10  ;;  %v12178_v10 = vld [vmem:[%s12346_s30 + $0x20] sm:$0xff]  }
 0x218   : > { %4944 = vmatmul.mubr.bf16.gmra.mrb[156].mxu1 %v4358_v19 }
 0x219   : > { %10488 = vmatprep.mubr.msk.bf16.mxu1 %vm4215_vm2, %v4159_v24  ;;  %v4370_v24 = vsel %vm4215_vm2, %v12170_v43, %v4317_v6 }
 0x220   : > { %4952 = vmatmul.mubr.bf16.gmra.mrb[160].mxu1 %v4362_v13 }
 0x221   : > { %10489 = vmatprep.mubr.msk.bf16.mxu1 %vm4215_vm2, %v4160_v60  ;;  %v4319_v60 = vpop.permute.xlu1 %4318 }
 0x222   : > { %v4374_v45 = vsel %vm4215_vm2, %v12171_v52, %v4319_v60  ;;  %v12180_v52 = vld [vmem:[%s12346_s30 + $0x18] sm:$0xff]  }
 0x225   : > { %v4323_v48 = vpop.permute.xlu1 %4322 }
 0x226   : > { %v4382_v35 = vsel %vm4215_vm2, %v12174_v49, %v4323_v48 }
 0x228   : > { %4960 = vmatmul.mubr.bf16.gmra.mrb[164].mxu1 %v4366_v28 }
 0x229   : > { %10490 = vmatprep.mubr.msk.bf16.mxu1 %vm4215_vm2, %v4161_v31  ;;  %v4327_v14 = vpop.permute.xlu1 %4326 }
 0x22a   : > { %v4390_v7 = vsel %vm4215_vm2, %v12177_v62, %v4327_v14 }
 0x230   : > { %4968 = vmatmul.mubr.bf16.gmra.mrb[168].mxu1 %v4370_v24  ;;  %v12179_v24 = vld [vmem:[%s12346_s30 + $0x8] sm:$0xff]  }
 0x231   : > { %10491 = vmatprep.mubr.msk.bf16.mxu1 %vm4215_vm2, %v4162_v41 }
 0x233   : > { %v4577_v3 = vpop.f32.mrb[128].mxu0 }
 0x234   : > { %v4579_v38 = vpop.f32.mrb[129].mxu0  ;;  %v4578_v31 = vadd.f32 %v13321_v47, %v4577_v3 }
 0x235   : > { %v4580_v17 = vpop.f32.mrb[130].mxu0 }
 0x236   : > { %v4581_v22 = vadd.f32 %v13321_v47, %v4580_v17  ;;  %v4582_v56 = vpop.f32.mrb[131].mxu0 }
 0x238   : > { %v13327_v5 = vpack.c.bf16 %v4581_v22, %v4578_v31  ;;  %4976 = vmatmul.mubr.bf16.gmra.mrb[172].mxu1 %v4374_v45 }
 0x239   : > { %10492 = vmatprep.mubr.msk.bf16.mxu1 %vm4215_vm2, %v4163_v54 }
 0x23a   : > { %11413 = vmatpush3.bf16.msra.mxu0 %v13327_v5 }
 0x23b   : > { %v4585_v41 = vpop.f32.mrb[132].mxu0  ;;  %11424 = vmatprep.subr.bf16.mxu0 %v14741_v0 }
 0x23c   : > { %v4587_v18 = vpop.f32.mrb[133].mxu0  ;;  %v4586_v4 = vadd.f32 %v13321_v47, %v4585_v41 }
 0x23d   : > { %v4588_v61 = vpop.f32.mrb[134].mxu0  ;;  %11415 = vmatmul.mubr.msk.bf16.vlgmr.msra.gmra.mrb[192].mxu0 %vm785_vm1, %v12172_v1  ;;  %v12181_v18 = vld [vmem:[%s12346_s30 + $0x30] sm:$0xff]  }
 0x23e   : > { %v4589_v23 = vadd.f32 %v13321_v47, %v4588_v61  ;;  %v4590_v2 = vpop.f32.mrb[135].mxu0  ;;  %11426 = vmatprep.mubr.msk.bf16.mxu0 %vm12249_vm0, %v14741_v0 }
 0x23f   : > { %v12182_v2 = vld [vmem:[%s12346_s30 + $0x28] sm:$0xff]  }
 0x240   : > { %v13343_v54 = vpack.c.bf16 %v4589_v23, %v4586_v4  ;;  %4984 = vmatmul.mubr.bf16.gmra.mrb[176].mxu1 %v4378_v46 }
 0x241   : > { %10493 = vmatprep.mubr.msk.bf16.mxu1 %vm4215_vm2, %v4164_v53  ;;  %v4325_v53 = vpop.permute.xlu0 %4324 }
 0x242   : > { %11419 = vmatpush3.bf16.msra.mxu1 %v13343_v54  ;;  %v4386_v37 = vsel %vm4215_vm2, %v12176_v59, %v4325_v53  ;;  %v12185_v59 = vld [vmem:[%s12346_s30 + $0x48] sm:$0xff]  }
 0x243   : > { %v4593_v15 = vpop.f32.mrb[136].mxu0  ;;  %11430 = vmatprep.subr.bf16.mxu1 %v14741_v0 }
 0x244   : > { %v4595_v20 = vpop.f32.mrb[137].mxu0  ;;  %v4594_v30 = vadd.f32 %v13321_v47, %v4593_v15 }
 0x245   : > { %v4596_v9 = vpop.f32.mrb[138].mxu0 }
 0x246   : > { %v4597_v50 = vadd.f32 %v13321_v47, %v4596_v9  ;;  %v4598_v63 = vpop.f32.mrb[139].mxu0 }
 0x248   : > { %v13355_v34 = vpack.c.bf16 %v4597_v50, %v4594_v30  ;;  %4992 = vmatmul.mubr.bf16.gmra.mrb[180].mxu1 %v4382_v35  ;;  %v12183_v50 = vld [vmem:[%s12346_s30 + $0x38] sm:$0xff]  }
 0x249   : > { %10494 = vmatprep.mubr.msk.bf16.mxu1 %vm4215_vm2, %v4165_v21 }
 0x24a   : > { %11425 = vmatpush3.bf16.msra.mxu0 %v13355_v34 }
 0x24b   : > { %v4601_v57 = vpop.f32.mrb[140].mxu0  ;;  %11436 = vmatprep.subr.bf16.mxu0 %v14741_v0 }
 0x24c   : > { %v4603_v25 = vpop.f32.mrb[141].mxu0  ;;  %v4602_v27 = vadd.f32 %v13321_v47, %v4601_v57  ;;  %v12184_v57 = vld [vmem:[%s12346_s30 + $0x40] sm:$0xff]  }
 0x24d   : > { %v4604_v40 = vpop.f32.mrb[142].mxu0  ;;  %11427 = vmatmul.mubr.msk.bf16.vlgmr.msra.gmra.mrb[196].mxu0 %vm785_vm1, %v12175_v33 }
 0x24e   : > { %v4605_v44 = vadd.f32 %v13321_v47, %v4604_v40  ;;  %v4606_v16 = vpop.f32.mrb[143].mxu0  ;;  %11438 = vmatprep.mubr.msk.bf16.mxu0 %vm12249_vm0, %v14741_v0 }
 0x250   : > { %v13371_v21 = vpack.c.bf16 %v4605_v44, %v4602_v27  ;;  %5000 = vmatmul.mubr.bf16.gmra.mrb[184].mxu1 %v4386_v37 }
 0x251   : > { %10495 = vmatprep.mubr.msk.bf16.mxu1 %vm4215_vm2, %v4166_v11 }
 0x253   : > { %v4609_v55 = vpop.f32.mrb[144].mxu0 }
 0x254   : > { %v4611_v39 = vpop.f32.mrb[145].mxu0  ;;  %v4610_v42 = vadd.f32 %v13321_v47, %v4609_v55 }
 0x255   : > { %v4612_v12 = vpop.f32.mrb[146].mxu0 }
 0x256   : > { %v4613_v36 = vadd.f32 %v13321_v47, %v4612_v12  ;;  %v4614_v19 = vpop.f32.mrb[147].mxu0 }
 0x257   : > { %v12186_v19 = vld [vmem:[%s12346_s30 + $0x50] sm:$0xff]  }
 0x258   : > { %v13381_v13 = vpack.c.bf16 %v4613_v36, %v4610_v42  ;;  %5008 = vmatmul.mubr.bf16.gmra.mrb[188].mxu1 %v4390_v7 }
 0x259   : > { %11420 = vmatprep.mubr.msk.bf16.mxu1 %vm12249_vm0, %v14741_v0 }
 0x25a   : > { %11437 = vmatpush3.bf16.msra.mxu0 %v13381_v13 }
 0x25b   : > { %v4617_v8 = vpop.f32.mrb[148].mxu0  ;;  %11448 = vmatprep.subr.bf16.mxu0 %v14741_v0 }
 0x25c   : > { %v4619_v29 = vpop.f32.mrb[149].mxu0  ;;  %v4618_v32 = vadd.f32 %v13321_v47, %v4617_v8 }
 0x25d   : > { %v4620_v11 = vpop.f32.mrb[150].mxu0  ;;  %11439 = vmatmul.mubr.msk.bf16.vlgmr.msra.gmra.mrb[200].mxu0 %vm785_vm1, %v12178_v10 }
 0x25e   : > { %v4621_v28 = vadd.f32 %v13321_v47, %v4620_v11  ;;  %v4622_v6 = vpop.f32.mrb[151].mxu0  ;;  %11450 = vmatprep.mubr.msk.bf16.mxu0 %vm12249_vm0, %v14741_v0 }
 0x260   : > { %v13393_v43 = vpack.c.bf16 %v4621_v28, %v4618_v32  ;;  %11421 = vmatmul.mubr.msk.bf16.vlgmr.msra.gmra.mrb[192].mxu1 %vm785_vm1, %v12179_v24  ;;  %v12187_v28 = vld [vmem:[%s12346_s30 + $0x58] sm:$0xff]  }
 0x261   : > { %11431 = vmatpush3.bf16.msra.mxu1 %v13371_v21  ;;  %11432 = vmatprep.mubr.msk.bf16.mxu1 %vm12249_vm0, %v14741_v0 }
 0x262   : > { %11442 = vmatprep.subr.bf16.mxu1 %v14741_v0 }
 0x263   : > { %v4625_v3 = vpop.f32.mrb[152].mxu0 }
 0x264   : > { %v4627_v60 = vpop.f32.mrb[153].mxu0  ;;  %v4626_v17 = vadd.f32 %v13321_v47, %v4625_v3 }
 0x265   : > { %v4628_v38 = vpop.f32.mrb[154].mxu0 }
 0x266   : > { %v4629_v31 = vadd.f32 %v13321_v47, %v4628_v38  ;;  %v4630_v22 = vpop.f32.mrb[155].mxu0 }
 0x267   : > { %v12188_v22 = vld [vmem:[%s12346_s30 + $0x60] sm:$0xff]  }
 0x268   : > { %v13403_v56 = vpack.c.bf16 %v4629_v31, %v4626_v17  ;;  %11433 = vmatmul.mubr.msk.bf16.vlgmr.msra.gmra.mrb[196].mxu1 %vm785_vm1, %v12180_v52 }
 0x269   : > { %11443 = vmatpush3.bf16.msra.mxu1 %v13393_v43  ;;  %11444 = vmatprep.mubr.msk.bf16.mxu1 %vm12249_vm0, %v14741_v0 }
 0x26a   : > { %11449 = vmatpush3.bf16.msra.mxu0 %v13403_v56  ;;  %11454 = vmatprep.subr.bf16.mxu1 %v14741_v0 }
 0x26b   : > { %v4633_v45 = vpop.f32.mrb[156].mxu0  ;;  %11460 = vmatprep.subr.bf16.mxu0 %v14741_v0 }
 0x26c   : > { %v4635_v41 = vpop.f32.mrb[157].mxu0  ;;  %v4634_v61 = vadd.f32 %v13321_v47, %v4633_v45 }
 0x26d   : > { %v4636_v58 = vpop.f32.mrb[158].mxu0  ;;  %11451 = vmatmul.mubr.msk.bf16.vlgmr.msra.gmra.mrb[204].mxu0 %vm785_vm1, %v12181_v18 }
 0x26e   : > { %v4637_v1 = vadd.f32 %v13321_v47, %v4636_v58  ;;  %v4638_v4 = vpop.f32.mrb[159].mxu0  ;;  %11462 = vmatprep.mubr.msk.bf16.mxu0 %vm12249_vm0, %v14741_v0 }
 0x26f   : > { %v12189_v4 = vld [vmem:[%s12346_s30 + $0x68] sm:$0xff]  }
 0x270   : > { %v13419_v23 = vpack.c.bf16 %v4637_v1, %v4634_v61  ;;  %11445 = vmatmul.mubr.msk.bf16.vlgmr.msra.gmra.mrb[200].mxu1 %vm785_vm1, %v12182_v2 }
 0x271   : > { %11456 = vmatprep.mubr.msk.bf16.mxu1 %vm12249_vm0, %v14741_v0 }
 0x272   : > { %11455 = vmatpush3.bf16.msra.mxu1 %v13419_v23 }
 0x273   : > { %v4641_v51 = vpop.f32.mrb[160].mxu0  ;;  %11466 = vmatprep.subr.bf16.mxu1 %v14741_v0 }
 0x274   : > { %v4643_v46 = vpop.f32.mrb[161].mxu0  ;;  %v4642_v48 = vadd.f32 %v13321_v47, %v4641_v51 }
 0x275   : > { %v4644_v15 = vpop.f32.mrb[162].mxu0 }
 0x276   : > { %v4645_v20 = vadd.f32 %v13321_v47, %v4644_v15  ;;  %v4646_v9 = vpop.f32.mrb[163].mxu0 }
 0x278   : > { %v13429_v30 = vpack.c.bf16 %v4645_v20, %v4642_v48  ;;  %11457 = vmatmul.mubr.msk.bf16.vlgmr.msra.gmra.mrb[204].mxu1 %vm785_vm1, %v12183_v50  ;;  %v12190_v50 = vld [vmem:[%s12346_s30 + $0x70] sm:$0xff]  }
 0x279   : > { %11468 = vmatprep.mubr.msk.bf16.mxu1 %vm12249_vm0, %v14741_v0 }
 0x27a   : > { %11461 = vmatpush3.bf16.msra.mxu0 %v13429_v30 }
 0x27b   : > { %v4649_v63 = vpop.f32.mrb[164].mxu0  ;;  %11472 = vmatprep.subr.bf16.mxu0 %v14741_v0 }
 0x27c   : > { %v4651_v49 = vpop.f32.mrb[165].mxu0  ;;  %v4650_v53 = vadd.f32 %v13321_v47, %v4649_v63 }
 0x27d   : > { %v4652_v35 = vpop.f32.mrb[166].mxu0  ;;  %11463 = vmatmul.mubr.msk.bf16.vlgmr.msra.gmra.mrb[208].mxu0 %vm785_vm1, %v12184_v57 }
 0x27e   : > { %v4653_v25 = vadd.f32 %v13321_v47, %v4652_v35  ;;  %v4654_v40 = vpop.f32.mrb[167].mxu0  ;;  %11474 = vmatprep.mubr.msk.bf16.mxu0 %vm12249_vm0, %v14741_v0 }
 0x280   : > { %v13443_v33 = vpack.c.bf16 %v4653_v25, %v4650_v53  ;;  %v13509_v53 = vld [vmem:[%s14739_s11] ss:$0 sm:$0xff] }
 0x282   : > { %11467 = vmatpush3.bf16.msra.mxu1 %v13443_v33 }
 0x283   : > { %v4657_v27 = vpop.f32.mrb[168].mxu0  ;;  %11478 = vmatprep.subr.bf16.mxu1 %v14741_v0 }
 0x284   : > { %v4659_v44 = vpop.f32.mrb[169].mxu0  ;;  %v4658_v37 = vadd.f32 %v13321_v47, %v4657_v27 }
 0x285   : > { %v4660_v16 = vpop.f32.mrb[170].mxu0  ;;  %11469 = vmatmul.mubr.msk.bf16.vlgmr.msra.gmra.mrb[208].mxu1 %vm785_vm1, %v12185_v59 }
 0x286   : > { %v4661_v55 = vadd.f32 %v13321_v47, %v4660_v16  ;;  %v4662_v14 = vpop.f32.mrb[171].mxu0  ;;  %11480 = vmatprep.mubr.msk.bf16.mxu1 %vm12249_vm0, %v14741_v0 }
 0x288   : > { %v13453_v39 = vpack.c.bf16 %v4661_v55, %v4658_v37 }
 0x28a   : > { %11473 = vmatpush3.bf16.msra.mxu0 %v13453_v39 }
 0x28b   : > { %v4665_v12 = vpop.f32.mrb[172].mxu0  ;;  %11484 = vmatprep.subr.bf16.mxu0 %v14741_v0 }
 0x28c   : > { %v4667_v42 = vpop.f32.mrb[173].mxu0  ;;  %v4666_v62 = vadd.f32 %v13321_v47, %v4665_v12 }
 0x28d   : > { %v4668_v36 = vpop.f32.mrb[174].mxu0  ;;  %11475 = vmatmul.mubr.msk.bf16.vlgmr.msra.gmra.mrb[212].mxu0 %vm785_vm1, %v12186_v19  ;;  %v12192_v42 = vld [vmem:[%s12421_s18] sm:$0xff]  }
 0x28e   : > { %v4669_v7 = vadd.f32 %v13321_v47, %v4668_v36  ;;  %v4670_v8 = vpop.f32.mrb[175].mxu0  ;;  %11486 = vmatprep.mubr.msk.bf16.mxu0 %vm12249_vm0, %v14741_v0 }
 0x290   : > { %v13463_v29 = vpack.c.bf16 %v4669_v7, %v4666_v62 }
 0x292   : > { %11479 = vmatpush3.bf16.msra.mxu1 %v13463_v29 }
 0x293   : > { %v4673_v11 = vpop.f32.mrb[176].mxu0  ;;  %11490 = vmatprep.subr.bf16.mxu1 %v14741_v0 }
 0x294   : > { %v4675_v10 = vpop.f32.mrb[177].mxu0  ;;  %v4674_v6 = vadd.f32 %v13321_v47, %v4673_v11 }
 0x295   : > { %v4676_v32 = vpop.f32.mrb[178].mxu0  ;;  %11481 = vmatmul.mubr.msk.bf16.vlgmr.msra.gmra.mrb[212].mxu1 %vm785_vm1, %v12187_v28 }
 0x296   : > { %v4677_v24 = vadd.f32 %v13321_v47, %v4676_v32  ;;  %v4678_v3 = vpop.f32.mrb[179].mxu0  ;;  %11492 = vmatprep.mubr.msk.bf16.mxu1 %vm12249_vm0, %v14741_v0  ;;  %v12193_v32 = vld [vmem:[%s12421_s18 + $0x8] sm:$0xff]  }
 0x298   : > { %v13473_v60 = vpack.c.bf16 %v4677_v24, %v4674_v6 }
 0x29a   : > { %11485 = vmatpush3.bf16.msra.mxu0 %v13473_v60 }
 0x29b   : > { %v4681_v38 = vpop.f32.mrb[180].mxu0  ;;  %11496 = vmatprep.subr.bf16.mxu0 %v14741_v0 }
 0x29c   : > { %v4683_v17 = vpop.f32.mrb[181].mxu0  ;;  %v4682_v52 = vadd.f32 %v13321_v47, %v4681_v38 }
 0x29d   : > { %v4684_v31 = vpop.f32.mrb[182].mxu0  ;;  %11487 = vmatmul.mubr.msk.bf16.vlgmr.msra.gmra.mrb[216].mxu0 %vm785_vm1, %v12188_v22  ;;  %v12194_v22 = vld [vmem:[%s12421_s18 + $0x10] sm:$0xff]  }
 0x29e   : > { %v4685_v45 = vadd.f32 %v13321_v47, %v4684_v31  ;;  %v4686_v41 = vpop.f32.mrb[183].mxu0  ;;  %11498 = vmatprep.mubr.msk.bf16.mxu0 %vm12249_vm0, %v14741_v0 }
 0x2a0   : > { %v13483_v58 = vpack.c.bf16 %v4685_v45, %v4682_v52 }
 0x2a2   : > { %11491 = vmatpush3.bf16.msra.mxu1 %v13483_v58 }
 0x2a3   : > { %v4689_v18 = vpop.f32.mrb[184].mxu0  ;;  %11502 = vmatprep.subr.bf16.mxu1 %v14741_v0 }
 0x2a4   : > { %v4691_v61 = vpop.f32.mrb[185].mxu0  ;;  %v4690_v2 = vadd.f32 %v13321_v47, %v4689_v18 }
 0x2a5   : > { %v4692_v1 = vpop.f32.mrb[186].mxu0  ;;  %11493 = vmatmul.mubr.msk.bf16.vlgmr.msra.gmra.mrb[216].mxu1 %vm785_vm1, %v12189_v4 }
 0x2a6   : > { %v4693_v51 = vadd.f32 %v13321_v47, %v4692_v1  ;;  %v4694_v46 = vpop.f32.mrb[187].mxu0  ;;  %11504 = vmatprep.mubr.msk.bf16.mxu1 %vm12249_vm0, %v14741_v0 }
 0x2a8   : > { %v13493_v15 = vpack.c.bf16 %v4693_v51, %v4690_v2  ;;  %v12195_v2 = vld [vmem:[%s12421_s18 + $0x18] sm:$0xff]  }
 0x2aa   : > { %11497 = vmatpush3.bf16.msra.mxu0 %v13493_v15 }
 0x2ab   : > { %v4697_v48 = vpop.f32.mrb[188].mxu0  ;;  %11508 = vmatprep.subr.bf16.mxu0 %v14741_v0 }
 0x2ac   : > { %v4699_v20 = vpop.f32.mrb[189].mxu0  ;;  %v4698_v63 = vadd.f32 %v13321_v47, %v4697_v48 }
 0x2ad   : > { %v4700_v9 = vpop.f32.mrb[190].mxu0  ;;  %11499 = vmatmul.mubr.msk.bf16.vlgmr.msra.gmra.mrb[220].mxu0 %vm785_vm1, %v12190_v50 }
 0x2ae   : > { %v4701_v49 = vadd.f32 %v13321_v47, %v4700_v9  ;;  %v4702_v35 = vpop.f32.mrb[191].mxu0  ;;  %11510 = vmatprep.mubr.msk.bf16.mxu0 %vm12249_vm0, %v14741_v0  ;;  %v12191_v47 = vld [vmem:[%s12346_s30 + $0x78] sm:$0xff]   ;;  %s14674_s30 = scalar_lea.vmem %s14740_s12, %s14751_s23 }
 0x2b0   : > { %v13503_v57 = vpack.c.bf16 %v4701_v49, %v4698_v63  ;;  %v12196_v49 = vld [vmem:[%s12421_s18 + $0x20] sm:$0xff]  }
 0x2b2   : > { %11503 = vmatpush3.bf16.msra.mxu1 %v13503_v57 }
 0x2b3   : > { %v4889_v25 = vpop.f32.mrb[128].mxu1  ;;  %11514 = vmatprep.subr.bf16.mxu1 %v14741_v0 }
 0x2b4   : > { %v4891_v40 = vpop.f32.mrb[129].mxu1  ;;  %v4890_v44 = vadd.f32 %v13509_v53, %v4889_v25 }
 0x2b5   : > { %v4892_v27 = vpop.f32.mrb[130].mxu1  ;;  %11505 = vmatmul.mubr.msk.bf16.vlgmr.msra.gmra.mrb[220].mxu1 %vm785_vm1, %v12191_v47 }
 0x2b6   : > { %v4893_v16 = vadd.f32 %v13509_v53, %v4892_v27  ;;  %v4894_v59 = vpop.f32.mrb[131].mxu1  ;;  %11516 = vmatprep.mubr.msk.bf16.mxu1 %vm12249_vm0, %v14741_v0 }
 0x2b7   : > { %v12197_v59 = vld [vmem:[%s12421_s18 + $0x28] sm:$0xff]  }
 0x2b8   : > { %v13518_v37 = vpack.c.bf16 %v4893_v16, %v4890_v44 }
 0x2ba   : > { %11509 = vmatpush3.bf16.msra.mxu0 %v13518_v37 }
 0x2bb   : > { %v4897_v55 = vpop.f32.mrb[132].mxu1  ;;  %11520 = vmatprep.subr.bf16.mxu0 %v14741_v0 }
 0x2bc   : > { %v4899_v14 = vpop.f32.mrb[133].mxu1  ;;  %v4898_v36 = vadd.f32 %v13509_v53, %v4897_v55 }
 0x2bd   : > { %v4900_v12 = vpop.f32.mrb[134].mxu1  ;;  %11511 = vmatmul.mubr.msk.bf16.vlgmr.msra.gmra.mrb[224].mxu0 %vm785_vm1, %v12192_v42 }
 0x2be   : > { %v4901_v19 = vadd.f32 %v13509_v53, %v4900_v12  ;;  %v4902_v62 = vpop.f32.mrb[135].mxu1  ;;  %11522 = vmatprep.mubr.msk.bf16.mxu0 %vm12249_vm0, %v14741_v0 }
 0x2c0   : > { %v13528_v7 = vpack.c.bf16 %v4901_v19, %v4898_v36 }
 0x2c2   : > { %11515 = vmatpush3.bf16.msra.mxu1 %v13528_v7 }
 0x2c3   : > { %v4905_v8 = vpop.f32.mrb[136].mxu1  ;;  %11526 = vmatprep.subr.bf16.mxu1 %v14741_v0 }
 0x2c4   : > { %v4907_v11 = vpop.f32.mrb[137].mxu1  ;;  %v4906_v28 = vadd.f32 %v13509_v53, %v4905_v8  ;;  %v12198_v8 = vld [vmem:[%s12421_s18 + $0x30] sm:$0xff]  }
 0x2c5   : > { %v4908_v10 = vpop.f32.mrb[138].mxu1  ;;  %11517 = vmatmul.mubr.msk.bf16.vlgmr.msra.gmra.mrb[224].mxu1 %vm785_vm1, %v12193_v32 }
 0x2c6   : > { %v4909_v6 = vadd.f32 %v13509_v53, %v4908_v10  ;;  %v4910_v24 = vpop.f32.mrb[139].mxu1  ;;  %11528 = vmatprep.mubr.msk.bf16.mxu1 %vm12249_vm0, %v14741_v0 }
 0x2c8   : > { %v13538_v3 = vpack.c.bf16 %v4909_v6, %v4906_v28 }
 0x2ca   : > { %11521 = vmatpush3.bf16.msra.mxu0 %v13538_v3 }
 0x2cb   : > { %v4913_v38 = vpop.f32.mrb[140].mxu1  ;;  %11532 = vmatprep.subr.bf16.mxu0 %v14741_v0 }
 0x2cc   : > { %v4915_v17 = vpop.f32.mrb[141].mxu1  ;;  %v4914_v52 = vadd.f32 %v13509_v53, %v4913_v38 }
 0x2cd   : > { %v4916_v31 = vpop.f32.mrb[142].mxu1  ;;  %11523 = vmatmul.mubr.msk.bf16.vlgmr.msra.gmra.mrb[228].mxu0 %vm785_vm1, %v12194_v22  ;;  %v12199_v17 = vld [vmem:[%s12421_s18 + $0x38] sm:$0xff]  }
 0x2ce   : > { %v4917_v45 = vadd.f32 %v13509_v53, %v4916_v31  ;;  %v4918_v41 = vpop.f32.mrb[143].mxu1  ;;  %11534 = vmatprep.mubr.msk.bf16.mxu0 %vm12249_vm0, %v14741_v0 }
 0x2d0   : > { %v13548_v18 = vpack.c.bf16 %v4917_v45, %v4914_v52 }
 0x2d2   : > { %11527 = vmatpush3.bf16.msra.mxu1 %v13548_v18 }
 0x2d3   : > { %v4921_v61 = vpop.f32.mrb[144].mxu1  ;;  %11538 = vmatprep.subr.bf16.mxu1 %v14741_v0 }
 0x2d4   : > { %v4923_v1 = vpop.f32.mrb[145].mxu1  ;;  %v4922_v51 = vadd.f32 %v13509_v53, %v4921_v61 }
 0x2d5   : > { %v4924_v4 = vpop.f32.mrb[146].mxu1  ;;  %11529 = vmatmul.mubr.msk.bf16.vlgmr.msra.gmra.mrb[228].mxu1 %vm785_vm1, %v12195_v2 }
 0x2d6   : > { %v4925_v46 = vadd.f32 %v13509_v53, %v4924_v4  ;;  %v4926_v48 = vpop.f32.mrb[147].mxu1  ;;  %11540 = vmatprep.mubr.msk.bf16.mxu1 %vm12249_vm0, %v14741_v0  ;;  %v12200_v4 = vld [vmem:[%s12421_s18 + $0x40] sm:$0xff]  }
 0x2d8   : > { %v13558_v20 = vpack.c.bf16 %v4925_v46, %v4922_v51 }
 0x2da   : > { %11533 = vmatpush3.bf16.msra.mxu0 %v13558_v20 }
 0x2db   : > { %v4929_v9 = vpop.f32.mrb[148].mxu1  ;;  %11544 = vmatprep.subr.bf16.mxu0 %v14741_v0 }
 0x2dc   : > { %v4931_v50 = vpop.f32.mrb[149].mxu1  ;;  %v4930_v35 = vadd.f32 %v13509_v53, %v4929_v9 }
 0x2dd   : > { %v4932_v63 = vpop.f32.mrb[150].mxu1  ;;  %11535 = vmatmul.mubr.msk.bf16.vlgmr.msra.gmra.mrb[232].mxu0 %vm785_vm1, %v12196_v49  ;;  %v12201_v49 = vld [vmem:[%s12421_s18 + $0x48] sm:$0xff]  }
 0x2de   : > { %v4933_v25 = vadd.f32 %v13509_v53, %v4932_v63  ;;  %v4934_v40 = vpop.f32.mrb[151].mxu1  ;;  %11546 = vmatprep.mubr.msk.bf16.mxu0 %vm12249_vm0, %v14741_v0 }
 0x2e0   : > { %v13568_v27 = vpack.c.bf16 %v4933_v25, %v4930_v35 }
 0x2e2   : > { %11539 = vmatpush3.bf16.msra.mxu1 %v13568_v27 }
 0x2e3   : > { %v4937_v47 = vpop.f32.mrb[152].mxu1  ;;  %11550 = vmatprep.subr.bf16.mxu1 %v14741_v0 }
 0x2e4   : > { %v4939_v44 = vpop.f32.mrb[153].mxu1  ;;  %v4938_v55 = vadd.f32 %v13509_v53, %v4937_v47 }
 0x2e5   : > { %v4940_v16 = vpop.f32.mrb[154].mxu1  ;;  %11541 = vmatmul.mubr.msk.bf16.vlgmr.msra.gmra.mrb[232].mxu1 %vm785_vm1, %v12197_v59 }
 0x2e6   : > { %v4941_v14 = vadd.f32 %v13509_v53, %v4940_v16  ;;  %v4942_v12 = vpop.f32.mrb[155].mxu1  ;;  %11552 = vmatprep.mubr.msk.bf16.mxu1 %vm12249_vm0, %v14741_v0 }
 0x2e8   : > { %v13578_v42 = vpack.c.bf16 %v4941_v14, %v4938_v55  ;;  %v12202_v55 = vld [vmem:[%s12421_s18 + $0x50] sm:$0xff]  }
 0x2ea   : > { %11545 = vmatpush3.bf16.msra.mxu0 %v13578_v42 }
 0x2eb   : > { %v4945_v36 = vpop.f32.mrb[156].mxu1  ;;  %11556 = vmatprep.subr.bf16.mxu0 %v14741_v0 }
 0x2ec   : > { %v4947_v19 = vpop.f32.mrb[157].mxu1  ;;  %v4946_v11 = vadd.f32 %v13509_v53, %v4945_v36 }
 0x2ed   : > { %v4948_v62 = vpop.f32.mrb[158].mxu1  ;;  %11547 = vmatmul.mubr.msk.bf16.vlgmr.msra.gmra.mrb[236].mxu0 %vm785_vm1, %v12198_v8 }
 0x2ee   : > { %v4949_v10 = vadd.f32 %v13509_v53, %v4948_v62  ;;  %v4950_v32 = vpop.f32.mrb[159].mxu1  ;;  %11558 = vmatprep.mubr.msk.bf16.mxu0 %vm12249_vm0, %v14741_v0 }
 0x2f0   : > { %v13588_v28 = vpack.c.bf16 %v4949_v10, %v4946_v11 }
 0x2f2   : > { %11551 = vmatpush3.bf16.msra.mxu1 %v13588_v28 }
 0x2f3   : > { %v4953_v6 = vpop.f32.mrb[160].mxu1  ;;  %11562 = vmatprep.subr.bf16.mxu1 %v14741_v0 }
 0x2f4   : > { %v4955_v24 = vpop.f32.mrb[161].mxu1  ;;  %v4954_v31 = vadd.f32 %v13509_v53, %v4953_v6 }
 0x2f5   : > { %v4956_v38 = vpop.f32.mrb[162].mxu1  ;;  %11553 = vmatmul.mubr.msk.bf16.vlgmr.msra.gmra.mrb[236].mxu1 %vm785_vm1, %v12199_v17  ;;  %v12203_v17 = vld [vmem:[%s12421_s18 + $0x58] sm:$0xff]  }
 0x2f6   : > { %v4957_v22 = vadd.f32 %v13509_v53, %v4956_v38  ;;  %v4958_v52 = vpop.f32.mrb[163].mxu1  ;;  %11564 = vmatprep.mubr.msk.bf16.mxu1 %vm12249_vm0, %v14741_v0 }
 0x2f8   : > { %v13598_v45 = vpack.c.bf16 %v4957_v22, %v4954_v31 }
 0x2fa   : > { %11557 = vmatpush3.bf16.msra.mxu0 %v13598_v45 }
 0x2fb   : > { %v4961_v41 = vpop.f32.mrb[164].mxu1  ;;  %11568 = vmatprep.subr.bf16.mxu0 %v14741_v0 }
 0x2fc   : > { %v4963_v61 = vpop.f32.mrb[165].mxu1  ;;  %v4962_v2 = vadd.f32 %v13509_v53, %v4961_v41 }
 0x2fd   : > { %v4964_v1 = vpop.f32.mrb[166].mxu1  ;;  %11559 = vmatmul.mubr.msk.bf16.vlgmr.msra.gmra.mrb[240].mxu0 %vm785_vm1, %v12200_v4 }
 0x2fe   : > { %v4965_v51 = vadd.f32 %v13509_v53, %v4964_v1  ;;  %v4966_v46 = vpop.f32.mrb[167].mxu1  ;;  %11570 = vmatprep.mubr.msk.bf16.mxu0 %vm12249_vm0, %v14741_v0 }
 0x300   : > { %v13608_v48 = vpack.c.bf16 %v4965_v51, %v4962_v2  ;;  %v12204_v2 = vld [vmem:[%s12421_s18 + $0x60] sm:$0xff]  }
 0x302   : > { %11563 = vmatpush3.bf16.msra.mxu1 %v13608_v48 }
 0x303   : > { %v4969_v9 = vpop.f32.mrb[168].mxu1  ;;  %11574 = vmatprep.subr.bf16.mxu1 %v14741_v0 }
 0x304   : > { %v4971_v50 = vpop.f32.mrb[169].mxu1  ;;  %v4970_v35 = vadd.f32 %v13509_v53, %v4969_v9 }
 0x305   : > { %v4972_v63 = vpop.f32.mrb[170].mxu1  ;;  %11565 = vmatmul.mubr.msk.bf16.vlgmr.msra.gmra.mrb[240].mxu1 %vm785_vm1, %v12201_v49 }
 0x306   : > { %v4973_v25 = vadd.f32 %v13509_v53, %v4972_v63  ;;  %v4974_v40 = vpop.f32.mrb[171].mxu1  ;;  %11576 = vmatprep.mubr.msk.bf16.mxu1 %vm12249_vm0, %v14741_v0 }
 0x308   : > { %v13618_v47 = vpack.c.bf16 %v4973_v25, %v4970_v35 }
 0x30a   : > { %11569 = vmatpush3.bf16.msra.mxu0 %v13618_v47 }
 0x30b   : > { %v4977_v44 = vpop.f32.mrb[172].mxu1  ;;  %11580 = vmatprep.subr.bf16.mxu0 %v14741_v0 }
 0x30c   : > { %v4979_v16 = vpop.f32.mrb[173].mxu1  ;;  %v4978_v14 = vadd.f32 %v13509_v53, %v4977_v44 }
 0x30d   : > { %v4980_v59 = vpop.f32.mrb[174].mxu1  ;;  %11571 = vmatmul.mubr.msk.bf16.vlgmr.msra.gmra.mrb[244].mxu0 %vm785_vm1, %v12202_v55  ;;  %v12205_v55 = vld [vmem:[%s12421_s18 + $0x68] sm:$0xff]  }
 0x30e   : > { %v4981_v12 = vadd.f32 %v13509_v53, %v4980_v59  ;;  %v4982_v36 = vpop.f32.mrb[175].mxu1  ;;  %11582 = vmatprep.mubr.msk.bf16.mxu0 %vm12249_vm0, %v14741_v0 }
 0x310   : > { %v13628_v19 = vpack.c.bf16 %v4981_v12, %v4978_v14  ;;  %v5082_v62 = vpop.f32.mrb[192].mxu0 }
 0x311   : > { %v11416_v8 = vpop.f32.mrb[193].mxu0 }
 0x312   : > { %v5085_v11 = vpop.f32.mrb[194].mxu0  ;;  %11575 = vmatpush3.bf16.msra.mxu1 %v13628_v19 }
 0x313   : > { %v5704_v10 = vpack.c.bf16 %v5085_v11, %v5082_v62  ;;  %v4985_v32 = vpop.f32.mrb[176].mxu1  ;;  %v11417_v6 = vpop.f32.mrb[195].mxu0  ;;  %11586 = vmatprep.subr.bf16.mxu1 %v14741_v0 }
 0x314   : > { %v4987_v24 = vpop.f32.mrb[177].mxu1  ;;  %v4986_v31 = vadd.f32 %v13509_v53, %v4985_v32  ;;  %v12206_v32 = vld [vmem:[%s12421_s18 + $0x70] sm:$0xff]  }
 0x315   : > { %v4988_v38 = vpop.f32.mrb[178].mxu1  ;;  %7752 = vrot.lane.b32.xlu0 %v5704_v10, %s12250_s24  ;;  %11577 = vmatmul.mubr.msk.bf16.vlgmr.msra.gmra.mrb[244].mxu1 %vm785_vm1, %v12203_v17 }
 0x316   : > { %v4989_v22 = vadd.f32 %v13509_v53, %v4988_v38  ;;  %v4990_v52 = vpop.f32.mrb[179].mxu1  ;;  %11588 = vmatprep.mubr.msk.bf16.mxu1 %vm12249_vm0, %v14741_v0 }
 0x318   : > { %v13639_v41 = vpack.c.bf16 %v4989_v22, %v4986_v31 }
 0x31a   : > { %11581 = vmatpush3.bf16.msra.mxu0 %v13639_v41 }
 0x31b   : > { %v4993_v61 = vpop.f32.mrb[180].mxu1  ;;  %11592 = vmatprep.subr.bf16.mxu0 %v14741_v0 }
 0x31c   : > { %v4995_v1 = vpop.f32.mrb[181].mxu1  ;;  %v4994_v51 = vadd.f32 %v13509_v53, %v4993_v61 }
 0x31d   : > { %v4996_v4 = vpop.f32.mrb[182].mxu1  ;;  %11583 = vmatmul.mubr.msk.bf16.vlgmr.msra.gmra.mrb[248].mxu0 %vm785_vm1, %v12204_v2 }
 0x31e   : > { %v4997_v46 = vadd.f32 %v13509_v53, %v4996_v4  ;;  %v4998_v9 = vpop.f32.mrb[183].mxu1  ;;  %11594 = vmatprep.mubr.msk.bf16.mxu0 %vm12249_vm0, %v14741_v0 }
 0x320   : > { %v13649_v50 = vpack.c.bf16 %v4997_v46, %v4994_v51  ;;  %v5164_v63 = vpop.f32.mrb[196].mxu0  ;;  %v12207_v51 = vld [vmem:[%s12421_s18 + $0x78] sm:$0xff]   ;;  %v12208_v46 = vld [vmem:[%s12496_s22] sm:$0xff]  }
 0x321   : > { %v11428_v49 = vpop.f32.mrb[197].mxu0 }
 0x322   : > { %v5167_v35 = vpop.f32.mrb[198].mxu0  ;;  %11587 = vmatpush3.bf16.msra.mxu1 %v13649_v50 }
 0x323   : > { %v5706_v25 = vpack.c.bf16 %v5167_v35, %v5164_v63  ;;  %v5001_v40 = vpop.f32.mrb[184].mxu1  ;;  %v11429_v44 = vpop.f32.mrb[199].mxu0  ;;  %11598 = vmatprep.subr.bf16.mxu1 %v14741_v0 }
 0x324   : > { %v5003_v16 = vpop.f32.mrb[185].mxu1  ;;  %v5002_v14 = vadd.f32 %v13509_v53, %v5001_v40  ;;  %v12209_v40 = vld [vmem:[%s12496_s22 + $0x8] sm:$0xff]   ;;  %v12210_v44 = vld [vmem:[%s12496_s22 + $0x10] sm:$0xff]  }
 0x325   : > { %v5004_v59 = vpop.f32.mrb[186].mxu1  ;;  %7756 = vrot.lane.b32.xlu0 %v5706_v25, %s12250_s24  ;;  %11589 = vmatmul.mubr.msk.bf16.vlgmr.msra.gmra.mrb[248].mxu1 %vm785_vm1, %v12205_v55 }
 0x326   : > { %v5005_v12 = vadd.f32 %v13509_v53, %v5004_v59  ;;  %v5006_v36 = vpop.f32.mrb[187].mxu1  ;;  %11600 = vmatprep.mubr.msk.bf16.mxu1 %vm12249_vm0, %v14741_v0 }
 0x328   : > { %v13660_v62 = vpack.c.bf16 %v5005_v12, %v5002_v14 }
 0x32a   : > { %11593 = vmatpush3.bf16.msra.mxu0 %v13660_v62 }
 0x32b   : > { %v5009_v8 = vpop.f32.mrb[188].mxu1  ;;  %11604 = vmatprep.subr.bf16.mxu0 %v14741_v0 }
 0x32c   : > { %v5011_v11 = vpop.f32.mrb[189].mxu1  ;;  %v5010_v6 = vadd.f32 %v13509_v53, %v5009_v8 }
 0x32d   : > { %v5012_v10 = vpop.f32.mrb[190].mxu1  ;;  %11595 = vmatmul.mubr.msk.bf16.vlgmr.msra.gmra.mrb[252].mxu0 %vm785_vm1, %v12206_v32 }
 0x32e   : > { %v5013_v24 = vadd.f32 %v13509_v53, %v5012_v10  ;;  %v5014_v38 = vpop.f32.mrb[191].mxu1  ;;  %11605 = vmatpush3.bf16.msra.mxu0 %v13518_v37  ;;  %11606 = vmatprep.mubr.msk.bf16.mxu0 %vm12249_vm0, %v14741_v0 }
 0x32f   : > { %11616 = vmatprep.subr.bf16.mxu0 %v14741_v0 }
 0x330   : > { %v13672_v17 = vpack.c.bf16 %v5013_v24, %v5010_v6  ;;  %v5246_v31 = vpop.f32.mrb[200].mxu0  ;;  %v12211_v6 = vld [vmem:[%s12496_s22 + $0x18] sm:$0xff]   ;;  %v12212_v24 = vld [vmem:[%s12496_s22 + $0x20] sm:$0xff]  }
 0x331   : > { %v11440_v22 = vpop.f32.mrb[201].mxu0 }
 0x332   : > { %v5249_v52 = vpop.f32.mrb[202].mxu0  ;;  %11599 = vmatpush3.bf16.msra.mxu1 %v13672_v17 }
 0x333   : > { %v5708_v61 = vpack.c.bf16 %v5249_v52, %v5246_v31  ;;  %v5123_v1 = vpop.f32.mrb[192].mxu1  ;;  %11610 = vmatprep.subr.bf16.mxu1 %v14741_v0  ;;  %v11441_v53 = vpop.f32.mrb[203].mxu0 }
 0x334   : > { %v11422_v4 = vpop.f32.mrb[193].mxu1  ;;  %v12214_v53 = vld [vmem:[%s12496_s22 + $0x30] sm:$0xff]  }
 0x335   : > { %v5126_v2 = vpop.f32.mrb[194].mxu1  ;;  %11601 = vmatmul.mubr.msk.bf16.vlgmr.msra.gmra.mrb[252].mxu1 %vm785_vm1, %v12207_v51  ;;  %11607 = vmatmul.mubr.msk.bf16.vlgmr.msra.gmra.mrb[0].mxu0 %vm785_vm1, %v12208_v46 }
 0x336   : > { %v5705_v9 = vpack.c.bf16 %v5126_v2, %v5123_v1  ;;  %11617 = vmatpush3.bf16.msra.mxu0 %v13538_v3  ;;  %7760 = vrot.lane.b32.xlu0 %v5708_v61, %s12250_s24  ;;  %v11423_v63 = vpop.f32.mrb[195].mxu1  ;;  %v12213_v1 = vld [vmem:[%s12496_s22 + $0x28] sm:$0xff]  }
 0x337   : > { %11611 = vmatpush3.bf16.msra.mxu1 %v13528_v7  ;;  %11612 = vmatprep.mubr.msk.bf16.mxu1 %vm12249_vm0, %v14741_v0 }
 0x338   : > { %7754 = vrot.lane.b32.xlu1 %v5705_v9, %s12250_s24  ;;  %11618 = vmatprep.mubr.msk.bf16.mxu0 %vm12249_vm0, %v14741_v0 }
 0x339   : > { %11622 = vmatprep.subr.bf16.mxu1 %v14741_v0  ;;  %11628 = vmatprep.subr.bf16.mxu0 %v14741_v0 }
 0x33b   : > { %v5205_v49 = vpop.f32.mrb[196].mxu1 }
 0x33c   : > { %v11434_v35 = vpop.f32.mrb[197].mxu1 }
 0x33d   : > { %v5208_v25 = vpop.f32.mrb[198].mxu1  ;;  %11613 = vmatmul.mubr.msk.bf16.vlgmr.msra.gmra.mrb[0].mxu1 %vm785_vm1, %v12209_v40  ;;  %11619 = vmatmul.mubr.msk.bf16.vlgmr.msra.gmra.mrb[4].mxu0 %vm785_vm1, %v12210_v44  ;;  %v12215_v35 = vld [vmem:[%s12496_s22 + $0x38] sm:$0xff]  }
 0x33e   : > { %v5707_v16 = vpack.c.bf16 %v5208_v25, %v5205_v49  ;;  %11623 = vmatpush3.bf16.msra.mxu1 %v13548_v18  ;;  %11629 = vmatpush3.bf16.msra.mxu0 %v13558_v20  ;;  %v11435_v59 = vpop.f32.mrb[199].mxu1  ;;  %v12216_v25 = vld [vmem:[%s12496_s22 + $0x40] sm:$0xff]  }
 0x33f   : > { %11624 = vmatprep.mubr.msk.bf16.mxu1 %vm12249_vm0, %v14741_v0  ;;  %11630 = vmatprep.mubr.msk.bf16.mxu0 %vm12249_vm0, %v14741_v0 }
 0x340   : > { %7758 = vrot.lane.b32.xlu1 %v5707_v16, %s12250_s24  ;;  %v5328_v55 = vpop.f32.mrb[204].mxu0  ;;  %11634 = vmatprep.subr.bf16.mxu1 %v14741_v0 }
 0x341   : > { %v11452_v14 = vpop.f32.mrb[205].mxu0  ;;  %11640 = vmatprep.subr.bf16.mxu0 %v14741_v0 }
 0x342   : > { %v5331_v12 = vpop.f32.mrb[206].mxu0  ;;  %v12217_v14 = vld [vmem:[%s12496_s22 + $0x48] sm:$0xff]  }
 0x343   : > { %v5710_v36 = vpack.c.bf16 %v5331_v12, %v5328_v55  ;;  %v5287_v8 = vpop.f32.mrb[200].mxu1  ;;  %v11453_v11 = vpop.f32.mrb[207].mxu0  ;;  %v12218_v12 = vld [vmem:[%s12496_s22 + $0x50] sm:$0xff]  }
 0x344   : > { %v11446_v10 = vpop.f32.mrb[201].mxu1 }
 0x345   : > { %v5290_v32 = vpop.f32.mrb[202].mxu1  ;;  %11625 = vmatmul.mubr.msk.bf16.vlgmr.msra.gmra.mrb[4].mxu1 %vm785_vm1, %v12211_v6  ;;  %11631 = vmatmul.mubr.msk.bf16.vlgmr.msra.gmra.mrb[8].mxu0 %vm785_vm1, %v12212_v24  ;;  %v12219_v6 = vld [vmem:[%s12496_s22 + $0x58] sm:$0xff]   ;;  %v12220_v24 = vld [vmem:[%s12496_s22 + $0x60] sm:$0xff]  }
 0x346   : > { %v5709_v38 = vpack.c.bf16 %v5290_v32, %v5287_v8  ;;  %11635 = vmatpush3.bf16.msra.mxu1 %v13568_v27  ;;  %11641 = vmatpush3.bf16.msra.mxu0 %v13578_v42  ;;  %v11447_v31 = vpop.f32.mrb[203].mxu1 }
 0x347   : > { %7764 = vrot.lane.b32.xlu0 %v5710_v36, %s12250_s24  ;;  %11636 = vmatprep.mubr.msk.bf16.mxu1 %vm12249_vm0, %v14741_v0 }
 0x348   : > { %7762 = vrot.lane.b32.xlu1 %v5709_v38, %s12250_s24  ;;  %11642 = vmatprep.mubr.msk.bf16.mxu0 %vm12249_vm0, %v14741_v0 }
 0x349   : > { %11646 = vmatprep.subr.bf16.mxu1 %v14741_v0  ;;  %11652 = vmatprep.subr.bf16.mxu0 %v14741_v0 }
 0x34b   : > { %v5369_v22 = vpop.f32.mrb[204].mxu1 }
 0x34c   : > { %v11458_v52 = vpop.f32.mrb[205].mxu1 }
 0x34d   : > { %v5372_v61 = vpop.f32.mrb[206].mxu1  ;;  %11637 = vmatmul.mubr.msk.bf16.vlgmr.msra.gmra.mrb[8].mxu1 %vm785_vm1, %v12213_v1  ;;  %11643 = vmatmul.mubr.msk.bf16.vlgmr.msra.gmra.mrb[12].mxu0 %vm785_vm1, %v12214_v53  ;;  %v12221_v1 = vld [vmem:[%s12496_s22 + $0x68] sm:$0xff]   ;;  %v12222_v53 = vld [vmem:[%s12496_s22 + $0x70] sm:$0xff]  }
 0x34e   : > { %v5711_v4 = vpack.c.bf16 %v5372_v61, %v5369_v22  ;;  %11647 = vmatpush3.bf16.msra.mxu1 %v13588_v28  ;;  %11653 = vmatpush3.bf16.msra.mxu0 %v13598_v45  ;;  %v11459_v2 = vpop.f32.mrb[207].mxu1 }
 0x34f   : > { %11648 = vmatprep.mubr.msk.bf16.mxu1 %vm12249_vm0, %v14741_v0  ;;  %11654 = vmatprep.mubr.msk.bf16.mxu0 %vm12249_vm0, %v14741_v0 }
 0x350   : > { %7766 = vrot.lane.b32.xlu1 %v5711_v4, %s12250_s24  ;;  %v5410_v51 = vpop.f32.mrb[208].mxu0  ;;  %11658 = vmatprep.subr.bf16.mxu1 %v14741_v0 }
 0x351   : > { %v11464_v46 = vpop.f32.mrb[209].mxu0  ;;  %11664 = vmatprep.subr.bf16.mxu0 %v14741_v0 }
 0x352   : > { %v5413_v9 = vpop.f32.mrb[210].mxu0 }
 0x353   : > { %v5712_v63 = vpack.c.bf16 %v5413_v9, %v5410_v51  ;;  %v11465_v49 = vpop.f32.mrb[211].mxu0 }
 0x354   : > { %v12224_v49 = vld [vmem:[%s12583_s28] sm:$0xff]  }
 0x355   : > { %11649 = vmatmul.mubr.msk.bf16.vlgmr.msra.gmra.mrb[12].mxu1 %vm785_vm1, %v12215_v35  ;;  %11655 = vmatmul.mubr.msk.bf16.vlgmr.msra.gmra.mrb[16].mxu0 %vm785_vm1, %v12216_v25 }
 0x356   : > { %11659 = vmatpush3.bf16.msra.mxu1 %v13608_v48  ;;  %11665 = vmatpush3.bf16.msra.mxu0 %v13618_v47 }
 0x357   : > { %7768 = vrot.lane.b32.xlu0 %v5712_v63, %s12250_s24  ;;  %11660 = vmatprep.mubr.msk.bf16.mxu1 %vm12249_vm0, %v14741_v0  ;;  %v12223_v63 = vld [vmem:[%s12496_s22 + $0x78] sm:$0xff]  }
 0x358   : > { %v5451_v40 = vpop.f32.mrb[208].mxu1  ;;  %11666 = vmatprep.mubr.msk.bf16.mxu0 %vm12249_vm0, %v14741_v0  ;;  %11670 = vmatprep.subr.bf16.mxu1 %v14741_v0 }
 0x359   : > { %v11470_v44 = vpop.f32.mrb[209].mxu1  ;;  %11676 = vmatprep.subr.bf16.mxu0 %v14741_v0 }
 0x35a   : > { %v5454_v16 = vpop.f32.mrb[210].mxu1 }
 0x35b   : > { %v5713_v59 = vpack.c.bf16 %v5454_v16, %v5451_v40  ;;  %v11471_v55 = vpop.f32.mrb[211].mxu1 }
 0x35c   : > { %v12226_v55 = vld [vmem:[%s12583_s28 + $0x10] sm:$0xff]  }
 0x35d   : > { %11661 = vmatmul.mubr.msk.bf16.vlgmr.msra.gmra.mrb[16].mxu1 %vm785_vm1, %v12217_v14  ;;  %11667 = vmatmul.mubr.msk.bf16.vlgmr.msra.gmra.mrb[20].mxu0 %vm785_vm1, %v12218_v12 }
 0x35e   : > { %11671 = vmatpush3.bf16.msra.mxu1 %v13628_v19  ;;  %11677 = vmatpush3.bf16.msra.mxu0 %v13639_v41 }
 0x35f   : > { %7770 = vrot.lane.b32.xlu0 %v5713_v59, %s12250_s24  ;;  %11672 = vmatprep.mubr.msk.bf16.mxu1 %vm12249_vm0, %v14741_v0  ;;  %v12225_v59 = vld [vmem:[%s12583_s28 + $0x8] sm:$0xff]  }
 0x360   : > { %v5492_v36 = vpop.f32.mrb[212].mxu0  ;;  %11678 = vmatprep.mubr.msk.bf16.mxu0 %vm12249_vm0, %v14741_v0  ;;  %11682 = vmatprep.subr.bf16.mxu1 %v14741_v0 }
 0x361   : > { %v11476_v8 = vpop.f32.mrb[213].mxu0  ;;  %11688 = vmatprep.subr.bf16.mxu0 %v14741_v0 }
 0x362   : > { %v5495_v11 = vpop.f32.mrb[214].mxu0 }
 0x363   : > { %v5714_v10 = vpack.c.bf16 %v5495_v11, %v5492_v36  ;;  %v11477_v32 = vpop.f32.mrb[215].mxu0 }
 0x364   : > { %v12228_v32 = vld [vmem:[%s12583_s28 + $0x20] sm:$0xff]  }
 0x365   : > { %11673 = vmatmul.mubr.msk.bf16.vlgmr.msra.gmra.mrb[20].mxu1 %vm785_vm1, %v12219_v6  ;;  %11679 = vmatmul.mubr.msk.bf16.vlgmr.msra.gmra.mrb[24].mxu0 %vm785_vm1, %v12220_v24 }
 0x366   : > { %11683 = vmatpush3.bf16.msra.mxu1 %v13649_v50  ;;  %11689 = vmatpush3.bf16.msra.mxu0 %v13660_v62 }
 0x367   : > { %7772 = vrot.lane.b32.xlu0 %v5714_v10, %s12250_s24  ;;  %11684 = vmatprep.mubr.msk.bf16.mxu1 %vm12249_vm0, %v14741_v0  ;;  %v12227_v10 = vld [vmem:[%s12583_s28 + $0x18] sm:$0xff]  }
 0x368   : > { %v5533_v38 = vpop.f32.mrb[212].mxu1  ;;  %11690 = vmatprep.mubr.msk.bf16.mxu0 %vm12249_vm0, %v14741_v0  ;;  %11694 = vmatprep.subr.bf16.mxu1 %v14741_v0 }
 0x369   : > { %v11482_v31 = vpop.f32.mrb[213].mxu1  ;;  %11700 = vmatprep.subr.bf16.mxu0 %v14741_v0 }
 0x36a   : > { %v5536_v22 = vpop.f32.mrb[214].mxu1 }
 0x36b   : > { %v5715_v52 = vpack.c.bf16 %v5536_v22, %v5533_v38  ;;  %v11483_v61 = vpop.f32.mrb[215].mxu1 }
 0x36c   : > { %v12230_v61 = vld [vmem:[%s12583_s28 + $0x30] sm:$0xff]  }
 0x36d   : > { %11685 = vmatmul.mubr.msk.bf16.vlgmr.msra.gmra.mrb[24].mxu1 %vm785_vm1, %v12221_v1  ;;  %11691 = vmatmul.mubr.msk.bf16.vlgmr.msra.gmra.mrb[28].mxu0 %vm785_vm1, %v12222_v53 }
 0x36e   : > { %11695 = vmatpush3.bf16.msra.mxu1 %v13672_v17  ;;  %11701 = vmatpush3.bf16.msra.mxu0 %v13327_v5 }
 0x36f   : > { %7774 = vrot.lane.b32.xlu0 %v5715_v52, %s12250_s24  ;;  %11696 = vmatprep.mubr.msk.bf16.mxu1 %vm12249_vm0, %v14741_v0  ;;  %v12229_v52 = vld [vmem:[%s12583_s28 + $0x28] sm:$0xff]  }
 0x370   : > { %v5574_v4 = vpop.f32.mrb[216].mxu0  ;;  %11702 = vmatprep.mubr.msk.bf16.mxu0 %vm12249_vm0, %v14741_v0  ;;  %11706 = vmatprep.subr.bf16.mxu1 %v14741_v0 }
 0x371   : > { %v11488_v2 = vpop.f32.mrb[217].mxu0  ;;  %11712 = vmatprep.subr.bf16.mxu0 %v14741_v0 }
 0x372   : > { %v5577_v51 = vpop.f32.mrb[218].mxu0 }
 0x373   : > { %v5716_v46 = vpack.c.bf16 %v5577_v51, %v5574_v4  ;;  %v11489_v9 = vpop.f32.mrb[219].mxu0 }
 0x374   : > { %v12232_v9 = vld [vmem:[%s12583_s28 + $0x40] sm:$0xff]  }
 0x375   : > { %11697 = vmatmul.mubr.msk.bf16.vlgmr.msra.gmra.mrb[28].mxu1 %vm785_vm1, %v12223_v63  ;;  %11703 = vmatmul.mubr.msk.bf16.vlgmr.msra.gmra.mrb[32].mxu0 %vm785_vm1, %v12224_v49 }
 0x376   : > { %11707 = vmatpush3.bf16.msra.mxu1 %v13343_v54  ;;  %11713 = vmatpush3.bf16.msra.mxu0 %v13355_v34 }
 0x377   : > { %7776 = vrot.lane.b32.xlu0 %v5716_v46, %s12250_s24  ;;  %11708 = vmatprep.mubr.msk.bf16.mxu1 %vm12249_vm0, %v14741_v0  ;;  %v12231_v46 = vld [vmem:[%s12583_s28 + $0x38] sm:$0xff]  }
 0x378   : > { %v5615_v35 = vpop.f32.mrb[216].mxu1  ;;  %11714 = vmatprep.mubr.msk.bf16.mxu0 %vm12249_vm0, %v14741_v0  ;;  %11718 = vmatprep.subr.bf16.mxu1 %v14741_v0 }
 0x379   : > { %v11494_v25 = vpop.f32.mrb[217].mxu1  ;;  %11724 = vmatprep.subr.bf16.mxu0 %v14741_v0 }
 0x37a   : > { %v5618_v40 = vpop.f32.mrb[218].mxu1 }
 0x37b   : > { %v5717_v44 = vpack.c.bf16 %v5618_v40, %v5615_v35  ;;  %v11495_v16 = vpop.f32.mrb[219].mxu1 }
 0x37c   : > { %v12234_v16 = vld [vmem:[%s12583_s28 + $0x50] sm:$0xff]  }
 0x37d   : > { %11709 = vmatmul.mubr.msk.bf16.vlgmr.msra.gmra.mrb[32].mxu1 %vm785_vm1, %v12225_v59  ;;  %11715 = vmatmul.mubr.msk.bf16.vlgmr.msra.gmra.mrb[36].mxu0 %vm785_vm1, %v12226_v55 }
 0x37e   : > { %11719 = vmatpush3.bf16.msra.mxu1 %v13371_v21  ;;  %11725 = vmatpush3.bf16.msra.mxu0 %v13381_v13 }
 0x37f   : > { %7778 = vrot.lane.b32.xlu0 %v5717_v44, %s12250_s24  ;;  %11720 = vmatprep.mubr.msk.bf16.mxu1 %vm12249_vm0, %v14741_v0  ;;  %v12233_v44 = vld [vmem:[%s12583_s28 + $0x48] sm:$0xff]  }
 0x380   : > { %v5656_v14 = vpop.f32.mrb[220].mxu0  ;;  %11726 = vmatprep.mubr.msk.bf16.mxu0 %vm12249_vm0, %v14741_v0  ;;  %11730 = vmatprep.subr.bf16.mxu1 %v14741_v0 }
 0x381   : > { %v11500_v12 = vpop.f32.mrb[221].mxu0  ;;  %11736 = vmatprep.subr.bf16.mxu0 %v14741_v0 }
 0x382   : > { %v5659_v36 = vpop.f32.mrb[222].mxu0 }
 0x383   : > { %v5718_v8 = vpack.c.bf16 %v5659_v36, %v5656_v14  ;;  %v11501_v11 = vpop.f32.mrb[223].mxu0 }
 0x384   : > { %v12236_v11 = vld [vmem:[%s12583_s28 + $0x60] sm:$0xff]  }
 0x385   : > { %11721 = vmatmul.mubr.msk.bf16.vlgmr.msra.gmra.mrb[36].mxu1 %vm785_vm1, %v12227_v10  ;;  %11727 = vmatmul.mubr.msk.bf16.vlgmr.msra.gmra.mrb[40].mxu0 %vm785_vm1, %v12228_v32 }
 0x386   : > { %11731 = vmatpush3.bf16.msra.mxu1 %v13393_v43  ;;  %11737 = vmatpush3.bf16.msra.mxu0 %v13403_v56 }
 0x387   : > { %7780 = vrot.lane.b32.xlu0 %v5718_v8, %s12250_s24  ;;  %11732 = vmatprep.mubr.msk.bf16.mxu1 %vm12249_vm0, %v14741_v0  ;;  %v12235_v8 = vld [vmem:[%s12583_s28 + $0x58] sm:$0xff]  }
 0x388   : > { %v5697_v6 = vpop.f32.mrb[220].mxu1  ;;  %11738 = vmatprep.mubr.msk.bf16.mxu0 %vm12249_vm0, %v14741_v0  ;;  %11742 = vmatprep.subr.bf16.mxu1 %v14741_v0 }
 0x389   : > { %v11506_v24 = vpop.f32.mrb[221].mxu1  ;;  %11748 = vmatprep.subr.bf16.mxu0 %v14741_v0 }
 0x38a   : > { %v5700_v38 = vpop.f32.mrb[222].mxu1 }
 0x38b   : > { %v5719_v31 = vpack.c.bf16 %v5700_v38, %v5697_v6  ;;  %v11507_v22 = vpop.f32.mrb[223].mxu1  ;;  %v12120_v6 = vld [vmem:[%s14736_s8 + $0x60] sm:$0xff]  }
 0x38c   : > { %v12237_v22 = vld [vmem:[%s12583_s28 + $0x68] sm:$0xff]  }
 0x38d   : > { %11733 = vmatmul.mubr.msk.bf16.vlgmr.msra.gmra.mrb[40].mxu1 %vm785_vm1, %v12229_v52  ;;  %11739 = vmatmul.mubr.msk.bf16.vlgmr.msra.gmra.mrb[44].mxu0 %vm785_vm1, %v12230_v61  ;;  %v12238_v52 = vld [vmem:[%s12583_s28 + $0x70] sm:$0xff]   ;;  %v12121_v61 = vld [vmem:[%s14736_s8 + $0x68] sm:$0xff]  }
 0x38e   : > { %11743 = vmatpush3.bf16.msra.mxu1 %v13419_v23  ;;  %11749 = vmatpush3.bf16.msra.mxu0 %v13429_v30 }
 0x38f   : > { %7782 = vrot.lane.b32.xlu0 %v5719_v31, %s12250_s24  ;;  %11744 = vmatprep.mubr.msk.bf16.mxu1 %vm12249_vm0, %v14741_v0 }
 0x390   : > { %11750 = vmatprep.mubr.msk.bf16.mxu0 %vm12249_vm0, %v14741_v0  ;;  %11754 = vmatprep.subr.bf16.mxu1 %v14741_v0  ;;  %v5754_v1 = vpop.f32.mrb[224].mxu0 }
 0x391   : > { %11760 = vmatprep.subr.bf16.mxu0 %v14741_v0  ;;  %v11512_v53 = vpop.f32.mrb[225].mxu0 }
 0x392   : > { %v5757_v4 = vpop.f32.mrb[226].mxu0 }
 0x393   : > { %v6376_v2 = vpack.c.bf16 %v5757_v4, %v5754_v1  ;;  %v11513_v51 = vpop.f32.mrb[227].mxu0  ;;  %v12122_v4 = vld [vmem:[%s14736_s8 + $0x70] sm:$0xff]  }
 0x395   : > { %11745 = vmatmul.mubr.msk.bf16.vlgmr.msra.gmra.mrb[44].mxu1 %vm785_vm1, %v12231_v46  ;;  %11751 = vmatmul.mubr.msk.bf16.vlgmr.msra.gmra.mrb[48].mxu0 %vm785_vm1, %v12232_v9  ;;  %v12239_v9 = vld [vmem:[%s12583_s28 + $0x78] sm:$0xff]  }
 0x396   : > { %11755 = vmatpush3.bf16.msra.mxu1 %v13443_v33  ;;  %11761 = vmatpush3.bf16.msra.mxu0 %v13453_v39 }
 0x397   : > { %11756 = vmatprep.mubr.msk.bf16.mxu1 %vm12249_vm0, %v14741_v0  ;;  %11762 = vmatprep.mubr.msk.bf16.mxu0 %vm12249_vm0, %v14741_v0 }
 0x398   : > { %11766 = vmatprep.subr.bf16.mxu1 %v14741_v0  ;;  %11772 = vmatprep.subr.bf16.mxu0 %v14741_v0  ;;  %v13846_v63 = vpop.f32.mrb[224].mxu1 }
 0x399   : > { %v11518_v49 = vpop.f32.mrb[225].mxu1 }
 0x39a   : > { %v13848_v35 = vpop.f32.mrb[226].mxu1  ;;  %v12123_v49 = vld [vmem:[%s14736_s8 + $0x78] sm:$0xff]  }
 0x39b   : > { %v6377_v25 = vpack.c.bf16 %v13848_v35, %v13846_v63  ;;  %v11519_v40 = vpop.f32.mrb[227].mxu1  ;;  %v12137_v63 = vld [vmem:[%s14737_s9 + $0x88] sm:$0xff]  }
 0x39d   : > { %11757 = vmatmul.mubr.msk.bf16.vlgmr.msra.gmra.mrb[48].mxu1 %vm785_vm1, %v12233_v44  ;;  %11763 = vmatmul.mubr.msk.bf16.vlgmr.msra.gmra.mrb[52].mxu0 %vm785_vm1, %v12234_v16  ;;  %v12124_v16 = vld [vmem:[%s14736_s8 + $0x80] sm:$0xff]  }
 0x39e   : > { %11767 = vmatpush3.bf16.msra.mxu1 %v13463_v29  ;;  %11773 = vmatpush3.bf16.msra.mxu0 %v13473_v60 }
 0x39f   : > { %11768 = vmatprep.mubr.msk.bf16.mxu1 %vm12249_vm0, %v14741_v0  ;;  %11774 = vmatprep.mubr.msk.bf16.mxu0 %vm12249_vm0, %v14741_v0 }
 0x3a0   : > { %11778 = vmatprep.subr.bf16.mxu1 %v14741_v0  ;;  %11784 = vmatprep.subr.bf16.mxu0 %v14741_v0  ;;  %v13864_v59 = vpop.f32.mrb[228].mxu0 }
 0x3a1   : > { %v11524_v55 = vpop.f32.mrb[229].mxu0 }
 0x3a2   : > { %v13866_v14 = vpop.f32.mrb[230].mxu0 }
 0x3a3   : > { %v6378_v12 = vpack.c.bf16 %v13866_v14, %v13864_v59  ;;  %v11525_v36 = vpop.f32.mrb[231].mxu0  ;;  %v12139_v59 = vld [vmem:[%s14737_s9 + $0x98] sm:$0xff]  }
 0x3a5   : > { %11769 = vmatmul.mubr.msk.bf16.vlgmr.msra.gmra.mrb[52].mxu1 %vm785_vm1, %v12235_v8  ;;  %11775 = vmatmul.mubr.msk.bf16.vlgmr.msra.gmra.mrb[56].mxu0 %vm785_vm1, %v12236_v11  ;;  %v12125_v11 = vld [vmem:[%s14736_s8 + $0x88] sm:$0xff]  }
 0x3a6   : > { %11779 = vmatpush3.bf16.msra.mxu1 %v13483_v58  ;;  %11785 = vmatpush3.bf16.msra.mxu0 %v13493_v15 }
 0x3a7   : > { %11780 = vmatprep.mubr.msk.bf16.mxu1 %vm12249_vm0, %v14741_v0  ;;  %11786 = vmatprep.mubr.msk.bf16.mxu0 %vm12249_vm0, %v14741_v0 }
 0x3a8   : > { %11790 = vmatprep.subr.bf16.mxu1 %v14741_v0  ;;  %8113 = vmatprep.subr.bf16.mxu0 %v12251_v26  ;;  %v13882_v10 = vpop.f32.mrb[228].mxu1 }
 0x3a9   : > { %v11530_v32 = vpop.f32.mrb[229].mxu1 }
 0x3aa   : > { %v13887_v24 = vpop.f32.mrb[230].mxu1 }
 0x3ab   : > { %v6379_v38 = vpack.c.bf16 %v13887_v24, %v13882_v10  ;;  %v11531_v31 = vpop.f32.mrb[231].mxu1  ;;  %v12141_v10 = vld [vmem:[%s14737_s9 + $0xa8] sm:$0xff]  }
 0x3ac   : > { %v12126_v31 = vld [vmem:[%s14736_s8 + $0x90] sm:$0xff]  }
 0x3ad   : > { %11781 = vmatmul.mubr.msk.bf16.vlgmr.msra.gmra.mrb[56].mxu1 %vm785_vm1, %v12237_v22  ;;  %11787 = vmatmul.mubr.msk.bf16.vlgmr.msra.gmra.mrb[60].mxu0 %vm785_vm1, %v12238_v52 }
 0x3ae   : > { %11791 = vmatpush3.bf16.msra.mxu1 %v13503_v57  ;;  %8114 = vmatpush1.bf16.msra.mxu0 %v12120_v6 }
 0x3af   : > { %8115 = vmatprep.subr.bf16.mxu0 %v12251_v26  ;;  %10598 = vmatprep.mubr.msk.bf16.mxu0 %vm4215_vm2, %v6376_v2 }
 0x3b0   : > { %v13901_v1 = vpop.f32.mrb[232].mxu0  ;;  %11792 = vmatprep.mubr.msk.bf16.mxu1 %vm12249_vm0, %v14741_v0  ;;  %8427 = vmatprep.subr.bf16.mxu1 %v12251_v26 }
 0x3b1   : > { %v11536_v53 = vpop.f32.mrb[233].mxu0 }
 0x3b2   : > { %8116 = vmatpush1.bf16.msra.mxu0 %v12121_v61  ;;  %v13909_v51 = vpop.f32.mrb[234].mxu0  ;;  %v12127_v53 = vld [vmem:[%s14736_s8 + $0x98] sm:$0xff]  }
 0x3b3   : > { %8117 = vmatprep.subr.bf16.mxu0 %v12251_v26  ;;  %v6380_v2 = vpack.c.bf16 %v13909_v51, %v13901_v1  ;;  %v11537_v46 = vpop.f32.mrb[235].mxu0  ;;  %v12143_v1 = vld [vmem:[%s14737_s9 + $0xb8] sm:$0xff]  }
 0x3b5   : > { %11793 = vmatmul.mubr.msk.bf16.vlgmr.msra.gmra.mrb[60].mxu1 %vm785_vm1, %v12239_v9  ;;  %v12128_v9 = vld [vmem:[%s14736_s8 + $0xa0] sm:$0xff]  }
 0x3b6   : > { %8118 = vmatpush1.bf16.msra.mxu0 %v12122_v4 }
 0x3b7   : > { %8119 = vmatprep.subr.bf16.mxu0 %v12251_v26 }
 0x3b8   : > { %v13920_v40 = vpop.f32.mrb[232].mxu1 }
 0x3b9   : > { %v11542_v44 = vpop.f32.mrb[233].mxu1 }
 0x3ba   : > { %8120 = vmatpush1.bf16.msra.mxu0 %v12123_v49  ;;  %v13925_v55 = vpop.f32.mrb[234].mxu1 }
 0x3bb   : > { %8121 = vmatprep.subr.bf16.mxu0 %v12251_v26  ;;  %v11543_v8 = vpop.f32.mrb[235].mxu1 }
 0x3bc   : > { %v12129_v8 = vld [vmem:[%s14736_s8 + $0xa8] sm:$0xff]  }
 0x3be   : > { %8122 = vmatpush1.bf16.msra.mxu0 %v12124_v16 }
 0x3bf   : > { %8123 = vmatprep.subr.bf16.mxu0 %v12251_v26 }
 0x3c0   : > { %v13934_v32 = vpop.f32.mrb[236].mxu0 }
 0x3c1   : > { %v11548_v6 = vpop.f32.mrb[237].mxu0 }
 0x3c2   : > { %8124 = vmatpush1.bf16.msra.mxu0 %v12125_v11  ;;  %v13939_v22 = vpop.f32.mrb[238].mxu0  ;;  %v12132_v11 = vld [vmem:[%s14737_s9 + $0x60] sm:$0xff]  }
 0x3c3   : > { %8125 = vmatprep.subr.bf16.mxu0 %v12251_v26  ;;  %v11549_v61 = vpop.f32.mrb[239].mxu0  ;;  %8428 = vmatpush1.bf16.msra.mxu1 %v12132_v11  ;;  %v12134_v11 = vld [vmem:[%s14737_s9 + $0x70] sm:$0xff]  }
 0x3c4   : > { %8429 = vmatprep.subr.bf16.mxu1 %v12251_v26  ;;  %v12130_v61 = vld [vmem:[%s14736_s8 + $0xb0] sm:$0xff]  }
 0x3c6   : > { %8126 = vmatpush1.bf16.msra.mxu0 %v12126_v31 }
 0x3c7   : > { %8127 = vmatprep.subr.bf16.mxu0 %v12251_v26 }
 0x3c8   : > { %v13948_v4 = vpop.f32.mrb[236].mxu1 }
 0x3c9   : > { %v11554_v46 = vpop.f32.mrb[237].mxu1 }
 0x3ca   : > { %8128 = vmatpush1.bf16.msra.mxu0 %v12127_v53  ;;  %v13953_v49 = vpop.f32.mrb[238].mxu1 }
 0x3cb   : > { %8129 = vmatprep.subr.bf16.mxu0 %v12251_v26  ;;  %v11555_v16 = vpop.f32.mrb[239].mxu1 }
 0x3cc   : > { %v12133_v16 = vld [vmem:[%s14737_s9 + $0x68] sm:$0xff]  }
 0x3cd   : > { %8430 = vmatpush1.bf16.msra.mxu1 %v12133_v16  ;;  %v12135_v16 = vld [vmem:[%s14737_s9 + $0x78] sm:$0xff]  }
 0x3ce   : > { %8130 = vmatpush1.bf16.msra.mxu0 %v12128_v9  ;;  %8431 = vmatprep.subr.bf16.mxu1 %v12251_v26 }
 0x3cf   : > { %8131 = vmatprep.subr.bf16.mxu0 %v12251_v26 }
 0x3d0   : > { %v13965_v6 = vpop.f32.mrb[240].mxu0 }
 0x3d1   : > { %v11560_v31 = vpop.f32.mrb[241].mxu0  ;;  %8432 = vmatpush1.bf16.msra.mxu1 %v12134_v11 }
 0x3d2   : > { %8132 = vmatpush1.bf16.msra.mxu0 %v12129_v8  ;;  %v13971_v53 = vpop.f32.mrb[242].mxu0  ;;  %v12131_v8 = vld [vmem:[%s14736_s8 + $0xb8] sm:$0xff]   ;;  %8433 = vmatprep.subr.bf16.mxu1 %v12251_v26 }
 0x3d3   : > { %8133 = vmatprep.subr.bf16.mxu0 %v12251_v26  ;;  %v11561_v9 = vpop.f32.mrb[243].mxu0 }
 0x3d4   : > { %v7753_v9 = vpop.permute.xlu0 %7752 }
 0x3d5   : > { %v7786_v36 = vsel %vm4215_vm2, %v13327_v5, %v7753_v9  ;;  %8434 = vmatpush1.bf16.msra.mxu1 %v12135_v16 }
 0x3d6   : > { %8134 = vmatpush1.bf16.msra.mxu0 %v12130_v61  ;;  %8435 = vmatprep.subr.bf16.mxu1 %v12251_v26 }
 0x3d7   : > { %8135 = vmatprep.subr.bf16.mxu0 %v12251_v26 }
 0x3d8   : > { %v13986_v31 = vpop.f32.mrb[240].mxu1 }
 0x3d9   : > { %v11566_v46 = vpop.f32.mrb[241].mxu1 }
 0x3da   : > { %8136 = vmatpush1.bf16.msra.mxu0 %v12131_v8  ;;  %v13989_v44 = vpop.f32.mrb[242].mxu1  ;;  %v7755_v8 = vpop.permute.xlu1 %7754 }
 0x3db   : > { %v6385_v61 = vpack.c.bf16 %v13989_v44, %v13986_v31  ;;  %v11567_v52 = vpop.f32.mrb[243].mxu1  ;;  %11796 = vmatprep.subr.bf16.mxu0 %v14741_v0  ;;  %v7790_v35 = vsel %vm4215_vm2, %v13343_v54, %v7755_v8 }
 0x3dc   : > { %v12136_v52 = vld [vmem:[%s14737_s9 + $0x80] sm:$0xff]  }
 0x3dd   : > { %8146 = vmatmul.mubr.bf16.vlgmr.msra.gmra.mrb[64].mxu0 %v7786_v36  ;;  %8436 = vmatpush1.bf16.msra.mxu1 %v12136_v52  ;;  %v7757_v52 = vpop.permute.xlu0 %7756 }
 0x3de   : > { %10599 = vmatprep.mubr.msk.bf16.mxu0 %vm4215_vm2, %v6377_v25  ;;  %8437 = vmatprep.subr.bf16.mxu1 %v12251_v26  ;;  %v12138_v25 = vld [vmem:[%s14737_s9 + $0x90] sm:$0xff]   ;;  %v7794_v14 = vsel %vm4215_vm2, %v13355_v34, %v7757_v52 }
 0x3e0   : > { %v14007_v46 = vpop.f32.mrb[244].mxu0 }
 0x3e1   : > { %v11572_v11 = vpop.f32.mrb[245].mxu0  ;;  %8438 = vmatpush1.bf16.msra.mxu1 %v12137_v63 }
 0x3e2   : > { %v14010_v5 = vpop.f32.mrb[246].mxu0  ;;  %8439 = vmatprep.subr.bf16.mxu1 %v12251_v26 }
 0x3e3   : > { %v6386_v36 = vpack.c.bf16 %v14010_v5, %v14007_v46  ;;  %v11573_v9 = vpop.f32.mrb[247].mxu0 }
 0x3e5   : > { %8154 = vmatmul.mubr.bf16.gmra.mrb[68].mxu0 %v7790_v35  ;;  %8440 = vmatpush1.bf16.msra.mxu1 %v12138_v25  ;;  %v7759_v35 = vpop.permute.xlu1 %7758 }
 0x3e6   : > { %10600 = vmatprep.mubr.msk.bf16.mxu0 %vm4215_vm2, %v6378_v12  ;;  %8441 = vmatprep.subr.bf16.mxu1 %v12251_v26  ;;  %v12140_v12 = vld [vmem:[%s14737_s9 + $0xa0] sm:$0xff]   ;;  %v7798_v24 = vsel %vm4215_vm2, %v13371_v21, %v7759_v35 }
 0x3e8   : > { %v14027_v16 = vpop.f32.mrb[244].mxu1 }
 0x3e9   : > { %v11578_v11 = vpop.f32.mrb[245].mxu1  ;;  %8442 = vmatpush1.bf16.msra.mxu1 %v12139_v59  ;;  %v7761_v59 = vpop.permute.xlu0 %7760 }
 0x3ea   : > { %v14030_v54 = vpop.f32.mrb[246].mxu1  ;;  %8443 = vmatprep.subr.bf16.mxu1 %v12251_v26  ;;  %v7802_v51 = vsel %vm4215_vm2, %v13381_v13, %v7761_v59 }
 0x3eb   : > { %v6387_v8 = vpack.c.bf16 %v14030_v54, %v14027_v16  ;;  %v11579_v9 = vpop.f32.mrb[247].mxu1 }
 0x3ed   : > { %8162 = vmatmul.mubr.bf16.gmra.mrb[72].mxu0 %v7794_v14  ;;  %8444 = vmatpush1.bf16.msra.mxu1 %v12140_v12 }
 0x3ee   : > { %10601 = vmatprep.mubr.msk.bf16.mxu0 %vm4215_vm2, %v6379_v38  ;;  %8445 = vmatprep.subr.bf16.mxu1 %v12251_v26  ;;  %v12142_v38 = vld [vmem:[%s14737_s9 + $0xb0] sm:$0xff]  }
 0x3f0   : > { %v14047_v63 = vpop.f32.mrb[248].mxu0 }
 0x3f1   : > { %v11584_v25 = vpop.f32.mrb[249].mxu0  ;;  %8446 = vmatpush1.bf16.msra.mxu1 %v12141_v10 }
 0x3f2   : > { %v14050_v34 = vpop.f32.mrb[250].mxu0  ;;  %8447 = vmatprep.subr.bf16.mxu1 %v12251_v26 }
 0x3f3   : > { %v6388_v52 = vpack.c.bf16 %v14050_v34, %v14047_v63  ;;  %v11585_v11 = vpop.f32.mrb[251].mxu0 }
 0x3f4   : > { %v7763_v11 = vpop.permute.xlu1 %7762 }
 0x3f5   : > { %8170 = vmatmul.mubr.bf16.gmra.mrb[76].mxu0 %v7798_v24  ;;  %8448 = vmatpush1.bf16.msra.mxu1 %v12142_v38 }
 0x3f6   : > { %10602 = vmatprep.mubr.msk.bf16.mxu0 %vm4215_vm2, %v6380_v2  ;;  %8449 = vmatprep.subr.bf16.mxu1 %v12251_v26  ;;  %v14743_v2 = vpack.c.bf16 %v13925_v55, %v13920_v40  ;;  %v7806_v26 = vsel %vm4215_vm2, %v13393_v43, %v7763_v11  ;;  %v14744_v40 = vpack.c.bf16 %v13939_v22, %v13934_v32  ;;  %v7765_v55 = vpop.permute.xlu0 %7764 }
 0x3f7   : > { %v7810_v32 = vsel %vm4215_vm2, %v13403_v56, %v7765_v55  ;;  %v14745_v22 = vpack.c.bf16 %v13953_v49, %v13948_v4  ;;  %v14746_v4 = vpack.c.bf16 %v13971_v53, %v13965_v6 }
 0x3f8   : > { %v14067_v9 = vpop.f32.mrb[248].mxu1 }
 0x3f9   : > { %v11590_v14 = vpop.f32.mrb[249].mxu1  ;;  %8450 = vmatpush1.bf16.msra.mxu1 %v12143_v1 }
 0x3fa   : > { %v14070_v21 = vpop.f32.mrb[250].mxu1  ;;  %11802 = vmatprep.subr.bf16.mxu1 %v14741_v0  ;;  %v7769_v49 = vpop.permute.xlu0 %7768 }
 0x3fb   : > { %v6389_v12 = vpack.c.bf16 %v14070_v21, %v14067_v9  ;;  %v11591_v35 = vpop.f32.mrb[251].mxu1 }
 0x3fd   : > { %8178 = vmatmul.mubr.bf16.gmra.mrb[80].mxu0 %v7802_v51 }
 0x3fe   : > { %10603 = vmatprep.mubr.msk.bf16.mxu0 %vm4215_vm2, %v14743_v2  ;;  %v7771_v6 = vpop.permute.xlu0 %7770 }
 0x400   : > { %v14084_v25 = vpop.f32.mrb[252].mxu0 }
 0x401   : > { %v11596_v10 = vpop.f32.mrb[253].mxu0 }
 0x402   : > { %v14087_v24 = vpop.f32.mrb[254].mxu0  ;;  %v7773_v44 = vpop.permute.xlu0 %7772 }
 0x403   : > { %v11597_v38 = vpop.f32.mrb[255].mxu0  ;;  %v14747_v9 = vpack.c.bf16 %v14087_v24, %v14084_v25 }
 0x405   : > { %8186 = vmatmul.mubr.bf16.gmra.mrb[84].mxu0 %v7806_v26  ;;  %v7767_v26 = vpop.permute.xlu1 %7766 }
 0x406   : > { %10604 = vmatprep.mubr.msk.bf16.mxu0 %vm4215_vm2, %v14744_v40  ;;  %v7814_v56 = vsel %vm4215_vm2, %v13419_v23, %v7767_v26  ;;  %v7775_v46 = vpop.permute.xlu0 %7774 }
 0x408   : > { %v14097_v59 = vpop.f32.mrb[252].mxu1  ;;  %v6426_v14 = vpop.f32.mrb[0].mxu0 }
 0x409   : > { %v11602_v35 = vpop.f32.mrb[253].mxu1  ;;  %v11608_v1 = vpop.f32.mrb[1].mxu0 }
 0x40a   : > { %v14099_v51 = vpop.f32.mrb[254].mxu1  ;;  %v6429_v2 = vpop.f32.mrb[2].mxu0 }
 0x40b   : > { %v7048_v38 = vpack.c.bf16 %v6429_v2, %v6426_v14  ;;  %v11603_v43 = vpop.f32.mrb[255].mxu1  ;;  %v11609_v11 = vpop.f32.mrb[3].mxu0  ;;  %v14748_v25 = vpack.c.bf16 %v14099_v51, %v14097_v59 }
 0x40c   : > { %v7777_v16 = vpop.permute.xlu0 %7776 }
 0x40d   : > { %8194 = vmatmul.mubr.bf16.gmra.mrb[88].mxu0 %v7810_v32  ;;  %7864 = vrot.lane.b32.xlu1 %v7048_v38, %s12250_s24 }
 0x40e   : > { %10605 = vmatprep.mubr.msk.bf16.mxu0 %vm4215_vm2, %v14745_v22 }
 0x410   : > { %v6467_v40 = vpop.f32.mrb[0].mxu1  ;;  %v6508_v35 = vpop.f32.mrb[4].mxu0 }
 0x411   : > { %v11614_v1 = vpop.f32.mrb[1].mxu1  ;;  %v11620_v0 = vpop.f32.mrb[5].mxu0 }
 0x412   : > { %v6470_v10 = vpop.f32.mrb[2].mxu1  ;;  %v6511_v14 = vpop.f32.mrb[6].mxu0 }
 0x413   : > { %v7049_v2 = vpack.c.bf16 %v6470_v10, %v6467_v40  ;;  %v11615_v43 = vpop.f32.mrb[3].mxu1  ;;  %v7050_v11 = vpack.c.bf16 %v6511_v14, %v6508_v35  ;;  %v11621_v13 = vpop.f32.mrb[7].mxu0  ;;  %v7818_v35 = vsel %vm4215_vm2, %v13429_v30, %v7769_v49 }
 0x414   : > { %v7779_v63 = vpop.permute.xlu0 %7778 }
 0x415   : > { %8202 = vmatmul.mubr.bf16.gmra.mrb[92].mxu0 %v7814_v56  ;;  %7866 = vrot.lane.b32.xlu1 %v7049_v2, %s12250_s24 }
 0x416   : > { %10606 = vmatprep.mubr.msk.bf16.mxu0 %vm4215_vm2, %v14746_v4 }
 0x418   : > { %v6549_v55 = vpop.f32.mrb[4].mxu1  ;;  %v6590_v0 = vpop.f32.mrb[8].mxu0 }
 0x419   : > { %v11626_v38 = vpop.f32.mrb[5].mxu1  ;;  %7868 = vrot.lane.b32.xlu1 %v7050_v11, %s12250_s24  ;;  %v11632_v10 = vpop.f32.mrb[9].mxu0 }
 0x41a   : > { %v6552_v32 = vpop.f32.mrb[6].mxu1  ;;  %v6593_v13 = vpop.f32.mrb[10].mxu0 }
 0x41b   : > { %v7051_v22 = vpack.c.bf16 %v6552_v32, %v6549_v55  ;;  %v7052_v40 = vpack.c.bf16 %v6593_v13, %v6590_v0  ;;  %v11627_v23 = vpop.f32.mrb[7].mxu1  ;;  %v11633_v26 = vpop.f32.mrb[11].mxu0  ;;  %v7822_v55 = vsel %vm4215_vm2, %v13443_v33, %v7771_v6 }
 0x41c   : > { %v7826_v23 = vsel %vm4215_vm2, %v13453_v39, %v7773_v44  ;;  %v7781_v21 = vpop.permute.xlu0 %7780 }
 0x41d   : > { %8210 = vmatmul.mubr.bf16.gmra.mrb[96].mxu0 %v7818_v35  ;;  %7870 = vrot.lane.b32.xlu1 %v7051_v22, %s12250_s24 }
 0x41e   : > { %10607 = vmatprep.mubr.msk.bf16.mxu0 %vm4215_vm2, %v6385_v61 }
 0x420   : > { %v6631_v53 = vpop.f32.mrb[8].mxu1  ;;  %v6672_v1 = vpop.f32.mrb[12].mxu0 }
 0x421   : > { %v11638_v14 = vpop.f32.mrb[9].mxu1  ;;  %7872 = vrot.lane.b32.xlu1 %v7052_v40, %s12250_s24  ;;  %v11644_v2 = vpop.f32.mrb[13].mxu0 }
 0x422   : > { %v6634_v43 = vpop.f32.mrb[10].mxu1  ;;  %v6675_v11 = vpop.f32.mrb[14].mxu0 }
 0x423   : > { %v7053_v56 = vpack.c.bf16 %v6634_v43, %v6631_v53  ;;  %v7054_v4 = vpack.c.bf16 %v6675_v11, %v6672_v1  ;;  %v11639_v30 = vpop.f32.mrb[11].mxu1  ;;  %v11645_v49 = vpop.f32.mrb[15].mxu0  ;;  %v7830_v43 = vsel %vm4215_vm2, %v13463_v29, %v7775_v46 }
 0x424   : > { %v7783_v24 = vpop.permute.xlu0 %7782 }
 0x425   : > { %8218 = vmatmul.mubr.bf16.gmra.mrb[100].mxu0 %v7822_v55  ;;  %7874 = vrot.lane.b32.xlu1 %v7053_v56, %s12250_s24 }
 0x426   : > { %10608 = vmatprep.mubr.msk.bf16.mxu0 %vm4215_vm2, %v6386_v36 }
 0x428   : > { %v6713_v31 = vpop.f32.mrb[12].mxu1  ;;  %v6754_v61 = vpop.f32.mrb[16].mxu0 }
 0x429   : > { %v11650_v0 = vpop.f32.mrb[13].mxu1  ;;  %7876 = vrot.lane.b32.xlu1 %v7054_v4, %s12250_s24  ;;  %v11656_v38 = vpop.f32.mrb[17].mxu0 }
 0x42a   : > { %v6716_v10 = vpop.f32.mrb[14].mxu1  ;;  %v6757_v32 = vpop.f32.mrb[18].mxu0 }
 0x42b   : > { %v7055_v13 = vpack.c.bf16 %v6716_v10, %v6713_v31  ;;  %v7056_v22 = vpack.c.bf16 %v6757_v32, %v6754_v61  ;;  %v11651_v33 = vpop.f32.mrb[15].mxu1  ;;  %v11657_v40 = vpop.f32.mrb[19].mxu0  ;;  %v7834_v31 = vsel %vm4215_vm2, %v13473_v60, %v7777_v16 }
 0x42c   : > { %v7838_v33 = vsel %vm4215_vm2, %v13483_v58, %v7779_v63 }
 0x42d   : > { %8226 = vmatmul.mubr.bf16.gmra.mrb[104].mxu0 %v7826_v23  ;;  %7878 = vrot.lane.b32.xlu1 %v7055_v13, %s12250_s24 }
 0x42e   : > { %10609 = vmatprep.mubr.msk.bf16.mxu0 %vm4215_vm2, %v6387_v8  ;;  %7880 = vrot.lane.b32.xlu0 %v7056_v22, %s12250_s24 }
 0x430   : > { %v6795_v5 = vpop.f32.mrb[16].mxu1  ;;  %v6836_v36 = vpop.f32.mrb[20].mxu0 }
 0x431   : > { %v11662_v26 = vpop.f32.mrb[17].mxu1  ;;  %v11668_v35 = vpop.f32.mrb[21].mxu0 }
 0x432   : > { %v6798_v6 = vpop.f32.mrb[18].mxu1  ;;  %v6839_v53 = vpop.f32.mrb[22].mxu0 }
 0x433   : > { %v7057_v1 = vpack.c.bf16 %v6798_v6, %v6795_v5  ;;  %v7058_v14 = vpack.c.bf16 %v6839_v53, %v6836_v36  ;;  %v11663_v39 = vpop.f32.mrb[19].mxu1  ;;  %v11669_v2 = vpop.f32.mrb[23].mxu0  ;;  %v7842_v53 = vsel %vm4215_vm2, %v13493_v15, %v7781_v21 }
 0x435   : > { %8234 = vmatmul.mubr.bf16.gmra.mrb[108].mxu0 %v7830_v43  ;;  %7882 = vrot.lane.b32.xlu1 %v7057_v1, %s12250_s24 }
 0x436   : > { %10610 = vmatprep.mubr.msk.bf16.mxu0 %vm4215_vm2, %v6388_v52  ;;  %7884 = vrot.lane.b32.xlu0 %v7058_v14, %s12250_s24 }
 0x438   : > { %v6877_v54 = vpop.f32.mrb[20].mxu1  ;;  %v6918_v8 = vpop.f32.mrb[24].mxu0 }
 0x439   : > { %v11674_v11 = vpop.f32.mrb[21].mxu1  ;;  %v11680_v56 = vpop.f32.mrb[25].mxu0 }
 0x43a   : > { %v6880_v4 = vpop.f32.mrb[22].mxu1  ;;  %v6921_v30 = vpop.f32.mrb[26].mxu0  ;;  %v14749_v11 = vmov 0.0  }
 0x43b   : > { %v7059_v49 = vpack.c.bf16 %v6880_v4, %v6877_v54  ;;  %v7060_v55 = vpack.c.bf16 %v6921_v30, %v6918_v8  ;;  %v11675_v29 = vpop.f32.mrb[23].mxu1  ;;  %v11681_v44 = vpop.f32.mrb[27].mxu0  ;;  %v7846_v8 = vsel %vm4215_vm2, %v13503_v57, %v7783_v24 }
 0x43d   : > { %8242 = vmatmul.mubr.bf16.gmra.mrb[112].mxu0 %v7834_v31  ;;  %7886 = vrot.lane.b32.xlu1 %v7059_v49, %s12250_s24 }
 0x43e   : > { %10611 = vmatprep.mubr.msk.bf16.mxu0 %vm4215_vm2, %v6389_v12  ;;  %7888 = vrot.lane.b32.xlu0 %v7060_v55, %s12250_s24 }
 0x440   : > { %v6959_v34 = vpop.f32.mrb[24].mxu1  ;;  %v7000_v52 = vpop.f32.mrb[28].mxu0 }
 0x441   : > { %v11686_v61 = vpop.f32.mrb[25].mxu1  ;;  %v11692_v0 = vpop.f32.mrb[29].mxu0 }
 0x442   : > { %v6962_v38 = vpop.f32.mrb[26].mxu1  ;;  %v7003_v10 = vpop.f32.mrb[30].mxu0 }
 0x443   : > { %v7061_v32 = vpack.c.bf16 %v6962_v38, %v6959_v34  ;;  %v7062_v13 = vpack.c.bf16 %v7003_v10, %v7000_v52  ;;  %v11687_v60 = vpop.f32.mrb[27].mxu1  ;;  %v11693_v22 = vpop.f32.mrb[31].mxu0 }
 0x445   : > { %8250 = vmatmul.mubr.bf16.gmra.mrb[116].mxu0 %v7838_v33  ;;  %7890 = vrot.lane.b32.xlu1 %v7061_v32, %s12250_s24 }
 0x446   : > { %10612 = vmatprep.mubr.msk.bf16.mxu0 %vm4215_vm2, %v14747_v9  ;;  %7892 = vrot.lane.b32.xlu0 %v7062_v13, %s12250_s24 }
 0x448   : > { %v7041_v12 = vpop.f32.mrb[28].mxu1  ;;  %v7098_v40 = vpop.f32.mrb[32].mxu0 }
 0x449   : > { %v11698_v23 = vpop.f32.mrb[29].mxu1  ;;  %v11704_v46 = vpop.f32.mrb[33].mxu0 }
 0x44a   : > { %v7044_v5 = vpop.f32.mrb[30].mxu1  ;;  %v7101_v36 = vpop.f32.mrb[34].mxu0 }
 0x44b   : > { %v7063_v26 = vpack.c.bf16 %v7044_v5, %v7041_v12  ;;  %v7720_v35 = vpack.c.bf16 %v7101_v36, %v7098_v40  ;;  %v11705_v58 = vpop.f32.mrb[35].mxu0  ;;  %v11699_v6 = vpop.f32.mrb[31].mxu1 }
 0x44d   : > { %8258 = vmatmul.mubr.bf16.gmra.mrb[120].mxu0 %v7842_v53  ;;  %7894 = vrot.lane.b32.xlu1 %v7063_v26, %s12250_s24 }
 0x44e   : > { %10613 = vmatprep.mubr.msk.bf16.mxu0 %vm4215_vm2, %v14748_v25  ;;  %10652 = vmatprep.mubr.msk.bf16.mxu1 %vm4215_vm2, %v7720_v35 }
 0x450   : > { %v14174_v1 = vpop.f32.mrb[36].mxu0  ;;  %v14176_v14 = vpop.f32.mrb[32].mxu1 }
 0x451   : > { %v11716_v39 = vpop.f32.mrb[37].mxu0  ;;  %v11710_v2 = vpop.f32.mrb[33].mxu1 }
 0x452   : > { %v14178_v43 = vpop.f32.mrb[38].mxu0  ;;  %v14180_v15 = vpop.f32.mrb[34].mxu1 }
 0x453   : > { %v7722_v16 = vpack.c.bf16 %v14178_v43, %v14174_v1  ;;  %v11717_v54 = vpop.f32.mrb[39].mxu0  ;;  %v7721_v59 = vpack.c.bf16 %v14180_v15, %v14176_v14  ;;  %v11711_v51 = vpop.f32.mrb[35].mxu1 }
 0x455   : > { %8266 = vmatmul.mubr.bf16.gmra.mrb[124].mxu0 %v7846_v8 }
 0x456   : > { %11798 = vmatprep.mubr.msk.bf16.mxu0 %vm12249_vm0, %v14749_v11 }
 0x458   : > { %v14190_v56 = vpop.f32.mrb[40].mxu0  ;;  %v14192_v4 = vpop.f32.mrb[36].mxu1 }
 0x459   : > { %v11728_v30 = vpop.f32.mrb[41].mxu0  ;;  %v11722_v49 = vpop.f32.mrb[37].mxu1 }
 0x45a   : > { %v14194_v55 = vpop.f32.mrb[42].mxu0  ;;  %v14196_v29 = vpop.f32.mrb[38].mxu1 }
 0x45b   : > { %v7724_v44 = vpack.c.bf16 %v14194_v55, %v14190_v56  ;;  %v11729_v31 = vpop.f32.mrb[43].mxu0  ;;  %v7723_v57 = vpack.c.bf16 %v14196_v29, %v14192_v4  ;;  %v11723_v63 = vpop.f32.mrb[39].mxu1  ;;  %v14306_v4 = vld [vmem:[%s14738_s10 + $0x1] ss:$0 sm:$0xff] }
 0x460   : > { %v14202_v34 = vpop.f32.mrb[44].mxu0  ;;  %v14204_v52 = vpop.f32.mrb[40].mxu1 }
 0x461   : > { %v11740_v61 = vpop.f32.mrb[45].mxu0  ;;  %v11734_v0 = vpop.f32.mrb[41].mxu1 }
 0x462   : > { %v14206_v38 = vpop.f32.mrb[46].mxu0  ;;  %v14208_v10 = vpop.f32.mrb[42].mxu1 }
 0x463   : > { %v7726_v32 = vpack.c.bf16 %v14206_v38, %v14202_v34  ;;  %v11741_v13 = vpop.f32.mrb[47].mxu0  ;;  %v7725_v60 = vpack.c.bf16 %v14208_v10, %v14204_v52  ;;  %v11735_v22 = vpop.f32.mrb[43].mxu1  ;;  %v8620_v38 = vld [vmem:[%s14318_s29] sm:$0x1] }
 0x468   : > { %v14214_v33 = vpop.f32.mrb[48].mxu0  ;;  %v14216_v9 = vpop.f32.mrb[44].mxu1 }
 0x469   : > { %v11752_v21 = vpop.f32.mrb[49].mxu0  ;;  %v11746_v12 = vpop.f32.mrb[45].mxu1 }
 0x46a   : > { %v14218_v40 = vpop.f32.mrb[50].mxu0  ;;  %v14220_v23 = vpop.f32.mrb[46].mxu1 }
 0x46b   : > { %v7728_v46 = vpack.c.bf16 %v14218_v40, %v14214_v33  ;;  %v11753_v5 = vpop.f32.mrb[51].mxu0  ;;  %v7727_v36 = vpack.c.bf16 %v14220_v23, %v14216_v9  ;;  %v11747_v26 = vpop.f32.mrb[47].mxu1 }
 0x470   : > { %v14226_v35 = vpop.f32.mrb[52].mxu0  ;;  %v14228_v58 = vpop.f32.mrb[48].mxu1 }
 0x471   : > { %v11764_v6 = vpop.f32.mrb[53].mxu0  ;;  %v11758_v53 = vpop.f32.mrb[49].mxu1 }
 0x472   : > { %v14230_v25 = vpop.f32.mrb[54].mxu0  ;;  %v14232_v24 = vpop.f32.mrb[50].mxu1 }
 0x473   : > { %v7730_v14 = vpack.c.bf16 %v14230_v25, %v14226_v35  ;;  %v11765_v39 = vpop.f32.mrb[55].mxu0  ;;  %v7729_v2 = vpack.c.bf16 %v14232_v24, %v14228_v58  ;;  %v11759_v15 = vpop.f32.mrb[51].mxu1 }
 0x478   : > { %v14238_v54 = vpop.f32.mrb[56].mxu0  ;;  %v14240_v51 = vpop.f32.mrb[52].mxu1 }
 0x479   : > { %v11776_v8 = vpop.f32.mrb[57].mxu0  ;;  %v11770_v30 = vpop.f32.mrb[53].mxu1 }
 0x47a   : > { %v14242_v49 = vpop.f32.mrb[58].mxu0  ;;  %v14244_v31 = vpop.f32.mrb[54].mxu1 }
 0x47b   : > { %v7732_v63 = vpack.c.bf16 %v14242_v49, %v14238_v54  ;;  %v11777_v61 = vpop.f32.mrb[59].mxu0  ;;  %v7731_v0 = vpack.c.bf16 %v14244_v31, %v14240_v51  ;;  %v11771_v13 = vpop.f32.mrb[55].mxu1 }
 0x47f   : > { %v7865_v22 = vpop.permute.xlu1 %7864 }
 0x480   : > { %v7898_v21 = vsel %vm4215_vm2, %v13518_v37, %v7865_v22  ;;  %v14252_v12 = vpop.f32.mrb[60].mxu0  ;;  %v14254_v5 = vpop.f32.mrb[56].mxu1 }
 0x481   : > { %8460 = vmatmul.mubr.bf16.vlgmr.msra.gmra.mrb[64].mxu1 %v7898_v21  ;;  %v11788_v26 = vpop.f32.mrb[61].mxu0  ;;  %v11782_v6 = vpop.f32.mrb[57].mxu1 }
 0x482   : > { %10653 = vmatprep.mubr.msk.bf16.mxu1 %vm4215_vm2, %v7721_v59  ;;  %v14257_v53 = vpop.f32.mrb[62].mxu0  ;;  %v14259_v39 = vpop.f32.mrb[58].mxu1 }
 0x483   : > { %v7734_v15 = vpack.c.bf16 %v14257_v53, %v14252_v12  ;;  %v11789_v8 = vpop.f32.mrb[63].mxu0  ;;  %v7733_v37 = vpack.c.bf16 %v14259_v39, %v14254_v5  ;;  %v11783_v30 = vpop.f32.mrb[59].mxu1 }
 0x487   : > { %v7867_v61 = vpop.permute.xlu1 %7866 }
 0x488   : > { %v7902_v13 = vsel %vm4215_vm2, %v13528_v7, %v7867_v61  ;;  %v14267_v22 = vpop.f32.mrb[60].mxu1 }
 0x489   : > { %8468 = vmatmul.mubr.bf16.gmra.mrb[68].mxu1 %v7902_v13  ;;  %v11794_v59 = vpop.f32.mrb[61].mxu1 }
 0x48a   : > { %10654 = vmatprep.mubr.msk.bf16.mxu1 %vm4215_vm2, %v7722_v16  ;;  %v14273_v21 = vpop.f32.mrb[62].mxu1 }
 0x48b   : > { %v7735_v26 = vpack.c.bf16 %v14273_v21, %v14267_v22  ;;  %v11795_v6 = vpop.f32.mrb[63].mxu1  ;;  %v7869_v8 = vpop.permute.xlu1 %7868 }
 0x48c   : > { %v7906_v30 = vsel %vm4215_vm2, %v13538_v3, %v7869_v8 }
 0x48f   : > { %v7871_v7 = vpop.permute.xlu1 %7870 }
 0x490   : > { %v7910_v1 = vsel %vm4215_vm2, %v13548_v18, %v7871_v7 }
 0x491   : > { %8476 = vmatmul.mubr.bf16.gmra.mrb[72].mxu1 %v7906_v30 }
 0x492   : > { %10655 = vmatprep.mubr.msk.bf16.mxu1 %vm4215_vm2, %v7723_v57 }
 0x493   : > { %v7873_v43 = vpop.permute.xlu1 %7872 }
 0x494   : > { %v7914_v3 = vsel %vm4215_vm2, %v13558_v20, %v7873_v43 }
 0x497   : > { %v7875_v16 = vpop.permute.xlu1 %7874 }
 0x498   : > { %v7918_v18 = vsel %vm4215_vm2, %v13568_v27, %v7875_v16 }
 0x499   : > { %8484 = vmatmul.mubr.bf16.gmra.mrb[76].mxu1 %v7910_v1 }
 0x49a   : > { %10656 = vmatprep.mubr.msk.bf16.mxu1 %vm4215_vm2, %v7724_v44 }
 0x49b   : > { %v7877_v56 = vpop.permute.xlu1 %7876 }
 0x49c   : > { %v7922_v20 = vsel %vm4215_vm2, %v13578_v42, %v7877_v56 }
 0x49f   : > { %v7879_v42 = vpop.permute.xlu1 %7878 }
 0x4a0   : > { %v7926_v10 = vsel %vm4215_vm2, %v13588_v28, %v7879_v42  ;;  %v7881_v28 = vpop.permute.xlu0 %7880 }
 0x4a1   : > { %8492 = vmatmul.mubr.bf16.gmra.mrb[80].mxu1 %v7914_v3  ;;  %v7930_v59 = vsel %vm4215_vm2, %v13598_v45, %v7881_v28  ;;  %v8622_v45 = vld [vmem:[%s14318_s29 + $0x2] sm:$0x1]  ;;  %v8626_v28 = vld [vmem:[%s14318_s29 + $0x6] sm:$0x1] }
 0x4a2   : > { %10657 = vmatprep.mubr.msk.bf16.mxu1 %vm4215_vm2, %v7725_v60 }
 0x4a7   : > { %v7883_v7 = vpop.permute.xlu1 %7882 }
 0x4a8   : > { %v7934_v43 = vsel %vm4215_vm2, %v13608_v48, %v7883_v7 }
 0x4a9   : > { %8500 = vmatmul.mubr.bf16.gmra.mrb[84].mxu1 %v7918_v18  ;;  %v7885_v18 = vpop.permute.xlu0 %7884 }
 0x4aa   : > { %10658 = vmatprep.mubr.msk.bf16.mxu1 %vm4215_vm2, %v7726_v32  ;;  %v7938_v35 = vsel %vm4215_vm2, %v13618_v47, %v7885_v18 }
 0x4b0   : > { %v8147_v55 = vpop.f32.mrb[64].mxu0 }
 0x4b1   : > { %v8149_v29 = vpop.f32.mrb[65].mxu0  ;;  %8508 = vmatmul.mubr.bf16.gmra.mrb[88].mxu1 %v7922_v20  ;;  %v8148_v27 = vadd.f32 %v14306_v4, %v8147_v55 }
 0x4b2   : > { %v8150_v44 = vpop.f32.mrb[66].mxu0  ;;  %10659 = vmatprep.mubr.msk.bf16.mxu1 %vm4215_vm2, %v7727_v36 }
 0x4b3   : > { %v8151_v57 = vadd.f32 %v14306_v4, %v8150_v44  ;;  %v8152_v34 = vpop.f32.mrb[67].mxu0 }
 0x4b4   : > { %v8624_v34 = vld [vmem:[%s14318_s29 + $0x4] sm:$0x1] }
 0x4b5   : > { %v8588_v52 = vpack.c.bf16 %v8151_v57, %v8148_v27  ;;  %v7887_v27 = vpop.permute.xlu1 %7886 }
 0x4b6   : > { %v7942_v47 = vsel %vm4215_vm2, %v13628_v19, %v7887_v27  ;;  %v8630_v27 = vld [vmem:[%s14318_s29 + $0xa] sm:$0x1] }
 0x4b7   : > { %11797 = vmatpush3.bf16.msra.mxu0 %v8588_v52 }
 0x4b8   : > { %v8155_v32 = vpop.f32.mrb[68].mxu0  ;;  %11808 = vmatprep.subr.bf16.mxu0 %v14749_v11 }
 0x4b9   : > { %v8157_v60 = vpop.f32.mrb[69].mxu0  ;;  %8516 = vmatmul.mubr.bf16.gmra.mrb[92].mxu1 %v7926_v10  ;;  %v8156_v23 = vadd.f32 %v14306_v4, %v8155_v32 }
 0x4ba   : > { %v8158_v9 = vpop.f32.mrb[70].mxu0  ;;  %10660 = vmatprep.mubr.msk.bf16.mxu1 %vm4215_vm2, %v7728_v46  ;;  %11799 = vmatmul.mubr.msk.bf16.vlgmr.msra.gmra.mrb[128].mxu0 %vm785_vm1, %v8620_v38  ;;  %v7889_v38 = vpop.permute.xlu0 %7888 }
 0x4bb   : > { %v8159_v36 = vadd.f32 %v14306_v4, %v8158_v9  ;;  %v8160_v61 = vpop.f32.mrb[71].mxu0  ;;  %11810 = vmatprep.mubr.msk.bf16.mxu0 %vm12249_vm0, %v14749_v11  ;;  %v7946_v54 = vsel %vm4215_vm2, %v13639_v41, %v7889_v38 }
 0x4bd   : > { %v8589_v13 = vpack.c.bf16 %v8159_v36, %v8156_v23  ;;  %v7891_v36 = vpop.permute.xlu1 %7890 }
 0x4be   : > { %v7950_v41 = vsel %vm4215_vm2, %v13649_v50, %v7891_v36 }
 0x4bf   : > { %11803 = vmatpush3.bf16.msra.mxu1 %v8589_v13 }
 0x4c0   : > { %v8163_v33 = vpop.f32.mrb[72].mxu0  ;;  %11814 = vmatprep.subr.bf16.mxu1 %v14749_v11 }
 0x4c1   : > { %v8165_v40 = vpop.f32.mrb[73].mxu0  ;;  %8524 = vmatmul.mubr.bf16.gmra.mrb[96].mxu1 %v7930_v59  ;;  %v8164_v6 = vadd.f32 %v14306_v4, %v8163_v33  ;;  %v7893_v33 = vpop.permute.xlu0 %7892 }
 0x4c2   : > { %v8166_v46 = vpop.f32.mrb[74].mxu0  ;;  %10661 = vmatprep.mubr.msk.bf16.mxu1 %vm4215_vm2, %v7729_v2  ;;  %v7954_v12 = vsel %vm4215_vm2, %v13660_v62, %v7893_v33  ;;  %v7895_v7 = vpop.permute.xlu1 %7894  ;;  %v8631_v33 = vld [vmem:[%s14318_s29 + $0xb] sm:$0x1] }
 0x4c3   : > { %v8167_v8 = vadd.f32 %v14306_v4, %v8166_v46  ;;  %v8168_v30 = vpop.f32.mrb[75].mxu0  ;;  %v7958_v62 = vsel %vm4215_vm2, %v13672_v17, %v7895_v7  ;;  %v8633_v7 = vld [vmem:[%s14318_s29 + $0xd] sm:$0x1] }
 0x4c5   : > { %v8590_v1 = vpack.c.bf16 %v8167_v8, %v8164_v6 }
 0x4c7   : > { %11809 = vmatpush3.bf16.msra.mxu0 %v8590_v1 }
 0x4c8   : > { %v8171_v3 = vpop.f32.mrb[76].mxu0  ;;  %11820 = vmatprep.subr.bf16.mxu0 %v14749_v11 }
 0x4c9   : > { %v8173_v16 = vpop.f32.mrb[77].mxu0  ;;  %8532 = vmatmul.mubr.bf16.gmra.mrb[100].mxu1 %v7934_v43  ;;  %v14352_v24 = vadd.f32 %v14306_v4, %v8171_v3 }
 0x4ca   : > { %v8174_v58 = vpop.f32.mrb[78].mxu0  ;;  %10662 = vmatprep.mubr.msk.bf16.mxu1 %vm4215_vm2, %v7730_v14  ;;  %11811 = vmatmul.mubr.msk.bf16.vlgmr.msra.gmra.mrb[132].mxu0 %vm785_vm1, %v8622_v45  ;;  %v8628_v45 = vld [vmem:[%s14318_s29 + $0x8] sm:$0x1] }
 0x4cb   : > { %v14355_v2 = vadd.f32 %v14306_v4, %v8174_v58  ;;  %v8176_v48 = vpop.f32.mrb[79].mxu0  ;;  %11822 = vmatprep.mubr.msk.bf16.mxu0 %vm12249_vm0, %v14749_v11  ;;  %v8621_v58 = vld [vmem:[%s14318_s29 + $0x1] sm:$0x1] }
 0x4cd   : > { %v8591_v56 = vpack.c.bf16 %v14355_v2, %v14352_v24 }
 0x4d0   : > { %v8179_v25 = vpop.f32.mrb[80].mxu0 }
 0x4d1   : > { %v8181_v14 = vpop.f32.mrb[81].mxu0  ;;  %8540 = vmatmul.mubr.bf16.gmra.mrb[104].mxu1 %v7938_v35  ;;  %v8180_v55 = vadd.f32 %v14306_v4, %v8179_v25 }
 0x4d2   : > { %v8182_v20 = vpop.f32.mrb[82].mxu0  ;;  %10663 = vmatprep.mubr.msk.bf16.mxu1 %vm4215_vm2, %v7731_v0 }
 0x4d3   : > { %v8183_v29 = vadd.f32 %v14306_v4, %v8182_v20  ;;  %v8184_v44 = vpop.f32.mrb[83].mxu0 }
 0x4d5   : > { %v8592_v57 = vpack.c.bf16 %v8183_v29, %v8180_v55  ;;  %v8623_v29 = vld [vmem:[%s14318_s29 + $0x3] sm:$0x1] }
 0x4d7   : > { %11821 = vmatpush3.bf16.msra.mxu0 %v8592_v57 }
 0x4d8   : > { %v8187_v42 = vpop.f32.mrb[84].mxu0  ;;  %11832 = vmatprep.subr.bf16.mxu0 %v14749_v11 }
 0x4d9   : > { %v8189_v52 = vpop.f32.mrb[85].mxu0  ;;  %8548 = vmatmul.mubr.bf16.gmra.mrb[108].mxu1 %v7942_v47  ;;  %v14379_v31 = vadd.f32 %v14306_v4, %v8187_v42  ;;  %v8625_v42 = vld [vmem:[%s14318_s29 + $0x5] sm:$0x1] }
 0x4da   : > { %v8190_v51 = vpop.f32.mrb[86].mxu0  ;;  %10664 = vmatprep.mubr.msk.bf16.mxu1 %vm4215_vm2, %v7732_v63  ;;  %11823 = vmatmul.mubr.msk.bf16.vlgmr.msra.gmra.mrb[136].mxu0 %vm785_vm1, %v8624_v34 }
 0x4db   : > { %v14382_v0 = vadd.f32 %v14306_v4, %v8190_v51  ;;  %v8192_v19 = vpop.f32.mrb[87].mxu0  ;;  %11834 = vmatprep.mubr.msk.bf16.mxu0 %vm12249_vm0, %v14749_v11 }
 0x4dd   : > { %v8593_v10 = vpack.c.bf16 %v14382_v0, %v14379_v31 }
 0x4e0   : > { %v8195_v49 = vpop.f32.mrb[88].mxu0 }
 0x4e1   : > { %v8197_v63 = vpop.f32.mrb[89].mxu0  ;;  %8556 = vmatmul.mubr.bf16.gmra.mrb[112].mxu1 %v7946_v54  ;;  %v8196_v60 = vadd.f32 %v14306_v4, %v8195_v49  ;;  %v8627_v54 = vld [vmem:[%s14318_s29 + $0x7] sm:$0x1] }
 0x4e2   : > { %v8198_v32 = vpop.f32.mrb[90].mxu0  ;;  %10665 = vmatprep.mubr.msk.bf16.mxu1 %vm4215_vm2, %v7733_v37  ;;  %v8632_v63 = vld [vmem:[%s14318_s29 + $0xc] sm:$0x1] }
 0x4e3   : > { %v8199_v9 = vadd.f32 %v14306_v4, %v8198_v32  ;;  %v8200_v23 = vpop.f32.mrb[91].mxu0 }
 0x4e5   : > { %v8594_v61 = vpack.c.bf16 %v8199_v9, %v8196_v60 }
 0x4e7   : > { %11833 = vmatpush3.bf16.msra.mxu0 %v8594_v61 }
 0x4e8   : > { %v8203_v13 = vpop.f32.mrb[92].mxu0  ;;  %11844 = vmatprep.subr.bf16.mxu0 %v14749_v11 }
 0x4e9   : > { %v8205_v59 = vpop.f32.mrb[93].mxu0  ;;  %8564 = vmatmul.mubr.bf16.gmra.mrb[116].mxu1 %v7950_v41  ;;  %v14406_v39 = vadd.f32 %v14306_v4, %v8203_v13 }
 0x4ea   : > { %v8206_v5 = vpop.f32.mrb[94].mxu0  ;;  %10666 = vmatprep.mubr.msk.bf16.mxu1 %vm4215_vm2, %v7734_v15  ;;  %11835 = vmatmul.mubr.msk.bf16.vlgmr.msra.gmra.mrb[140].mxu0 %vm785_vm1, %v8626_v28  ;;  %v8629_v28 = vld [vmem:[%s14318_s29 + $0x9] sm:$0x1] }
 0x4eb   : > { %v14409_v37 = vadd.f32 %v14306_v4, %v8206_v5  ;;  %v8208_v50 = vpop.f32.mrb[95].mxu0  ;;  %11846 = vmatprep.mubr.msk.bf16.mxu0 %vm12249_vm0, %v14749_v11 }
 0x4ed   : > { %v8595_v40 = vpack.c.bf16 %v14409_v37, %v14406_v39 }
 0x4f0   : > { %v8211_v53 = vpop.f32.mrb[96].mxu0 }
 0x4f1   : > { %v8213_v15 = vpop.f32.mrb[97].mxu0  ;;  %8572 = vmatmul.mubr.bf16.gmra.mrb[120].mxu1 %v7954_v12  ;;  %v8212_v6 = vadd.f32 %v14306_v4, %v8211_v53  ;;  %v8634_v12 = vld [vmem:[%s14318_s29 + $0xe] sm:$0x1] }
 0x4f2   : > { %v8214_v46 = vpop.f32.mrb[98].mxu0  ;;  %10667 = vmatprep.mubr.msk.bf16.mxu1 %vm4215_vm2, %v7735_v26 }
 0x4f3   : > { %v8215_v8 = vadd.f32 %v14306_v4, %v8214_v46  ;;  %v8216_v30 = vpop.f32.mrb[99].mxu0 }
 0x4f5   : > { %v8596_v1 = vpack.c.bf16 %v8215_v8, %v8212_v6 }
 0x4f7   : > { %11845 = vmatpush3.bf16.msra.mxu0 %v8596_v1  ;;  %v14509_v1 = vld [vmem:[%s14739_s11 + $0x1] ss:$0 sm:$0xff] }
 0x4f8   : > { %v8219_v43 = vpop.f32.mrb[100].mxu0  ;;  %11856 = vmatprep.subr.bf16.mxu0 %v14749_v11 }
 0x4f9   : > { %v8221_v3 = vpop.f32.mrb[101].mxu0  ;;  %8580 = vmatmul.mubr.bf16.gmra.mrb[124].mxu1 %v7958_v62  ;;  %v8220_v21 = vadd.f32 %v14306_v4, %v8219_v43 }
 0x4fa   : > { %v8222_v22 = vpop.f32.mrb[102].mxu0  ;;  %11804 = vmatprep.mubr.msk.bf16.mxu1 %vm12249_vm0, %v14749_v11  ;;  %11847 = vmatmul.mubr.msk.bf16.vlgmr.msra.gmra.mrb[144].mxu0 %vm785_vm1, %v8628_v45 }
 0x4fb   : > { %v8223_v26 = vadd.f32 %v14306_v4, %v8222_v22  ;;  %v8224_v16 = vpop.f32.mrb[103].mxu0  ;;  %11858 = vmatprep.mubr.msk.bf16.mxu0 %vm12249_vm0, %v14749_v11 }
 0x4fc   : > { %v9324_v16 = vld [vmem:[%s14517_s16] sm:$0x1] }
 0x4fd   : > { %v8597_v17 = vpack.c.bf16 %v8223_v26, %v8220_v21 }
 0x500   : > { %v8227_v48 = vpop.f32.mrb[104].mxu0 }
 0x501   : > { %v8229_v18 = vpop.f32.mrb[105].mxu0  ;;  %11805 = vmatmul.mubr.msk.bf16.vlgmr.msra.gmra.mrb[128].mxu1 %vm785_vm1, %v8621_v58  ;;  %v8228_v25 = vadd.f32 %v14306_v4, %v8227_v48 }
 0x502   : > { %v8230_v35 = vpop.f32.mrb[106].mxu0  ;;  %11815 = vmatpush3.bf16.msra.mxu1 %v8591_v56  ;;  %11816 = vmatprep.mubr.msk.bf16.mxu1 %vm12249_vm0, %v14749_v11 }
 0x503   : > { %v8231_v14 = vadd.f32 %v14306_v4, %v8230_v35  ;;  %v8232_v20 = vpop.f32.mrb[107].mxu0  ;;  %11826 = vmatprep.subr.bf16.mxu1 %v14749_v11 }
 0x504   : > { %v9325_v20 = vld [vmem:[%s14517_s16 + $0x1] sm:$0x1] }
 0x505   : > { %v8598_v55 = vpack.c.bf16 %v8231_v14, %v8228_v25 }
 0x507   : > { %11857 = vmatpush3.bf16.msra.mxu0 %v8598_v55 }
 0x508   : > { %v8235_v44 = vpop.f32.mrb[108].mxu0  ;;  %11868 = vmatprep.subr.bf16.mxu0 %v14749_v11 }
 0x509   : > { %v8237_v24 = vpop.f32.mrb[109].mxu0  ;;  %11817 = vmatmul.mubr.msk.bf16.vlgmr.msra.gmra.mrb[132].mxu1 %vm785_vm1, %v8623_v29  ;;  %v8236_v56 = vadd.f32 %v14306_v4, %v8235_v44 }
 0x50a   : > { %v8238_v2 = vpop.f32.mrb[110].mxu0  ;;  %11827 = vmatpush3.bf16.msra.mxu1 %v8593_v10  ;;  %11828 = vmatprep.mubr.msk.bf16.mxu1 %vm12249_vm0, %v14749_v11 }
 0x50b   : > { %v8239_v57 = vadd.f32 %v14306_v4, %v8238_v2  ;;  %v8240_v34 = vpop.f32.mrb[111].mxu0  ;;  %11838 = vmatprep.subr.bf16.mxu1 %v14749_v11  ;;  %11859 = vmatmul.mubr.msk.bf16.vlgmr.msra.gmra.mrb[148].mxu0 %vm785_vm1, %v8630_v27 }
 0x50c   : > { %11870 = vmatprep.mubr.msk.bf16.mxu0 %vm12249_vm0, %v14749_v11 }
 0x50d   : > { %v8599_v47 = vpack.c.bf16 %v8239_v57, %v8236_v56  ;;  %v9326_v57 = vld [vmem:[%s14517_s16 + $0x2] sm:$0x1] }
 0x510   : > { %v8243_v52 = vpop.f32.mrb[112].mxu0 }
 0x511   : > { %v8245_v51 = vpop.f32.mrb[113].mxu0  ;;  %11829 = vmatmul.mubr.msk.bf16.vlgmr.msra.gmra.mrb[136].mxu1 %vm785_vm1, %v8625_v42  ;;  %v8244_v0 = vadd.f32 %v14306_v4, %v8243_v52 }
 0x512   : > { %v8246_v31 = vpop.f32.mrb[114].mxu0  ;;  %11839 = vmatpush3.bf16.msra.mxu1 %v8595_v40  ;;  %11840 = vmatprep.mubr.msk.bf16.mxu1 %vm12249_vm0, %v14749_v11 }
 0x513   : > { %v8247_v19 = vadd.f32 %v14306_v4, %v8246_v31  ;;  %v8248_v38 = vpop.f32.mrb[115].mxu0  ;;  %11850 = vmatprep.subr.bf16.mxu1 %v14749_v11 }
 0x515   : > { %v8600_v10 = vpack.c.bf16 %v8247_v19, %v8244_v0  ;;  %v9327_v19 = vld [vmem:[%s14517_s16 + $0x3] sm:$0x1] }
 0x517   : > { %11869 = vmatpush3.bf16.msra.mxu0 %v8600_v10 }
 0x518   : > { %v8251_v49 = vpop.f32.mrb[116].mxu0  ;;  %11880 = vmatprep.subr.bf16.mxu0 %v14749_v11 }
 0x519   : > { %v8253_v32 = vpop.f32.mrb[117].mxu0  ;;  %11841 = vmatmul.mubr.msk.bf16.vlgmr.msra.gmra.mrb[140].mxu1 %vm785_vm1, %v8627_v54  ;;  %v8252_v9 = vadd.f32 %v14306_v4, %v8251_v49 }
 0x51a   : > { %v8254_v60 = vpop.f32.mrb[118].mxu0  ;;  %11851 = vmatpush3.bf16.msra.mxu1 %v8597_v17  ;;  %11852 = vmatprep.mubr.msk.bf16.mxu1 %vm12249_vm0, %v14749_v11 }
 0x51b   : > { %v8255_v23 = vadd.f32 %v14306_v4, %v8254_v60  ;;  %v8256_v36 = vpop.f32.mrb[119].mxu0  ;;  %11862 = vmatprep.subr.bf16.mxu1 %v14749_v11  ;;  %11871 = vmatmul.mubr.msk.bf16.vlgmr.msra.gmra.mrb[152].mxu0 %vm785_vm1, %v8632_v63 }
 0x51c   : > { %11882 = vmatprep.mubr.msk.bf16.mxu0 %vm12249_vm0, %v14749_v11 }
 0x51d   : > { %v8601_v61 = vpack.c.bf16 %v8255_v23, %v8252_v9  ;;  %v9328_v9 = vld [vmem:[%s14517_s16 + $0x4] sm:$0x1] }
 0x520   : > { %v8259_v41 = vpop.f32.mrb[120].mxu0 }
 0x521   : > { %v8261_v13 = vpop.f32.mrb[121].mxu0  ;;  %11853 = vmatmul.mubr.msk.bf16.vlgmr.msra.gmra.mrb[144].mxu1 %vm785_vm1, %v8629_v28  ;;  %v8260_v5 = vadd.f32 %v14306_v4, %v8259_v41 }
 0x522   : > { %v8262_v59 = vpop.f32.mrb[122].mxu0  ;;  %11863 = vmatpush3.bf16.msra.mxu1 %v8599_v47  ;;  %11864 = vmatprep.mubr.msk.bf16.mxu1 %vm12249_vm0, %v14749_v11 }
 0x523   : > { %v8263_v39 = vadd.f32 %v14306_v4, %v8262_v59  ;;  %v8264_v37 = vpop.f32.mrb[123].mxu0  ;;  %11874 = vmatprep.subr.bf16.mxu1 %v14749_v11 }
 0x525   : > { %v8602_v50 = vpack.c.bf16 %v8263_v39, %v8260_v5  ;;  %v9329_v5 = vld [vmem:[%s14517_s16 + $0x5] sm:$0x1] }
 0x527   : > { %11881 = vmatpush3.bf16.msra.mxu0 %v8602_v50 }
 0x528   : > { %v8267_v40 = vpop.f32.mrb[124].mxu0  ;;  %11892 = vmatprep.subr.bf16.mxu0 %v14749_v11 }
 0x529   : > { %v8269_v53 = vpop.f32.mrb[125].mxu0  ;;  %11865 = vmatmul.mubr.msk.bf16.vlgmr.msra.gmra.mrb[148].mxu1 %vm785_vm1, %v8631_v33  ;;  %v8268_v46 = vadd.f32 %v14306_v4, %v8267_v40 }
 0x52a   : > { %v8270_v15 = vpop.f32.mrb[126].mxu0  ;;  %11875 = vmatpush3.bf16.msra.mxu1 %v8601_v61  ;;  %11876 = vmatprep.mubr.msk.bf16.mxu1 %vm12249_vm0, %v14749_v11 }
 0x52b   : > { %v8271_v6 = vadd.f32 %v14306_v4, %v8270_v15  ;;  %v8272_v8 = vpop.f32.mrb[127].mxu0  ;;  %11886 = vmatprep.subr.bf16.mxu1 %v14749_v11  ;;  %11883 = vmatmul.mubr.msk.bf16.vlgmr.msra.gmra.mrb[156].mxu0 %vm785_vm1, %v8634_v12  ;;  %v8635_v4 = vld [vmem:[%s14318_s29 + $0xf] sm:$0x1]  ;;  %v9330_v15 = vld [vmem:[%s14517_s16 + $0x6] sm:$0x1] }
 0x52c   : > { %11894 = vmatprep.mubr.msk.bf16.mxu0 %vm12249_vm0, %v14749_v11 }
 0x52d   : > { %v8603_v30 = vpack.c.bf16 %v8271_v6, %v8268_v46 }
 0x531   : > { %11877 = vmatmul.mubr.msk.bf16.vlgmr.msra.gmra.mrb[152].mxu1 %vm785_vm1, %v8633_v7 }
 0x532   : > { %11887 = vmatpush3.bf16.msra.mxu1 %v8603_v30  ;;  %11888 = vmatprep.mubr.msk.bf16.mxu1 %vm12249_vm0, %v14749_v11 }
 0x533   : > { %11898 = vmatprep.subr.bf16.mxu1 %v14749_v11 }
 0x539   : > { %11889 = vmatmul.mubr.msk.bf16.vlgmr.msra.gmra.mrb[156].mxu1 %vm785_vm1, %v8635_v4 }
 0x53a   : > { %11900 = vmatprep.mubr.msk.bf16.mxu1 %vm12249_vm0, %v14749_v11 }
 0x554   : > { %v8461_v45 = vpop.f32.mrb[64].mxu1 }
 0x555   : > { %v8463_v62 = vpop.f32.mrb[65].mxu1  ;;  %v8462_v3 = vadd.f32 %v14509_v1, %v8461_v45 }
 0x556   : > { %v8464_v43 = vpop.f32.mrb[66].mxu1 }
 0x557   : > { %v8465_v22 = vadd.f32 %v14509_v1, %v8464_v43  ;;  %v8466_v21 = vpop.f32.mrb[67].mxu1 }
 0x558   : > { %v9331_v21 = vld [vmem:[%s14517_s16 + $0x7] sm:$0x1] }
 0x559   : > { %v8604_v26 = vpack.c.bf16 %v8465_v22, %v8462_v3 }
 0x55b   : > { %11893 = vmatpush3.bf16.msra.mxu0 %v8604_v26 }
 0x55c   : > { %v8469_v17 = vpop.f32.mrb[68].mxu1  ;;  %11904 = vmatprep.subr.bf16.mxu0 %v14749_v11 }
 0x55d   : > { %v8471_v58 = vpop.f32.mrb[69].mxu1  ;;  %v8470_v18 = vadd.f32 %v14509_v1, %v8469_v17 }
 0x55e   : > { %v8472_v48 = vpop.f32.mrb[70].mxu1  ;;  %11895 = vmatmul.mubr.msk.bf16.vlgmr.msra.gmra.mrb[160].mxu0 %vm785_vm1, %v9324_v16 }
 0x55f   : > { %v8473_v35 = vadd.f32 %v14509_v1, %v8472_v48  ;;  %v8474_v25 = vpop.f32.mrb[71].mxu1  ;;  %11906 = vmatprep.mubr.msk.bf16.mxu0 %vm12249_vm0, %v14749_v11 }
 0x560   : > { %v9332_v25 = vld [vmem:[%s14517_s16 + $0x8] sm:$0x1] }
 0x561   : > { %v8605_v14 = vpack.c.bf16 %v8473_v35, %v8470_v18 }
 0x563   : > { %11899 = vmatpush3.bf16.msra.mxu1 %v8605_v14 }
 0x564   : > { %v8477_v55 = vpop.f32.mrb[72].mxu1  ;;  %11910 = vmatprep.subr.bf16.mxu1 %v14749_v11 }
 0x565   : > { %v8479_v29 = vpop.f32.mrb[73].mxu1  ;;  %v8478_v27 = vadd.f32 %v14509_v1, %v8477_v55 }
 0x566   : > { %v8480_v44 = vpop.f32.mrb[74].mxu1  ;;  %11901 = vmatmul.mubr.msk.bf16.vlgmr.msra.gmra.mrb[160].mxu1 %vm785_vm1, %v9325_v20 }
 0x567   : > { %v8481_v24 = vadd.f32 %v14509_v1, %v8480_v44  ;;  %v8482_v2 = vpop.f32.mrb[75].mxu1  ;;  %11912 = vmatprep.mubr.msk.bf16.mxu1 %vm12249_vm0, %v14749_v11 }
 0x569   : > { %v8606_v56 = vpack.c.bf16 %v8481_v24, %v8478_v27 }
 0x56b   : > { %11905 = vmatpush3.bf16.msra.mxu0 %v8606_v56 }
 0x56c   : > { %v8485_v34 = vpop.f32.mrb[76].mxu1  ;;  %11916 = vmatprep.subr.bf16.mxu0 %v14749_v11 }
 0x56d   : > { %v8487_v47 = vpop.f32.mrb[77].mxu1  ;;  %v8486_v52 = vadd.f32 %v14509_v1, %v8485_v34 }
 0x56e   : > { %v8488_v42 = vpop.f32.mrb[78].mxu1  ;;  %11907 = vmatmul.mubr.msk.bf16.vlgmr.msra.gmra.mrb[164].mxu0 %vm785_vm1, %v9326_v57  ;;  %v9333_v47 = vld [vmem:[%s14517_s16 + $0x9] sm:$0x1] }
 0x56f   : > { %v8489_v51 = vadd.f32 %v14509_v1, %v8488_v42  ;;  %v8490_v31 = vpop.f32.mrb[79].mxu1  ;;  %11918 = vmatprep.mubr.msk.bf16.mxu0 %vm12249_vm0, %v14749_v11 }
 0x571   : > { %v8607_v0 = vpack.c.bf16 %v8489_v51, %v8486_v52 }
 0x573   : > { %11911 = vmatpush3.bf16.msra.mxu1 %v8607_v0 }
 0x574   : > { %v8493_v38 = vpop.f32.mrb[80].mxu1  ;;  %11922 = vmatprep.subr.bf16.mxu1 %v14749_v11 }
 0x575   : > { %v8495_v10 = vpop.f32.mrb[81].mxu1  ;;  %v8494_v49 = vadd.f32 %v14509_v1, %v8493_v38 }
 0x576   : > { %v8496_v54 = vpop.f32.mrb[82].mxu1  ;;  %11913 = vmatmul.mubr.msk.bf16.vlgmr.msra.gmra.mrb[164].mxu1 %vm785_vm1, %v9327_v19  ;;  %v9334_v10 = vld [vmem:[%s14517_s16 + $0xa] sm:$0x1] }
 0x577   : > { %v8497_v63 = vadd.f32 %v14509_v1, %v8496_v54  ;;  %v8498_v32 = vpop.f32.mrb[83].mxu1  ;;  %11924 = vmatprep.mubr.msk.bf16.mxu1 %vm12249_vm0, %v14749_v11 }
 0x579   : > { %v8608_v60 = vpack.c.bf16 %v8497_v63, %v8494_v49 }
 0x57b   : > { %11917 = vmatpush3.bf16.msra.mxu0 %v8608_v60 }
 0x57c   : > { %v8501_v23 = vpop.f32.mrb[84].mxu1  ;;  %11928 = vmatprep.subr.bf16.mxu0 %v14749_v11 }
 0x57d   : > { %v8503_v36 = vpop.f32.mrb[85].mxu1  ;;  %v8502_v28 = vadd.f32 %v14509_v1, %v8501_v23 }
 0x57e   : > { %v8504_v61 = vpop.f32.mrb[86].mxu1  ;;  %11919 = vmatmul.mubr.msk.bf16.vlgmr.msra.gmra.mrb[168].mxu0 %vm785_vm1, %v9328_v9 }
 0x57f   : > { %v8505_v41 = vadd.f32 %v14509_v1, %v8504_v61  ;;  %v8506_v13 = vpop.f32.mrb[87].mxu1  ;;  %11930 = vmatprep.mubr.msk.bf16.mxu0 %vm12249_vm0, %v14749_v11 }
 0x580   : > { %v9335_v13 = vld [vmem:[%s14517_s16 + $0xb] sm:$0x1] }
 0x581   : > { %v8609_v59 = vpack.c.bf16 %v8505_v41, %v8502_v28 }
 0x583   : > { %11923 = vmatpush3.bf16.msra.mxu1 %v8609_v59 }
 0x584   : > { %v8509_v39 = vpop.f32.mrb[88].mxu1  ;;  %11934 = vmatprep.subr.bf16.mxu1 %v14749_v11 }
 0x585   : > { %v8511_v37 = vpop.f32.mrb[89].mxu1  ;;  %v8510_v33 = vadd.f32 %v14509_v1, %v8509_v39 }
 0x586   : > { %v8512_v50 = vpop.f32.mrb[90].mxu1  ;;  %11925 = vmatmul.mubr.msk.bf16.vlgmr.msra.gmra.mrb[168].mxu1 %vm785_vm1, %v9329_v5 }
 0x587   : > { %v8513_v40 = vadd.f32 %v14509_v1, %v8512_v50  ;;  %v8514_v12 = vpop.f32.mrb[91].mxu1  ;;  %11936 = vmatprep.mubr.msk.bf16.mxu1 %vm12249_vm0, %v14749_v11 }
 0x588   : > { %v9336_v12 = vld [vmem:[%s14517_s16 + $0xc] sm:$0x1] }
 0x589   : > { %v8610_v53 = vpack.c.bf16 %v8513_v40, %v8510_v33 }
 0x58b   : > { %11929 = vmatpush3.bf16.msra.mxu0 %v8610_v53 }
 0x58c   : > { %v8517_v46 = vpop.f32.mrb[92].mxu1  ;;  %11940 = vmatprep.subr.bf16.mxu0 %v14749_v11 }
 0x58d   : > { %v8519_v6 = vpop.f32.mrb[93].mxu1  ;;  %v14563_v8 = vpop.f32.mrb[128].mxu0  ;;  %v8518_v4 = vadd.f32 %v14509_v1, %v8517_v46 }
 0x58e   : > { %v8520_v30 = vpop.f32.mrb[94].mxu1  ;;  %11931 = vmatmul.mubr.msk.bf16.vlgmr.msra.gmra.mrb[172].mxu0 %vm785_vm1, %v9330_v15  ;;  %v11800_v7 = vpop.f32.mrb[129].mxu0 }
 0x58f   : > { %v8521_v45 = vadd.f32 %v14509_v1, %v8520_v30  ;;  %v8522_v62 = vpop.f32.mrb[95].mxu1  ;;  %11942 = vmatprep.mubr.msk.bf16.mxu0 %vm12249_vm0, %v14749_v11  ;;  %v8676_v43 = vpop.f32.mrb[130].mxu0 }
 0x590   : > { %v11801_v3 = vpop.f32.mrb[131].mxu0 }
 0x591   : > { %v8611_v22 = vpack.c.bf16 %v8521_v45, %v8518_v4 }
 0x593   : > { %11935 = vmatpush3.bf16.msra.mxu1 %v8611_v22  ;;  %v9337_v22 = vld [vmem:[%s14517_s16 + $0xd] sm:$0x1] }
 0x594   : > { %v8525_v26 = vpop.f32.mrb[96].mxu1  ;;  %11946 = vmatprep.subr.bf16.mxu1 %v14749_v11 }
 0x595   : > { %v8527_v16 = vpop.f32.mrb[97].mxu1  ;;  %v8526_v58 = vadd.f32 %v14509_v1, %v8525_v26 }
 0x596   : > { %v8528_v17 = vpop.f32.mrb[98].mxu1  ;;  %11937 = vmatmul.mubr.msk.bf16.vlgmr.msra.gmra.mrb[172].mxu1 %vm785_vm1, %v9331_v21 }
 0x597   : > { %v8529_v48 = vadd.f32 %v14509_v1, %v8528_v17  ;;  %v8530_v18 = vpop.f32.mrb[99].mxu1  ;;  %11948 = vmatprep.mubr.msk.bf16.mxu1 %vm12249_vm0, %v14749_v11 }
 0x599   : > { %v8612_v35 = vpack.c.bf16 %v8529_v48, %v8526_v58 }
 0x59b   : > { %11941 = vmatpush3.bf16.msra.mxu0 %v8612_v35  ;;  %v9338_v35 = vld [vmem:[%s14517_s16 + $0xe] sm:$0x1] }
 0x59c   : > { %v8533_v14 = vpop.f32.mrb[100].mxu1  ;;  %11952 = vmatprep.subr.bf16.mxu0 %v14749_v11 }
 0x59d   : > { %v8535_v20 = vpop.f32.mrb[101].mxu1  ;;  %v14579_v55 = vpop.f32.mrb[132].mxu0  ;;  %v8534_v27 = vadd.f32 %v14509_v1, %v8533_v14 }
 0x59e   : > { %v8536_v29 = vpop.f32.mrb[102].mxu1  ;;  %11943 = vmatmul.mubr.msk.bf16.vlgmr.msra.gmra.mrb[176].mxu0 %vm785_vm1, %v9332_v25  ;;  %v11812_v44 = vpop.f32.mrb[133].mxu0 }
 0x59f   : > { %v8537_v24 = vadd.f32 %v14509_v1, %v8536_v29  ;;  %v8538_v2 = vpop.f32.mrb[103].mxu1  ;;  %11954 = vmatprep.mubr.msk.bf16.mxu0 %vm12249_vm0, %v14749_v11  ;;  %v8762_v56 = vpop.f32.mrb[134].mxu0 }
 0x5a0   : > { %v11813_v57 = vpop.f32.mrb[135].mxu0 }
 0x5a1   : > { %v8613_v34 = vpack.c.bf16 %v8537_v24, %v8534_v27 }
 0x5a3   : > { %11947 = vmatpush3.bf16.msra.mxu1 %v8613_v34  ;;  %v9339_v34 = vld [vmem:[%s14517_s16 + $0xf] sm:$0x1] }
 0x5a4   : > { %v8541_v42 = vpop.f32.mrb[104].mxu1  ;;  %11958 = vmatprep.subr.bf16.mxu1 %v14749_v11 }
 0x5a5   : > { %v8543_v52 = vpop.f32.mrb[105].mxu1  ;;  %v8542_v31 = vadd.f32 %v14509_v1, %v8541_v42 }
 0x5a6   : > { %v8544_v51 = vpop.f32.mrb[106].mxu1  ;;  %11949 = vmatmul.mubr.msk.bf16.vlgmr.msra.gmra.mrb[176].mxu1 %vm785_vm1, %v9333_v47 }
 0x5a7   : > { %v8545_v0 = vadd.f32 %v14509_v1, %v8544_v51  ;;  %v8546_v19 = vpop.f32.mrb[107].mxu1  ;;  %11960 = vmatprep.mubr.msk.bf16.mxu1 %vm12249_vm0, %v14749_v11 }
 0x5a9   : > { %v8614_v38 = vpack.c.bf16 %v8545_v0, %v8542_v31 }
 0x5ab   : > { %11953 = vmatpush3.bf16.msra.mxu0 %v8614_v38 }
 0x5ac   : > { %v8549_v54 = vpop.f32.mrb[108].mxu1  ;;  %11964 = vmatprep.subr.bf16.mxu0 %v14749_v11 }
 0x5ad   : > { %v8551_v49 = vpop.f32.mrb[109].mxu1  ;;  %v14595_v63 = vpop.f32.mrb[136].mxu0  ;;  %v8550_v9 = vadd.f32 %v14509_v1, %v8549_v54 }
 0x5ae   : > { %v8552_v32 = vpop.f32.mrb[110].mxu1  ;;  %11955 = vmatmul.mubr.msk.bf16.vlgmr.msra.gmra.mrb[180].mxu0 %vm785_vm1, %v9334_v10  ;;  %v11824_v60 = vpop.f32.mrb[137].mxu0 }
 0x5af   : > { %v8553_v23 = vadd.f32 %v14509_v1, %v8552_v32  ;;  %v8554_v36 = vpop.f32.mrb[111].mxu1  ;;  %11966 = vmatprep.mubr.msk.bf16.mxu0 %vm12249_vm0, %v14749_v11  ;;  %v8848_v61 = vpop.f32.mrb[138].mxu0 }
 0x5b0   : > { %v11825_v28 = vpop.f32.mrb[139].mxu0 }
 0x5b1   : > { %v8615_v41 = vpack.c.bf16 %v8553_v23, %v8550_v9 }
 0x5b3   : > { %11959 = vmatpush3.bf16.msra.mxu1 %v8615_v41 }
 0x5b4   : > { %v8557_v59 = vpop.f32.mrb[112].mxu1  ;;  %11970 = vmatprep.subr.bf16.mxu1 %v14749_v11 }
 0x5b5   : > { %v8559_v5 = vpop.f32.mrb[113].mxu1  ;;  %v8558_v37 = vadd.f32 %v14509_v1, %v8557_v59 }
 0x5b6   : > { %v8560_v39 = vpop.f32.mrb[114].mxu1  ;;  %11961 = vmatmul.mubr.msk.bf16.vlgmr.msra.gmra.mrb[180].mxu1 %vm785_vm1, %v9335_v13 }
 0x5b7   : > { %v8561_v50 = vadd.f32 %v14509_v1, %v8560_v39  ;;  %v8562_v33 = vpop.f32.mrb[115].mxu1  ;;  %11972 = vmatprep.mubr.msk.bf16.mxu1 %vm12249_vm0, %v14749_v11 }
 0x5b9   : > { %v8616_v40 = vpack.c.bf16 %v8561_v50, %v8558_v37 }
 0x5bb   : > { %11965 = vmatpush3.bf16.msra.mxu0 %v8616_v40 }
 0x5bc   : > { %v8565_v53 = vpop.f32.mrb[116].mxu1  ;;  %11976 = vmatprep.subr.bf16.mxu0 %v14749_v11 }
 0x5bd   : > { %v8567_v15 = vpop.f32.mrb[117].mxu1  ;;  %v14611_v46 = vpop.f32.mrb[140].mxu0  ;;  %v8566_v7 = vadd.f32 %v14509_v1, %v8565_v53 }
 0x5be   : > { %v8568_v6 = vpop.f32.mrb[118].mxu1  ;;  %11967 = vmatmul.mubr.msk.bf16.vlgmr.msra.gmra.mrb[184].mxu0 %vm785_vm1, %v9336_v12  ;;  %v11836_v30 = vpop.f32.mrb[141].mxu0 }
 0x5bf   : > { %v8569_v4 = vadd.f32 %v14509_v1, %v8568_v6  ;;  %v8570_v45 = vpop.f32.mrb[119].mxu1  ;;  %11978 = vmatprep.mubr.msk.bf16.mxu0 %vm12249_vm0, %v14749_v11  ;;  %v8934_v62 = vpop.f32.mrb[142].mxu0 }
 0x5c0   : > { %v11837_v43 = vpop.f32.mrb[143].mxu0 }
 0x5c1   : > { %v8617_v3 = vpack.c.bf16 %v8569_v4, %v8566_v7 }
 0x5c3   : > { %11971 = vmatpush3.bf16.msra.mxu1 %v8617_v3 }
 0x5c4   : > { %v8573_v21 = vpop.f32.mrb[120].mxu1  ;;  %11982 = vmatprep.subr.bf16.mxu1 %v14749_v11 }
 0x5c5   : > { %v8575_v26 = vpop.f32.mrb[121].mxu1  ;;  %v8574_v17 = vadd.f32 %v14509_v1, %v8573_v21 }
 0x5c6   : > { %v8576_v16 = vpop.f32.mrb[122].mxu1  ;;  %11973 = vmatmul.mubr.msk.bf16.vlgmr.msra.gmra.mrb[184].mxu1 %vm785_vm1, %v9337_v22 }
 0x5c7   : > { %v8577_v58 = vadd.f32 %v14509_v1, %v8576_v16  ;;  %v8578_v48 = vpop.f32.mrb[123].mxu1  ;;  %11984 = vmatprep.mubr.msk.bf16.mxu1 %vm12249_vm0, %v14749_v11 }
 0x5c9   : > { %v8618_v18 = vpack.c.bf16 %v8577_v58, %v8574_v17 }
 0x5cb   : > { %11977 = vmatpush3.bf16.msra.mxu0 %v8618_v18 }
 0x5cc   : > { %v8581_v25 = vpop.f32.mrb[124].mxu1 }
 0x5cd   : > { %v8583_v14 = vpop.f32.mrb[125].mxu1  ;;  %v14626_v20 = vpop.f32.mrb[144].mxu0  ;;  %v8582_v27 = vadd.f32 %v14509_v1, %v8581_v25 }
 0x5ce   : > { %v8584_v29 = vpop.f32.mrb[126].mxu1  ;;  %11979 = vmatmul.mubr.msk.bf16.vlgmr.msra.gmra.mrb[188].mxu0 %vm785_vm1, %v9338_v35  ;;  %v11848_v44 = vpop.f32.mrb[145].mxu0 }
 0x5cf   : > { %v8585_v24 = vadd.f32 %v14509_v1, %v8584_v29  ;;  %v8586_v2 = vpop.f32.mrb[127].mxu1  ;;  %v9020_v56 = vpop.f32.mrb[146].mxu0 }
 0x5d0   : > { %v11849_v57 = vpop.f32.mrb[147].mxu0 }
 0x5d1   : > { %v8619_v11 = vpack.c.bf16 %v8585_v24, %v8582_v27 }
 0x5d3   : > { %11983 = vmatpush3.bf16.msra.mxu1 %v8619_v11 }
 0x5d4   : > { %v14632_v47 = vpop.f32.mrb[128].mxu1 }
 0x5d5   : > { %v11806_v42 = vpop.f32.mrb[129].mxu1 }
 0x5d6   : > { %11985 = vmatmul.mubr.msk.bf16.vlgmr.msra.gmra.mrb[188].mxu1 %vm785_vm1, %v9339_v34  ;;  %v8719_v52 = vpop.f32.mrb[130].mxu1 }
 0x5d7   : > { %v11807_v51 = vpop.f32.mrb[131].mxu1 }
 0x5dc   : > { %v14635_v31 = vpop.f32.mrb[132].mxu1 }
 0x5dd   : > { %v11818_v0 = vpop.f32.mrb[133].mxu1 }
 0x5de   : > { %v8805_v19 = vpop.f32.mrb[134].mxu1  ;;  %v14637_v38 = vpop.f32.mrb[148].mxu0 }
 0x5df   : > { %v11819_v1 = vpop.f32.mrb[135].mxu1  ;;  %v11860_v10 = vpop.f32.mrb[149].mxu0 }
 0x5e0   : > { %v9106_v54 = vpop.f32.mrb[150].mxu0 }
 0x5e1   : > { %v11861_v49 = vpop.f32.mrb[151].mxu0 }
 0x5e4   : > { %v14639_v32 = vpop.f32.mrb[136].mxu1 }
 0x5e5   : > { %v11830_v60 = vpop.f32.mrb[137].mxu1 }
 0x5e6   : > { %v8891_v9 = vpop.f32.mrb[138].mxu1 }
 0x5e7   : > { %v11831_v23 = vpop.f32.mrb[139].mxu1 }
 0x5ec   : > { %v14641_v36 = vpop.f32.mrb[140].mxu1 }
 0x5ed   : > { %v11842_v61 = vpop.f32.mrb[141].mxu1 }
 0x5ee   : > { %v8977_v28 = vpop.f32.mrb[142].mxu1  ;;  %v14643_v41 = vpop.f32.mrb[152].mxu0 }
 0x5ef   : > { %v11843_v13 = vpop.f32.mrb[143].mxu1  ;;  %v11872_v59 = vpop.f32.mrb[153].mxu0 }
 0x5f0   : > { %v9192_v5 = vpop.f32.mrb[154].mxu0 }
 0x5f1   : > { %v11873_v39 = vpop.f32.mrb[155].mxu0 }
 0x5f4   : > { %v14645_v37 = vpop.f32.mrb[144].mxu1 }
 0x5f5   : > { %v11854_v50 = vpop.f32.mrb[145].mxu1 }
 0x5f6   : > { %v9063_v33 = vpop.f32.mrb[146].mxu1 }
 0x5f7   : > { %v11855_v40 = vpop.f32.mrb[147].mxu1 }
 0x5fc   : > { %v14647_v12 = vpop.f32.mrb[148].mxu1 }
 0x5fd   : > { %v11866_v53 = vpop.f32.mrb[149].mxu1 }
 0x5fe   : > { %v14649_v15 = vpop.f32.mrb[156].mxu0  ;;  %v9149_v6 = vpop.f32.mrb[150].mxu1 }
 0x5ff   : > { %v11884_v30 = vpop.f32.mrb[157].mxu0  ;;  %v11867_v7 = vpop.f32.mrb[151].mxu1 }
 0x600   : > { %v9278_v4 = vpop.f32.mrb[158].mxu0 }
 0x601   : > { %v11885_v45 = vpop.f32.mrb[159].mxu0 }
 0x604   : > { %v14651_v62 = vpop.f32.mrb[152].mxu1 }
 0x605   : > { %v11878_v43 = vpop.f32.mrb[153].mxu1 }
 0x606   : > { %v9235_v3 = vpop.f32.mrb[154].mxu1 }
 0x607   : > { %v11879_v22 = vpop.f32.mrb[155].mxu1 }
 0x60c   : > { %v14653_v21 = vpop.f32.mrb[156].mxu1 }
 0x60d   : > { %v11890_v26 = vpop.f32.mrb[157].mxu1 }
 0x60e   : > { %v9321_v16 = vpop.f32.mrb[158].mxu1 }
 0x60f   : > { %v11891_v17 = vpop.f32.mrb[159].mxu1 }
 0x631   : > { %v9377_v58 = vpop.f32.mrb[160].mxu0 }
 0x632   : > { %10044 = vrot.lane.b32.xlu0 %v9377_v58, %s12250_s24  ;;  %v11896_v48 = vpop.f32.mrb[161].mxu0 }
 0x633   : > { %v9380_v18 = vpop.f32.mrb[162].mxu0 }
 0x634   : > { %v11897_v35 = vpop.f32.mrb[163].mxu0 }
 0x639   : > { %v9420_v25 = vpop.f32.mrb[160].mxu1 }
 0x63a   : > { %10046 = vrot.lane.b32.xlu1 %v9420_v25, %s12250_s24  ;;  %v11902_v14 = vpop.f32.mrb[161].mxu1 }
 0x63b   : > { %v9423_v29 = vpop.f32.mrb[162].mxu1 }
 0x63c   : > { %v11903_v44 = vpop.f32.mrb[163].mxu1 }
 0x641   : > { %v9463_v27 = vpop.f32.mrb[164].mxu0 }
 0x642   : > { %10048 = vrot.lane.b32.xlu0 %v9463_v27, %s12250_s24  ;;  %v11908_v24 = vpop.f32.mrb[165].mxu0 }
 0x643   : > { %v9466_v2 = vpop.f32.mrb[166].mxu0 }
 0x644   : > { %v11909_v56 = vpop.f32.mrb[167].mxu0 }
 0x649   : > { %v9506_v57 = vpop.f32.mrb[164].mxu1 }
 0x64a   : > { %10050 = vrot.lane.b32.xlu1 %v9506_v57, %s12250_s24  ;;  %v11914_v11 = vpop.f32.mrb[165].mxu1 }
 0x64b   : > { %v9509_v34 = vpop.f32.mrb[166].mxu1 }
 0x64c   : > { %v11915_v42 = vpop.f32.mrb[167].mxu1 }
 0x651   : > { %v9549_v52 = vpop.f32.mrb[168].mxu0 }
 0x652   : > { %10052 = vrot.lane.b32.xlu0 %v9549_v52, %s12250_s24  ;;  %v11920_v51 = vpop.f32.mrb[169].mxu0 }
 0x653   : > { %v9552_v0 = vpop.f32.mrb[170].mxu0 }
 0x654   : > { %v11921_v19 = vpop.f32.mrb[171].mxu0 }
 0x659   : > { %v9592_v1 = vpop.f32.mrb[168].mxu1 }
 0x65a   : > { %10054 = vrot.lane.b32.xlu1 %v9592_v1, %s12250_s24  ;;  %v11926_v10 = vpop.f32.mrb[169].mxu1 }
 0x65b   : > { %v9595_v54 = vpop.f32.mrb[170].mxu1 }
 0x65c   : > { %v11927_v49 = vpop.f32.mrb[171].mxu1 }
 0x661   : > { %v9635_v60 = vpop.f32.mrb[172].mxu0 }
 0x662   : > { %10056 = vrot.lane.b32.xlu0 %v9635_v60, %s12250_s24  ;;  %v11932_v9 = vpop.f32.mrb[173].mxu0 }
 0x663   : > { %v9638_v23 = vpop.f32.mrb[174].mxu0 }
 0x664   : > { %v11933_v61 = vpop.f32.mrb[175].mxu0 }
 0x669   : > { %v9678_v28 = vpop.f32.mrb[172].mxu1 }
 0x66a   : > { %10058 = vrot.lane.b32.xlu1 %v9678_v28, %s12250_s24  ;;  %v11938_v13 = vpop.f32.mrb[173].mxu1 }
 0x66b   : > { %v9681_v59 = vpop.f32.mrb[174].mxu1 }
 0x66c   : > { %v11939_v5 = vpop.f32.mrb[175].mxu1 }
 0x671   : > { %v9721_v39 = vpop.f32.mrb[176].mxu0 }
 0x672   : > { %10060 = vrot.lane.b32.xlu0 %v9721_v39, %s12250_s24  ;;  %v11944_v50 = vpop.f32.mrb[177].mxu0 }
 0x673   : > { %v9724_v33 = vpop.f32.mrb[178].mxu0 }
 0x674   : > { %v11945_v40 = vpop.f32.mrb[179].mxu0 }
 0x679   : > { %v9764_v53 = vpop.f32.mrb[176].mxu1 }
 0x67a   : > { %10062 = vrot.lane.b32.xlu1 %v9764_v53, %s12250_s24  ;;  %v11950_v6 = vpop.f32.mrb[177].mxu1 }
 0x67b   : > { %v9767_v30 = vpop.f32.mrb[178].mxu1 }
 0x67c   : > { %v11951_v7 = vpop.f32.mrb[179].mxu1 }
 0x681   : > { %v9807_v4 = vpop.f32.mrb[180].mxu0 }
 0x682   : > { %10064 = vrot.lane.b32.xlu0 %v9807_v4, %s12250_s24  ;;  %v11956_v45 = vpop.f32.mrb[181].mxu0 }
 0x683   : > { %v9810_v43 = vpop.f32.mrb[182].mxu0 }
 0x684   : > { %v11957_v3 = vpop.f32.mrb[183].mxu0 }
 0x689   : > { %v9850_v22 = vpop.f32.mrb[180].mxu1 }
 0x68a   : > { %10066 = vrot.lane.b32.xlu1 %v9850_v22, %s12250_s24  ;;  %v11962_v26 = vpop.f32.mrb[181].mxu1 }
 0x68b   : > { %v9853_v16 = vpop.f32.mrb[182].mxu1 }
 0x68c   : > { %v11963_v17 = vpop.f32.mrb[183].mxu1 }
 0x691   : > { %v9893_v58 = vpop.f32.mrb[184].mxu0 }
 0x692   : > { %10068 = vrot.lane.b32.xlu0 %v9893_v58, %s12250_s24  ;;  %v11968_v48 = vpop.f32.mrb[185].mxu0 }
 0x693   : > { %v9896_v18 = vpop.f32.mrb[186].mxu0 }
 0x694   : > { %v11969_v35 = vpop.f32.mrb[187].mxu0 }
 0x699   : > { %v9936_v25 = vpop.f32.mrb[184].mxu1 }
 0x69a   : > { %10070 = vrot.lane.b32.xlu1 %v9936_v25, %s12250_s24  ;;  %v11974_v14 = vpop.f32.mrb[185].mxu1 }
 0x69b   : > { %v9939_v29 = vpop.f32.mrb[186].mxu1 }
 0x69c   : > { %v11975_v44 = vpop.f32.mrb[187].mxu1 }
 0x6a1   : > { %v9979_v27 = vpop.f32.mrb[188].mxu0 }
 0x6a2   : > { %10072 = vrot.lane.b32.xlu0 %v9979_v27, %s12250_s24  ;;  %v11980_v24 = vpop.f32.mrb[189].mxu0 }
 0x6a3   : > { %v9982_v2 = vpop.f32.mrb[190].mxu0 }
 0x6a4   : > { %v10045_v56 = vpop.permute.xlu0 %10044  ;;  %v11981_v57 = vpop.f32.mrb[191].mxu0 }
 0x6a5   : > { %v10092_v11 = vsel %vm4215_vm2, %v14563_v8, %v10045_v56 }
 0x6a6   : > { %10108 = vst [vmem:[%s14674_s30] sm:$0x1] %v10092_v11 }
 0x6a9   : > { %v10022_v34 = vpop.f32.mrb[188].mxu1 }
 0x6aa   : > { %10074 = vrot.lane.b32.xlu1 %v10022_v34, %s12250_s24  ;;  %v11986_v42 = vpop.f32.mrb[189].mxu1 }
 0x6ab   : > { %v10025_v52 = vpop.f32.mrb[190].mxu1 }
 0x6ac   : > { %v10047_v51 = vpop.permute.xlu1 %10046  ;;  %v11987_v0 = vpop.f32.mrb[191].mxu1 }
 0x6ad   : > { %v10093_v19 = vsel %vm4215_vm2, %v14632_v47, %v10047_v51 }
 0x6ae   : > { %10109 = vst [vmem:[%s14674_s30 + $0x1] sm:$0x1] %v10093_v19 }
 0x6b4   : > { %v10049_v1 = vpop.permute.xlu0 %10048 }
 0x6b5   : > { %v10094_v10 = vsel %vm4215_vm2, %v14579_v55, %v10049_v1 }
 0x6b6   : > { %10110 = vst [vmem:[%s14674_s30 + $0x2] sm:$0x1] %v10094_v10 }
 0x6bc   : > { %v10051_v8 = vpop.permute.xlu1 %10050 }
 0x6bd   : > { %v10095_v54 = vsel %vm4215_vm2, %v14635_v31, %v10051_v8 }
 0x6be   : > { %10111 = vst [vmem:[%s14674_s30 + $0x3] sm:$0x1] %v10095_v54 }
 0x6c4   : > { %v10053_v49 = vpop.permute.xlu0 %10052 }
 0x6c5   : > { %v10096_v60 = vsel %vm4215_vm2, %v14595_v63, %v10053_v49 }
 0x6c6   : > { %10112 = vst [vmem:[%s14674_s30 + $0x4] sm:$0x1] %v10096_v60 }
 0x6cc   : > { %v10055_v47 = vpop.permute.xlu1 %10054 }
 0x6cd   : > { %v10097_v9 = vsel %vm4215_vm2, %v14639_v32, %v10055_v47 }
 0x6ce   : > { %10113 = vst [vmem:[%s14674_s30 + $0x5] sm:$0x1] %v10097_v9 }
 0x6d4   : > { %v10057_v55 = vpop.permute.xlu0 %10056 }
 0x6d5   : > { %v10098_v23 = vsel %vm4215_vm2, %v14611_v46, %v10057_v55 }
 0x6d6   : > { %10114 = vst [vmem:[%s14674_s30 + $0x6] sm:$0x1] %v10098_v23 }
 0x6dc   : > { %v10059_v31 = vpop.permute.xlu1 %10058 }
 0x6dd   : > { %v10099_v61 = vsel %vm4215_vm2, %v14641_v36, %v10059_v31 }
 0x6de   : > { %10115 = vst [vmem:[%s14674_s30 + $0x7] sm:$0x1] %v10099_v61 }
 0x6e4   : > { %v10061_v63 = vpop.permute.xlu0 %10060 }
 0x6e5   : > { %v10100_v28 = vsel %vm4215_vm2, %v14626_v20, %v10061_v63 }
 0x6e6   : > { %10116 = vst [vmem:[%s14674_s30 + $0x8] sm:$0x1] %v10100_v28 }
 0x6ec   : > { %v10063_v32 = vpop.permute.xlu1 %10062 }
 0x6ed   : > { %v10101_v13 = vsel %vm4215_vm2, %v14645_v37, %v10063_v32 }
 0x6ee   : > { %10117 = vst [vmem:[%s14674_s30 + $0x9] sm:$0x1] %v10101_v13 }
 0x6f4   : > { %v10065_v46 = vpop.permute.xlu0 %10064 }
 0x6f5   : > { %v10102_v59 = vsel %vm4215_vm2, %v14637_v38, %v10065_v46 }
 0x6f6   : > { %10118 = vst [vmem:[%s14674_s30 + $0xa] sm:$0x1] %v10102_v59 }
 0x6fc   : > { %v10067_v36 = vpop.permute.xlu1 %10066 }
 0x6fd   : > { %v10103_v5 = vsel %vm4215_vm2, %v14647_v12, %v10067_v36 }
 0x6fe   : > { %10119 = vst [vmem:[%s14674_s30 + $0xb] sm:$0x1] %v10103_v5 }
 0x704   : > { %v10069_v20 = vpop.permute.xlu0 %10068 }
 0x705   : > { %v10104_v39 = vsel %vm4215_vm2, %v14643_v41, %v10069_v20 }
 0x706   : > { %10120 = vst [vmem:[%s14674_s30 + $0xc] sm:$0x1] %v10104_v39 }
 0x70c   : > { %v10071_v50 = vpop.permute.xlu1 %10070 }
 0x70d   : > { %v10105_v37 = vsel %vm4215_vm2, %v14651_v62, %v10071_v50 }
 0x70e   : > { %10121 = vst [vmem:[%s14674_s30 + $0xd] sm:$0x1] %v10105_v37 }
 0x714   : > { %v10073_v33 = vpop.permute.xlu0 %10072 }
 0x715   : > { %v10106_v38 = vsel %vm4215_vm2, %v14649_v15, %v10073_v33 }
 0x716   : > { %10122 = vst [vmem:[%s14674_s30 + $0xe] sm:$0x1] %v10106_v38 }
 0x71c   : > { %v10075_v40 = vpop.permute.xlu1 %10074 }
 0x71d   : > { %v10107_v12 = vsel %vm4215_vm2, %v14653_v21, %v10075_v40 }
 0x71e   : > { %10123 = vst [vmem:[%s14674_s30 + $0xf] sm:$0x1] %v10107_v12 }
 0x71f PF: > { %s22_s21 = sadd.s32 1, %s12246_s21  }
 0x720   : > { %p19_p4 = scmp.ge.s32.totalorder %s22_s21, 4  }
 0x722   :  { %21 = sbr.rel (!%p19_p4) target bundleno = 1 (0x1), region = 123 }

</bundles_post_ra>
